<compile_context>
chip_gen: v7x
topology: tpu7x:2x2x1
jax: 0.10.0
libtpu: 0.0.40
codegen_flags: <defaults>
</compile_context>

<pallas_src>
import functools

import numpy as np

import jax
import jax.numpy as jnp
from jax.experimental import pallas as pl
from jax.experimental.pallas import tpu as pltpu


# ---------------------------------------------------------------------------
# Weight packing helpers (run once at init)
# ---------------------------------------------------------------------------
def _rup(n, m):
    return ((n + m - 1) // m) * m


def conv_w3_flat(w):
    """nn.Conv2d weight [Cout, Cin, 3, 3] (pad=1, height-1 input) ->
    [3*Cin, Cout], tap-major: rows [0:Cin]=left tap, [Cin:2Cin]=centre,
    [2Cin:3Cin]=right tap (only the middle kernel row touches data)."""
    return jnp.transpose(w[:, :, 1, :], (2, 1, 0)).reshape(-1, w.shape[0])


def convT_w3_flat(w):
    """nn.ConvTranspose2d weight [Cin, Cout, 3, 3] (stride 1, pad 1) ->
    [3*Cin, Cout] in the same (left, centre, right) tap order (kw flipped)."""
    return jnp.transpose(w[:, :, 1, ::-1], (2, 0, 1)).reshape(-1, w.shape[1])


def _pad_tap_rows(w_flat, cin, cin_pad):
    """[3*cin, Cout] tap-major -> [3*cin_pad, Cout] (zero rows per tap block)."""
    if cin == cin_pad:
        return w_flat
    cout = w_flat.shape[1]
    out = jnp.zeros((3 * cin_pad, cout), w_flat.dtype)
    for t in range(3):
        out = out.at[t * cin_pad:t * cin_pad + cin, :].set(
            w_flat[t * cin:(t + 1) * cin, :])
    return out


# ---------------------------------------------------------------------------
# Fused forward kernel (single grid step, everything VMEM-resident)
# ---------------------------------------------------------------------------
def _fused_vae_kernel(cols_ref, eps_ref,
                      projw_ref, projb_ref,
                      e1w_ref, e1b_ref, bn1g_ref, bn1b_ref,
                      e2w_ref, e2b_ref, bn2g_ref, bn2b_ref,
                      mlw_ref, mlb_ref,
                      diw_ref, dib_ref, bd1g_ref, bd1b_ref,
                      d1w_ref, d1b_ref, bd2g_ref, bd2b_ref,
                      d2w_ref, d2b_ref,
                      dcw_ref,
                      contrib_ref, mulv_ref,
                      *, num_valid, num_patches, latent_pad, slope, bn_eps):
    mp = cols_ref.shape[0]
    inv_m = 1.0 / float(num_valid)

    # Row bookkeeping: patch index within a batch element + valid-row mask.
    row = jax.lax.broadcasted_iota(jnp.int32, (mp, 1), 0)
    pmod = row % num_patches
    valid_b = row < num_valid                   # padded rows -> excluded from BN
    lmask_b = pmod != 0                         # patch p-1 exists (same image)
    rmask_b = pmod != (num_patches - 1)         # patch p+1 exists (same image)

    def mxu(x_f32, w_ref):
        return jnp.dot(x_f32.astype(jnp.bfloat16), w_ref[...],
                       preferred_element_type=jnp.float32)

    def conv3(x, w_ref, b_ref):
        # Width-3 conv along the flattened patch axis as ONE matmul:
        # neighbour taps via XLU sublane rolls + boundary masks, then a lane
        # concat -> [Mp, 3*Cin] against the tap-major packed [3*Cin, Cout].
        xl = jnp.where(lmask_b, pltpu.roll(x, shift=1, axis=0), 0.0)       # row m-1
        xr = jnp.where(rmask_b, pltpu.roll(x, shift=mp - 1, axis=0), 0.0)  # row m+1
        xcat = jnp.concatenate([xl, x, xr], axis=1)
        return mxu(xcat, w_ref) + b_ref[...]

    def bn_lrelu(h, g_ref, b_ref):
        # Train-mode BatchNorm (biased batch stats over the valid rows,
        # centered two-pass variance) fused with LeakyReLU.
        hm = jnp.where(valid_b, h, 0.0)
        mean = jnp.sum(hm, axis=0, keepdims=True) * inv_m
        cen = jnp.where(valid_b, h - mean, 0.0)
        var = jnp.sum(cen * cen, axis=0, keepdims=True) * inv_m
        scale = g_ref[...] * jax.lax.rsqrt(var + bn_eps)
        shift = b_ref[...] - mean * scale
        y = h * scale + shift
        return jnp.where(y >= 0, y, slope * y)

    # --- PatchEmbed.proj (Conv2d k=patch, stride=stride) as one bf16 matmul.
    tok = jnp.dot(cols_ref[...], projw_ref[...],
                  preferred_element_type=jnp.float32) + projb_ref[...]     # [Mp, Ep]

    # --- encoder
    h = bn_lrelu(conv3(tok, e1w_ref, e1b_ref), bn1g_ref, bn1b_ref)         # [Mp, 256]
    h = bn_lrelu(conv3(h, e2w_ref, e2b_ref), bn2g_ref, bn2b_ref)           # [Mp, 128]

    # --- fused, lane-padded mu | logvar head (split on a 128-lane boundary)
    mulv = conv3(h, mlw_ref, mlb_ref)                                      # [Mp, 2*Lp]
    mu = mulv[:, :latent_pad]
    logvar = mulv[:, latent_pad:]

    # --- reparameterization trick (f32)
    z = mu + eps_ref[...] * jnp.exp(0.5 * logvar)                          # [Mp, Lp]

    # --- decoder
    d = bn_lrelu(conv3(z, diw_ref, dib_ref), bd1g_ref, bd1b_ref)           # [Mp, 128]
    d = bn_lrelu(conv3(d, d1w_ref, d1b_ref), bd2g_ref, bd2b_ref)           # [Mp, 256]
    patch_recon = conv3(d, d2w_ref, d2b_ref)                               # [Mp, Ep]

    # --- PatchEmbed.deconv as a per-patch matmul (overlap-add done outside).
    contrib_ref[...] = mxu(patch_recon, dcw_ref)                           # [Mp, Dp]
    mulv_ref[...] = mulv


# ---------------------------------------------------------------------------
# PatchVAE
# ---------------------------------------------------------------------------
class PatchVAEPallas:
    def __init__(self, patch_size, img_channels, img_size, embed_dim,
                 latent_dim, stride, key):
        self.patch_size = patch_size
        self.img_size = img_size
        self.stride = stride
        self.embed_dim = embed_dim
        self.latent_dim = latent_dim
        self.img_channels = img_channels
        Ho = (img_size - patch_size) // stride + 1
        self.H_out = Ho
        self.num_patches = Ho * Ho

        E, L, C, ps = embed_dim, latent_dim, img_channels, patch_size
        # Lane-padded sizes (multiples of 128 lanes).
        self._Ep = _rup(E, 128)
        self._Lp = _rup(L, 128)
        self._K0 = C * ps * ps
        self._K0p = _rup(self._K0, 128)
        self._D0 = 3 * ps * ps
        self._Dp = _rup(self._D0, 128)

        ks = iter(jax.random.split(key, 32))

        def w(shape):
            fan = 1
            for d in shape[1:]:
                fan *= d
            return jax.random.normal(next(ks), shape, jnp.float32) / jnp.sqrt(float(fan))

        def b(n):
            return 0.01 * jax.random.normal(next(ks), (n,), jnp.float32)

        ones = lambda n: jnp.ones((n,), jnp.float32)
        zeros = lambda n: jnp.zeros((n,), jnp.float32)

        p = dict(
            proj_w=w((E, C, ps, ps)), proj_b=b(E),          # PatchEmbed.proj
            deconv_w=w((E, 3, ps, ps)), deconv_b=b(3),      # PatchEmbed.deconv
            enc1_w=w((256, E, 3, 3)), enc1_b=b(256),        # encoder conv1
            bn1_g=ones(256), bn1_b=zeros(256),
            enc2_w=w((128, 256, 3, 3)), enc2_b=b(128),      # encoder conv2
            bn2_g=ones(128), bn2_b=zeros(128),
            mu_w=w((L, 128, 3, 3)), mu_b=b(L),              # conv_mu
            lv_w=w((L, 128, 3, 3)), lv_b=b(L),              # conv_logvar
            dec_in_w=w((128, L, 3, 3)), dec_in_b=b(128),    # decoder_input
            bnd1_g=ones(128), bnd1_b=zeros(128),
            dec1_w=w((128, 256, 3, 3)), dec1_b=b(256),      # ConvT 128->256
            bnd2_g=ones(256), bnd2_b=zeros(256),
            dec2_w=w((256, E, 3, 3)), dec2_b=b(E),          # ConvT 256->E
        )
        self.p = p

        # --- pack all weights once into kernel-ready, lane-padded 2-D layouts.
        Ep, Lp, K0, K0p, D0, Dp = self._Ep, self._Lp, self._K0, self._K0p, self._D0, self._Dp
        bf16 = lambda a: a.astype(jnp.bfloat16)
        row = lambda v: v.reshape(1, -1)

        projw = jnp.zeros((K0p, Ep), jnp.float32)
        projw = projw.at[:K0, :E].set(p['proj_w'].reshape(E, -1).T)
        projb = jnp.zeros((1, Ep), jnp.float32).at[0, :E].set(p['proj_b'])

        e1w = _pad_tap_rows(conv_w3_flat(p['enc1_w']), E, Ep)              # [3Ep, 256]
        e2w = conv_w3_flat(p['enc2_w'])                                    # [768, 128]

        mlw = jnp.zeros((3 * 128, 2 * Lp), jnp.float32)
        mlw = mlw.at[:, :L].set(conv_w3_flat(p['mu_w']))
        mlw = mlw.at[:, Lp:Lp + L].set(conv_w3_flat(p['lv_w']))
        mlb = jnp.zeros((1, 2 * Lp), jnp.float32)
        mlb = mlb.at[0, :L].set(p['mu_b']).at[0, Lp:Lp + L].set(p['lv_b'])

        diw = _pad_tap_rows(conv_w3_flat(p['dec_in_w']), L, Lp)            # [3Lp, 128]
        d1w = convT_w3_flat(p['dec1_w'])                                   # [384, 256]

        d2w = jnp.zeros((3 * 256, Ep), jnp.float32)
        d2w = d2w.at[:, :E].set(convT_w3_flat(p['dec2_w']))
        d2b = jnp.zeros((1, Ep), jnp.float32).at[0, :E].set(p['dec2_b'])

        dcw = jnp.zeros((Ep, Dp), jnp.float32)
        dcw = dcw.at[:E, :D0].set(p['deconv_w'].reshape(E, -1))

        self._weights = [
            bf16(projw), projb,
            bf16(e1w), row(p['enc1_b']), row(p['bn1_g']), row(p['bn1_b']),
            bf16(e2w), row(p['enc2_b']), row(p['bn2_g']), row(p['bn2_b']),
            bf16(mlw), mlb,
            bf16(diw), row(p['dec_in_b']), row(p['bnd1_g']), row(p['bnd1_b']),
            bf16(d1w), row(p['dec1_b']), row(p['bnd2_g']), row(p['bnd2_b']),
            bf16(d2w), d2b,
            bf16(dcw),
        ]
        self._deconv_b = p['deconv_b']

        # --- one-hot col2im matrix: overlap-add as a dense matmul, no scatter.
        out_sz = (Ho - 1) * stride + ps
        self._out_sz = out_sz
        hh, ww, aa, bb = np.meshgrid(np.arange(Ho), np.arange(Ho),
                                     np.arange(ps), np.arange(ps), indexing="ij")
        pidx = (hh * Ho + ww).reshape(-1)
        jidx = (aa * ps + bb).reshape(-1)
        oidx = ((hh * stride + aa) * out_sz + (ww * stride + bb)).reshape(-1)
        S = np.zeros((self.num_patches, ps * ps, out_sz * out_sz), np.float32)
        S[pidx, jidx, oidx] = 1.0
        self._col2im_S = jnp.asarray(S)

    # ------------------------------------------------------------------ glue
    def _extract_patches(self, x):
        """x [B, C, H, W] -> [B*P, C*ps*ps] via strided slices (no gather)."""
        B, C, _, _ = x.shape
        ps, s, Ho = self.patch_size, self.stride, self.H_out
        stop = (Ho - 1) * s + 1
        slabs = []
        for ph in range(ps):
            for pw in range(ps):
                slabs.append(x[:, :, ph:ph + stop:s, pw:pw + stop:s])      # [B,C,Ho,Wo]
        pat = jnp.stack(slabs, axis=-1)                                    # [B,C,Ho,Wo,ps*ps]
        pat = jnp.transpose(pat, (0, 2, 3, 1, 4))                          # [B,Ho,Wo,C,ps*ps]
        return pat.reshape(B * Ho * Ho, C * ps * ps)

    def _run_fused(self, cols, eps, num_valid):
        Mp = cols.shape[0]
        Lp, Dp = self._Lp, self._Dp
        inputs = [cols, eps] + self._weights
        kernel = functools.partial(
            _fused_vae_kernel,
            num_valid=num_valid, num_patches=self.num_patches,
            latent_pad=Lp, slope=0.2, bn_eps=1e-5)
        in_specs = [pl.BlockSpec(a.shape, lambda i: (0, 0)) for a in inputs]
        out_shape = (jax.ShapeDtypeStruct((Mp, Dp), jnp.float32),
                     jax.ShapeDtypeStruct((Mp, 2 * Lp), jnp.float32))
        out_specs = (pl.BlockSpec((Mp, Dp), lambda i: (0, 0)),
                     pl.BlockSpec((Mp, 2 * Lp), lambda i: (0, 0)))
        in_bytes = sum(int(np.prod(a.shape)) * a.dtype.itemsize for a in inputs)
        out_bytes = (Mp * Dp + Mp * 2 * Lp) * 4
        vmem_limit = int(min(64 << 20,
                             max(8 << 20, 2 * (in_bytes + out_bytes) + (4 << 20))))
        return pl.pallas_call(
            kernel,
            out_shape=out_shape,
            grid=(1,),
            in_specs=in_specs,
            out_specs=out_specs,
            compiler_params=pltpu.CompilerParams(
                dimension_semantics=("arbitrary",),
                vmem_limit_bytes=vmem_limit),
        )(*inputs)

    # --------------------------------------------------------------- forward
    def forward(self, x, key_eps):
        B = x.shape[0]
        P, L, Lp = self.num_patches, self.latent_dim, self._Lp
        ps = self.patch_size
        M = B * P
        Mp = _rup(M, 16)          # bf16 sublane alignment for the row axis

        cols = self._extract_patches(x)                                    # [M, C*ps*ps]
        cols = jnp.pad(cols, ((0, Mp - M), (0, self._K0p - self._K0)))
        cols = cols.astype(jnp.bfloat16)

        eps = jax.random.normal(key_eps, (Mp, Lp), jnp.float32)

        contrib_p, mulv = self._run_fused(cols, eps, M)

        mu = mulv[:M, :L]
        logvar = mulv[:M, Lp:Lp + L]
        contrib = contrib_p[:M, :self._D0]                                 # [M, 3*ps*ps]

        # --- deconv overlap-add (col2im) as one dense one-hot matmul + bias.
        out_sz = self._out_sz
        assert out_sz == self.img_size
        # TODO(synk): general bilinear resize for mismatched deconv output
        # sizes not implemented (F.interpolate is the identity at these shapes).
        c4 = contrib.reshape(B, P, 3, ps * ps)
        img = jnp.einsum('bpcj,pjo->bco', c4, self._col2im_S)              # [B,3,out*out]
        img = img.reshape(B, 3, out_sz, out_sz) + self._deconv_b.reshape(1, 3, 1, 1)

        mu4 = mu.reshape(B, P, L).transpose(0, 2, 1)[:, :, None, :]        # [B, L, 1, P]
        lv4 = logvar.reshape(B, P, L).transpose(0, 2, 1)[:, :, None, :]
        return img, mu4, lv4


if __name__ == "__main__":
    key = jax.random.PRNGKey(0)
    k_param, k_x, k_eps = jax.random.split(key, 3)

    B, C, IMG = 2, 3, 16
    model = PatchVAEPallas(patch_size=8, img_channels=C, img_size=IMG,
                           embed_dim=64, latent_dim=32, stride=4, key=k_param)

    x = jax.random.normal(k_x, (B, C, IMG, IMG), jnp.float32)
    fwd = jax.jit(model.forward)
    recon, mu, logvar = fwd(x, k_eps)
    (recon, mu, logvar) = jax.block_until_ready((recon, mu, logvar))

    assert recon.shape == (B, 3, IMG, IMG)
    assert mu.shape == (B, 32, 1, model.num_patches)
    assert logvar.shape == (B, 32, 1, model.num_patches)
    assert jnp.all(jnp.isfinite(recon)) and jnp.all(jnp.isfinite(mu))
    assert jnp.all(jnp.isfinite(logvar))
    print("KERNEL_OK")
</pallas_src>

<mosaic_0001>
module attributes {stable_mosaic.version = 11 : i64} {
  func.func @_fused_vae_kernel(%arg0: i32, %arg1: memref<32x256xbf16, #tpu.memory_space<vmem>>, %arg2: memref<32x128xf32, #tpu.memory_space<vmem>>, %arg3: memref<256x128xbf16, #tpu.memory_space<vmem>>, %arg4: memref<1x128xf32, #tpu.memory_space<vmem>>, %arg5: memref<384x256xbf16, #tpu.memory_space<vmem>>, %arg6: memref<1x256xf32, #tpu.memory_space<vmem>>, %arg7: memref<1x256xf32, #tpu.memory_space<vmem>>, %arg8: memref<1x256xf32, #tpu.memory_space<vmem>>, %arg9: memref<768x128xbf16, #tpu.memory_space<vmem>>, %arg10: memref<1x128xf32, #tpu.memory_space<vmem>>, %arg11: memref<1x128xf32, #tpu.memory_space<vmem>>, %arg12: memref<1x128xf32, #tpu.memory_space<vmem>>, %arg13: memref<384x256xbf16, #tpu.memory_space<vmem>>, %arg14: memref<1x256xf32, #tpu.memory_space<vmem>>, %arg15: memref<384x128xbf16, #tpu.memory_space<vmem>>, %arg16: memref<1x128xf32, #tpu.memory_space<vmem>>, %arg17: memref<1x128xf32, #tpu.memory_space<vmem>>, %arg18: memref<1x128xf32, #tpu.memory_space<vmem>>, %arg19: memref<384x256xbf16, #tpu.memory_space<vmem>>, %arg20: memref<1x256xf32, #tpu.memory_space<vmem>>, %arg21: memref<1x256xf32, #tpu.memory_space<vmem>>, %arg22: memref<1x256xf32, #tpu.memory_space<vmem>>, %arg23: memref<768x128xbf16, #tpu.memory_space<vmem>>, %arg24: memref<1x128xf32, #tpu.memory_space<vmem>>, %arg25: memref<128x256xbf16, #tpu.memory_space<vmem>>, %arg26: memref<32x256xf32, #tpu.memory_space<vmem>>, %arg27: memref<32x256xf32, #tpu.memory_space<vmem>>) attributes {dimension_semantics = [#tpu.dimension_semantics<arbitrary>], iteration_bounds = array<i64: 1>, scalar_prefetch = 0 : i64, scratch_operands = 0 : i64, tpu.core_type = #tpu.core_type<tc>, window_params = [{pipeline_mode = #tpu.pipeline_mode<synchronous>, transform_indices = @transform_0, window_bounds = array<i64: 32, 256>}, {pipeline_mode = #tpu.pipeline_mode<synchronous>, transform_indices = @transform_1, window_bounds = array<i64: 32, 128>}, {pipeline_mode = #tpu.pipeline_mode<synchronous>, transform_indices = @transform_2, window_bounds = array<i64: 256, 128>}, {pipeline_mode = #tpu.pipeline_mode<synchronous>, transform_indices = @transform_3, window_bounds = array<i64: 1, 128>}, {pipeline_mode = #tpu.pipeline_mode<synchronous>, transform_indices = @transform_4, window_bounds = array<i64: 384, 256>}, {pipeline_mode = #tpu.pipeline_mode<synchronous>, transform_indices = @transform_5, window_bounds = array<i64: 1, 256>}, {pipeline_mode = #tpu.pipeline_mode<synchronous>, transform_indices = @transform_6, window_bounds = array<i64: 1, 256>}, {pipeline_mode = #tpu.pipeline_mode<synchronous>, transform_indices = @transform_7, window_bounds = array<i64: 1, 256>}, {pipeline_mode = #tpu.pipeline_mode<synchronous>, transform_indices = @transform_8, window_bounds = array<i64: 768, 128>}, {pipeline_mode = #tpu.pipeline_mode<synchronous>, transform_indices = @transform_9, window_bounds = array<i64: 1, 128>}, {pipeline_mode = #tpu.pipeline_mode<synchronous>, transform_indices = @transform_10, window_bounds = array<i64: 1, 128>}, {pipeline_mode = #tpu.pipeline_mode<synchronous>, transform_indices = @transform_11, window_bounds = array<i64: 1, 128>}, {pipeline_mode = #tpu.pipeline_mode<synchronous>, transform_indices = @transform_12, window_bounds = array<i64: 384, 256>}, {pipeline_mode = #tpu.pipeline_mode<synchronous>, transform_indices = @transform_13, window_bounds = array<i64: 1, 256>}, {pipeline_mode = #tpu.pipeline_mode<synchronous>, transform_indices = @transform_14, window_bounds = array<i64: 384, 128>}, {pipeline_mode = #tpu.pipeline_mode<synchronous>, transform_indices = @transform_15, window_bounds = array<i64: 1, 128>}, {pipeline_mode = #tpu.pipeline_mode<synchronous>, transform_indices = @transform_16, window_bounds = array<i64: 1, 128>}, {pipeline_mode = #tpu.pipeline_mode<synchronous>, transform_indices = @transform_17, window_bounds = array<i64: 1, 128>}, {pipeline_mode = #tpu.pipeline_mode<synchronous>, transform_indices = @transform_18, window_bounds = array<i64: 384, 256>}, {pipeline_mode = #tpu.pipeline_mode<synchronous>, transform_indices = @transform_19, window_bounds = array<i64: 1, 256>}, {pipeline_mode = #tpu.pipeline_mode<synchronous>, transform_indices = @transform_20, window_bounds = array<i64: 1, 256>}, {pipeline_mode = #tpu.pipeline_mode<synchronous>, transform_indices = @transform_21, window_bounds = array<i64: 1, 256>}, {pipeline_mode = #tpu.pipeline_mode<synchronous>, transform_indices = @transform_22, window_bounds = array<i64: 768, 128>}, {pipeline_mode = #tpu.pipeline_mode<synchronous>, transform_indices = @transform_23, window_bounds = array<i64: 1, 128>}, {pipeline_mode = #tpu.pipeline_mode<synchronous>, transform_indices = @transform_24, window_bounds = array<i64: 128, 256>}, {pipeline_mode = #tpu.pipeline_mode<synchronous>, transform_indices = @transform_25, window_bounds = array<i64: 32, 256>}, {pipeline_mode = #tpu.pipeline_mode<synchronous>, transform_indices = @transform_26, window_bounds = array<i64: 32, 256>}]} {
    %0 = tpu.iota {dimensions = array<i32: 0>} : vector<32x1xi32>
    %c9_i32 = arith.constant 9 : i32
    %c0_i32 = arith.constant 0 : i32
    %1 = arith.cmpi eq, %c9_i32, %c0_i32 : i32
    %c1_i32 = arith.constant 1 : i32
    %2 = arith.select %1, %c1_i32, %c9_i32 : i32
    %3 = vector.broadcast %2 : i32 to vector<32x1xi32>
    %4 = arith.remsi %0, %3 : vector<32x1xi32>
    %c0_i32_0 = arith.constant 0 : i32
    %5 = vector.broadcast %c0_i32_0 : i32 to vector<32x1xi32>
    %6 = arith.cmpi ne, %4, %5 : vector<32x1xi32>
    %c0_i32_1 = arith.constant 0 : i32
    %7 = vector.broadcast %c0_i32_1 : i32 to vector<32x1xi32>
    %8 = arith.cmpi slt, %4, %7 : vector<32x1xi32>
    %c0_i32_2 = arith.constant 0 : i32
    %9 = arith.cmpi slt, %2, %c0_i32_2 : i32
    %10 = vector.broadcast %9 : i1 to vector<32x1xi1>
    %11 = vector.broadcast %10 : vector<32x1xi1> to vector<32x1xi1>
    %12 = arith.xori %8, %11 : vector<32x1xi1>
    %13 = arith.andi %12, %6 : vector<32x1xi1>
    %14 = vector.broadcast %2 : i32 to vector<32x1xi32>
    %15 = arith.addi %4, %14 : vector<32x1xi32>
    %16 = arith.select %13, %15, %4 : vector<32x1xi1>, vector<32x1xi32>
    %c18_i32 = arith.constant 18 : i32
    %17 = vector.broadcast %c18_i32 : i32 to vector<32x1xi32>
    %18 = arith.cmpi slt, %0, %17 : vector<32x1xi32>
    %c0_i32_3 = arith.constant 0 : i32
    %19 = vector.broadcast %c0_i32_3 : i32 to vector<32x1xi32>
    %20 = arith.cmpi ne, %16, %19 : vector<32x1xi32>
    %c8_i32 = arith.constant 8 : i32
    %21 = vector.broadcast %c8_i32 : i32 to vector<32x1xi32>
    %22 = arith.cmpi ne, %16, %21 : vector<32x1xi32>
    %c0 = arith.constant 0 : index
    %c0_4 = arith.constant 0 : index
    %23 = vector.load %arg1[%c0, %c0_4] : memref<32x256xbf16, #tpu.memory_space<vmem>>, vector<32x256xbf16>
    %c0_5 = arith.constant 0 : index
    %c0_6 = arith.constant 0 : index
    %24 = vector.load %arg3[%c0_5, %c0_6] : memref<256x128xbf16, #tpu.memory_space<vmem>>, vector<256x128xbf16>
    %cst = arith.constant dense<0.000000e+00> : vector<32x128xf32>
    %25 = tpu.matmul %23, %24, %cst {dimension_numbers = #tpu.dot_dimension_numbers<[1], [0], [0], [1], [0, 0, 1, 1], [], []>} : vector<32x256xbf16>, vector<256x128xbf16>, vector<32x128xf32> -> vector<32x128xf32>
    %c0_7 = arith.constant 0 : index
    %c0_8 = arith.constant 0 : index
    %26 = vector.load %arg4[%c0_7, %c0_8] : memref<1x128xf32, #tpu.memory_space<vmem>>, vector<1x128xf32>
    %27 = vector.broadcast %26 : vector<1x128xf32> to vector<32x128xf32>
    %28 = arith.addf %25, %27 : vector<32x128xf32>
    %c1_i32_9 = arith.constant 1 : i32
    %29 = tpu.dynamic_rotate %28 by %c1_i32_9 dim 0 : vector<32x128xf32>, i32 -> vector<32x128xf32>
    %cst_10 = arith.constant 0.000000e+00 : f32
    %30 = vector.shape_cast %20 : vector<32x1xi1> to vector<32x1xi1>
    %31 = vector.broadcast %30 : vector<32x1xi1> to vector<32x128xi1>
    %32 = vector.broadcast %cst_10 : f32 to vector<32x128xf32>
    %33 = arith.select %31, %29, %32 : vector<32x128xi1>, vector<32x128xf32>
    %c31_i32 = arith.constant 31 : i32
    %34 = tpu.dynamic_rotate %28 by %c31_i32 dim 0 : vector<32x128xf32>, i32 -> vector<32x128xf32>
    %cst_11 = arith.constant 0.000000e+00 : f32
    %35 = vector.shape_cast %22 : vector<32x1xi1> to vector<32x1xi1>
    %36 = vector.broadcast %35 : vector<32x1xi1> to vector<32x128xi1>
    %37 = vector.broadcast %cst_11 : f32 to vector<32x128xf32>
    %38 = arith.select %36, %34, %37 : vector<32x128xi1>, vector<32x128xf32>
    %39 = tpu.concatenate %33, %28, %38 in 1 : vector<32x128xf32>, vector<32x128xf32>, vector<32x128xf32> -> vector<32x384xf32>
    %40 = arith.truncf %39 : vector<32x384xf32> to vector<32x384xbf16>
    %c0_12 = arith.constant 0 : index
    %c0_13 = arith.constant 0 : index
    %41 = vector.load %arg5[%c0_12, %c0_13] : memref<384x256xbf16, #tpu.memory_space<vmem>>, vector<384x256xbf16>
    %cst_14 = arith.constant dense<0.000000e+00> : vector<32x256xf32>
    %42 = tpu.matmul %40, %41, %cst_14 {dimension_numbers = #tpu.dot_dimension_numbers<[1], [0], [0], [1], [0, 0, 1, 1], [], []>} : vector<32x384xbf16>, vector<384x256xbf16>, vector<32x256xf32> -> vector<32x256xf32>
    %c0_15 = arith.constant 0 : index
    %c0_16 = arith.constant 0 : index
    %43 = vector.load %arg6[%c0_15, %c0_16] : memref<1x256xf32, #tpu.memory_space<vmem>>, vector<1x256xf32>
    %44 = vector.broadcast %43 : vector<1x256xf32> to vector<32x256xf32>
    %45 = arith.addf %42, %44 : vector<32x256xf32>
    %cst_17 = arith.constant 0.000000e+00 : f32
    %46 = vector.shape_cast %18 : vector<32x1xi1> to vector<32x1xi1>
    %47 = vector.broadcast %46 : vector<32x1xi1> to vector<32x256xi1>
    %48 = vector.broadcast %cst_17 : f32 to vector<32x256xf32>
    %49 = arith.select %47, %45, %48 : vector<32x256xi1>, vector<32x256xf32>
    %cst_18 = arith.constant dense<0.000000e+00> : vector<256xf32>
    %50 = vector.multi_reduction <add>, %49, %cst_18 [0] : vector<32x256xf32> to vector<256xf32>
    %51 = vector.shape_cast %50 : vector<256xf32> to vector<1x256xf32>
    %cst_19 = arith.constant 0.055555556 : f32
    %52 = vector.broadcast %cst_19 : f32 to vector<1x256xf32>
    %53 = arith.mulf %51, %52 : vector<1x256xf32>
    %54 = vector.broadcast %53 : vector<1x256xf32> to vector<32x256xf32>
    %55 = arith.subf %45, %54 : vector<32x256xf32>
    %cst_20 = arith.constant 0.000000e+00 : f32
    %56 = vector.shape_cast %18 : vector<32x1xi1> to vector<32x1xi1>
    %57 = vector.broadcast %56 : vector<32x1xi1> to vector<32x256xi1>
    %58 = vector.broadcast %cst_20 : f32 to vector<32x256xf32>
    %59 = arith.select %57, %55, %58 : vector<32x256xi1>, vector<32x256xf32>
    %60 = arith.mulf %59, %59 : vector<32x256xf32>
    %cst_21 = arith.constant dense<0.000000e+00> : vector<256xf32>
    %61 = vector.multi_reduction <add>, %60, %cst_21 [0] : vector<32x256xf32> to vector<256xf32>
    %62 = vector.shape_cast %61 : vector<256xf32> to vector<1x256xf32>
    %cst_22 = arith.constant 0.055555556 : f32
    %63 = vector.broadcast %cst_22 : f32 to vector<1x256xf32>
    %64 = arith.mulf %62, %63 : vector<1x256xf32>
    %c0_23 = arith.constant 0 : index
    %c0_24 = arith.constant 0 : index
    %65 = vector.load %arg7[%c0_23, %c0_24] : memref<1x256xf32, #tpu.memory_space<vmem>>, vector<1x256xf32>
    %cst_25 = arith.constant 9.99999974E-6 : f32
    %66 = vector.broadcast %cst_25 : f32 to vector<1x256xf32>
    %67 = arith.addf %64, %66 : vector<1x256xf32>
    %68 = math.rsqrt %67 : vector<1x256xf32>
    %69 = arith.mulf %65, %68 : vector<1x256xf32>
    %c0_26 = arith.constant 0 : index
    %c0_27 = arith.constant 0 : index
    %70 = vector.load %arg8[%c0_26, %c0_27] : memref<1x256xf32, #tpu.memory_space<vmem>>, vector<1x256xf32>
    %71 = arith.mulf %53, %69 : vector<1x256xf32>
    %72 = arith.subf %70, %71 : vector<1x256xf32>
    %73 = vector.broadcast %69 : vector<1x256xf32> to vector<32x256xf32>
    %74 = arith.mulf %45, %73 : vector<32x256xf32>
    %75 = vector.broadcast %72 : vector<1x256xf32> to vector<32x256xf32>
    %76 = arith.addf %74, %75 : vector<32x256xf32>
    %cst_28 = arith.constant 0.000000e+00 : f32
    %77 = vector.broadcast %cst_28 : f32 to vector<32x256xf32>
    %78 = arith.cmpf oge, %76, %77 : vector<32x256xf32>
    %cst_29 = arith.constant 2.000000e-01 : f32
    %79 = vector.broadcast %cst_29 : f32 to vector<32x256xf32>
    %80 = arith.mulf %79, %76 : vector<32x256xf32>
    %81 = arith.select %78, %76, %80 : vector<32x256xi1>, vector<32x256xf32>
    %c1_i32_30 = arith.constant 1 : i32
    %82 = tpu.dynamic_rotate %81 by %c1_i32_30 dim 0 : vector<32x256xf32>, i32 -> vector<32x256xf32>
    %cst_31 = arith.constant 0.000000e+00 : f32
    %83 = vector.shape_cast %20 : vector<32x1xi1> to vector<32x1xi1>
    %84 = vector.broadcast %83 : vector<32x1xi1> to vector<32x256xi1>
    %85 = vector.broadcast %cst_31 : f32 to vector<32x256xf32>
    %86 = arith.select %84, %82, %85 : vector<32x256xi1>, vector<32x256xf32>
    %c31_i32_32 = arith.constant 31 : i32
    %87 = tpu.dynamic_rotate %81 by %c31_i32_32 dim 0 : vector<32x256xf32>, i32 -> vector<32x256xf32>
    %cst_33 = arith.constant 0.000000e+00 : f32
    %88 = vector.shape_cast %22 : vector<32x1xi1> to vector<32x1xi1>
    %89 = vector.broadcast %88 : vector<32x1xi1> to vector<32x256xi1>
    %90 = vector.broadcast %cst_33 : f32 to vector<32x256xf32>
    %91 = arith.select %89, %87, %90 : vector<32x256xi1>, vector<32x256xf32>
    %92 = tpu.concatenate %86, %81, %91 in 1 : vector<32x256xf32>, vector<32x256xf32>, vector<32x256xf32> -> vector<32x768xf32>
    %93 = arith.truncf %92 : vector<32x768xf32> to vector<32x768xbf16>
    %c0_34 = arith.constant 0 : index
    %c0_35 = arith.constant 0 : index
    %94 = vector.load %arg9[%c0_34, %c0_35] : memref<768x128xbf16, #tpu.memory_space<vmem>>, vector<768x128xbf16>
    %cst_36 = arith.constant dense<0.000000e+00> : vector<32x128xf32>
    %95 = tpu.matmul %93, %94, %cst_36 {dimension_numbers = #tpu.dot_dimension_numbers<[1], [0], [0], [1], [0, 0, 1, 1], [], []>} : vector<32x768xbf16>, vector<768x128xbf16>, vector<32x128xf32> -> vector<32x128xf32>
    %c0_37 = arith.constant 0 : index
    %c0_38 = arith.constant 0 : index
    %96 = vector.load %arg10[%c0_37, %c0_38] : memref<1x128xf32, #tpu.memory_space<vmem>>, vector<1x128xf32>
    %97 = vector.broadcast %96 : vector<1x128xf32> to vector<32x128xf32>
    %98 = arith.addf %95, %97 : vector<32x128xf32>
    %cst_39 = arith.constant 0.000000e+00 : f32
    %99 = vector.shape_cast %18 : vector<32x1xi1> to vector<32x1xi1>
    %100 = vector.broadcast %99 : vector<32x1xi1> to vector<32x128xi1>
    %101 = vector.broadcast %cst_39 : f32 to vector<32x128xf32>
    %102 = arith.select %100, %98, %101 : vector<32x128xi1>, vector<32x128xf32>
    %cst_40 = arith.constant dense<0.000000e+00> : vector<128xf32>
    %103 = vector.multi_reduction <add>, %102, %cst_40 [0] : vector<32x128xf32> to vector<128xf32>
    %104 = vector.shape_cast %103 : vector<128xf32> to vector<1x128xf32>
    %cst_41 = arith.constant 0.055555556 : f32
    %105 = vector.broadcast %cst_41 : f32 to vector<1x128xf32>
    %106 = arith.mulf %104, %105 : vector<1x128xf32>
    %107 = vector.broadcast %106 : vector<1x128xf32> to vector<32x128xf32>
    %108 = arith.subf %98, %107 : vector<32x128xf32>
    %cst_42 = arith.constant 0.000000e+00 : f32
    %109 = vector.shape_cast %18 : vector<32x1xi1> to vector<32x1xi1>
    %110 = vector.broadcast %109 : vector<32x1xi1> to vector<32x128xi1>
    %111 = vector.broadcast %cst_42 : f32 to vector<32x128xf32>
    %112 = arith.select %110, %108, %111 : vector<32x128xi1>, vector<32x128xf32>
    %113 = arith.mulf %112, %112 : vector<32x128xf32>
    %cst_43 = arith.constant dense<0.000000e+00> : vector<128xf32>
    %114 = vector.multi_reduction <add>, %113, %cst_43 [0] : vector<32x128xf32> to vector<128xf32>
    %115 = vector.shape_cast %114 : vector<128xf32> to vector<1x128xf32>
    %cst_44 = arith.constant 0.055555556 : f32
    %116 = vector.broadcast %cst_44 : f32 to vector<1x128xf32>
    %117 = arith.mulf %115, %116 : vector<1x128xf32>
    %c0_45 = arith.constant 0 : index
    %c0_46 = arith.constant 0 : index
    %118 = vector.load %arg11[%c0_45, %c0_46] : memref<1x128xf32, #tpu.memory_space<vmem>>, vector<1x128xf32>
    %cst_47 = arith.constant 9.99999974E-6 : f32
    %119 = vector.broadcast %cst_47 : f32 to vector<1x128xf32>
    %120 = arith.addf %117, %119 : vector<1x128xf32>
    %121 = math.rsqrt %120 : vector<1x128xf32>
    %122 = arith.mulf %118, %121 : vector<1x128xf32>
    %c0_48 = arith.constant 0 : index
    %c0_49 = arith.constant 0 : index
    %123 = vector.load %arg12[%c0_48, %c0_49] : memref<1x128xf32, #tpu.memory_space<vmem>>, vector<1x128xf32>
    %124 = arith.mulf %106, %122 : vector<1x128xf32>
    %125 = arith.subf %123, %124 : vector<1x128xf32>
    %126 = vector.broadcast %122 : vector<1x128xf32> to vector<32x128xf32>
    %127 = arith.mulf %98, %126 : vector<32x128xf32>
    %128 = vector.broadcast %125 : vector<1x128xf32> to vector<32x128xf32>
    %129 = arith.addf %127, %128 : vector<32x128xf32>
    %cst_50 = arith.constant 0.000000e+00 : f32
    %130 = vector.broadcast %cst_50 : f32 to vector<32x128xf32>
    %131 = arith.cmpf oge, %129, %130 : vector<32x128xf32>
    %cst_51 = arith.constant 2.000000e-01 : f32
    %132 = vector.broadcast %cst_51 : f32 to vector<32x128xf32>
    %133 = arith.mulf %132, %129 : vector<32x128xf32>
    %134 = arith.select %131, %129, %133 : vector<32x128xi1>, vector<32x128xf32>
    %c1_i32_52 = arith.constant 1 : i32
    %135 = tpu.dynamic_rotate %134 by %c1_i32_52 dim 0 : vector<32x128xf32>, i32 -> vector<32x128xf32>
    %cst_53 = arith.constant 0.000000e+00 : f32
    %136 = vector.shape_cast %20 : vector<32x1xi1> to vector<32x1xi1>
    %137 = vector.broadcast %136 : vector<32x1xi1> to vector<32x128xi1>
    %138 = vector.broadcast %cst_53 : f32 to vector<32x128xf32>
    %139 = arith.select %137, %135, %138 : vector<32x128xi1>, vector<32x128xf32>
    %c31_i32_54 = arith.constant 31 : i32
    %140 = tpu.dynamic_rotate %134 by %c31_i32_54 dim 0 : vector<32x128xf32>, i32 -> vector<32x128xf32>
    %cst_55 = arith.constant 0.000000e+00 : f32
    %141 = vector.shape_cast %22 : vector<32x1xi1> to vector<32x1xi1>
    %142 = vector.broadcast %141 : vector<32x1xi1> to vector<32x128xi1>
    %143 = vector.broadcast %cst_55 : f32 to vector<32x128xf32>
    %144 = arith.select %142, %140, %143 : vector<32x128xi1>, vector<32x128xf32>
    %145 = tpu.concatenate %139, %134, %144 in 1 : vector<32x128xf32>, vector<32x128xf32>, vector<32x128xf32> -> vector<32x384xf32>
    %146 = arith.truncf %145 : vector<32x384xf32> to vector<32x384xbf16>
    %c0_56 = arith.constant 0 : index
    %c0_57 = arith.constant 0 : index
    %147 = vector.load %arg13[%c0_56, %c0_57] : memref<384x256xbf16, #tpu.memory_space<vmem>>, vector<384x256xbf16>
    %cst_58 = arith.constant dense<0.000000e+00> : vector<32x256xf32>
    %148 = tpu.matmul %146, %147, %cst_58 {dimension_numbers = #tpu.dot_dimension_numbers<[1], [0], [0], [1], [0, 0, 1, 1], [], []>} : vector<32x384xbf16>, vector<384x256xbf16>, vector<32x256xf32> -> vector<32x256xf32>
    %c0_59 = arith.constant 0 : index
    %c0_60 = arith.constant 0 : index
    %149 = vector.load %arg14[%c0_59, %c0_60] : memref<1x256xf32, #tpu.memory_space<vmem>>, vector<1x256xf32>
    %150 = vector.broadcast %149 : vector<1x256xf32> to vector<32x256xf32>
    %151 = arith.addf %148, %150 : vector<32x256xf32>
    %152 = vector.extract_strided_slice %151 {offsets = [0, 0], sizes = [32, 128], strides = [1, 1]} : vector<32x256xf32> to vector<32x128xf32>
    %153 = vector.extract_strided_slice %151 {offsets = [0, 128], sizes = [32, 128], strides = [1, 1]} : vector<32x256xf32> to vector<32x128xf32>
    %c0_61 = arith.constant 0 : index
    %c0_62 = arith.constant 0 : index
    %154 = vector.load %arg2[%c0_61, %c0_62] : memref<32x128xf32, #tpu.memory_space<vmem>>, vector<32x128xf32>
    %cst_63 = arith.constant 5.000000e-01 : f32
    %155 = vector.broadcast %cst_63 : f32 to vector<32x128xf32>
    %156 = arith.mulf %155, %153 : vector<32x128xf32>
    %157 = math.exp %156 : vector<32x128xf32>
    %158 = arith.mulf %154, %157 : vector<32x128xf32>
    %159 = arith.addf %152, %158 : vector<32x128xf32>
    %c1_i32_64 = arith.constant 1 : i32
    %160 = tpu.dynamic_rotate %159 by %c1_i32_64 dim 0 : vector<32x128xf32>, i32 -> vector<32x128xf32>
    %cst_65 = arith.constant 0.000000e+00 : f32
    %161 = vector.shape_cast %20 : vector<32x1xi1> to vector<32x1xi1>
    %162 = vector.broadcast %161 : vector<32x1xi1> to vector<32x128xi1>
    %163 = vector.broadcast %cst_65 : f32 to vector<32x128xf32>
    %164 = arith.select %162, %160, %163 : vector<32x128xi1>, vector<32x128xf32>
    %c31_i32_66 = arith.constant 31 : i32
    %165 = tpu.dynamic_rotate %159 by %c31_i32_66 dim 0 : vector<32x128xf32>, i32 -> vector<32x128xf32>
    %cst_67 = arith.constant 0.000000e+00 : f32
    %166 = vector.shape_cast %22 : vector<32x1xi1> to vector<32x1xi1>
    %167 = vector.broadcast %166 : vector<32x1xi1> to vector<32x128xi1>
    %168 = vector.broadcast %cst_67 : f32 to vector<32x128xf32>
    %169 = arith.select %167, %165, %168 : vector<32x128xi1>, vector<32x128xf32>
    %170 = tpu.concatenate %164, %159, %169 in 1 : vector<32x128xf32>, vector<32x128xf32>, vector<32x128xf32> -> vector<32x384xf32>
    %171 = arith.truncf %170 : vector<32x384xf32> to vector<32x384xbf16>
    %c0_68 = arith.constant 0 : index
    %c0_69 = arith.constant 0 : index
    %172 = vector.load %arg15[%c0_68, %c0_69] : memref<384x128xbf16, #tpu.memory_space<vmem>>, vector<384x128xbf16>
    %cst_70 = arith.constant dense<0.000000e+00> : vector<32x128xf32>
    %173 = tpu.matmul %171, %172, %cst_70 {dimension_numbers = #tpu.dot_dimension_numbers<[1], [0], [0], [1], [0, 0, 1, 1], [], []>} : vector<32x384xbf16>, vector<384x128xbf16>, vector<32x128xf32> -> vector<32x128xf32>
    %c0_71 = arith.constant 0 : index
    %c0_72 = arith.constant 0 : index
    %174 = vector.load %arg16[%c0_71, %c0_72] : memref<1x128xf32, #tpu.memory_space<vmem>>, vector<1x128xf32>
    %175 = vector.broadcast %174 : vector<1x128xf32> to vector<32x128xf32>
    %176 = arith.addf %173, %175 : vector<32x128xf32>
    %cst_73 = arith.constant 0.000000e+00 : f32
    %177 = vector.shape_cast %18 : vector<32x1xi1> to vector<32x1xi1>
    %178 = vector.broadcast %177 : vector<32x1xi1> to vector<32x128xi1>
    %179 = vector.broadcast %cst_73 : f32 to vector<32x128xf32>
    %180 = arith.select %178, %176, %179 : vector<32x128xi1>, vector<32x128xf32>
    %cst_74 = arith.constant dense<0.000000e+00> : vector<128xf32>
    %181 = vector.multi_reduction <add>, %180, %cst_74 [0] : vector<32x128xf32> to vector<128xf32>
    %182 = vector.shape_cast %181 : vector<128xf32> to vector<1x128xf32>
    %cst_75 = arith.constant 0.055555556 : f32
    %183 = vector.broadcast %cst_75 : f32 to vector<1x128xf32>
    %184 = arith.mulf %182, %183 : vector<1x128xf32>
    %185 = vector.broadcast %184 : vector<1x128xf32> to vector<32x128xf32>
    %186 = arith.subf %176, %185 : vector<32x128xf32>
    %cst_76 = arith.constant 0.000000e+00 : f32
    %187 = vector.shape_cast %18 : vector<32x1xi1> to vector<32x1xi1>
    %188 = vector.broadcast %187 : vector<32x1xi1> to vector<32x128xi1>
    %189 = vector.broadcast %cst_76 : f32 to vector<32x128xf32>
    %190 = arith.select %188, %186, %189 : vector<32x128xi1>, vector<32x128xf32>
    %191 = arith.mulf %190, %190 : vector<32x128xf32>
    %cst_77 = arith.constant dense<0.000000e+00> : vector<128xf32>
    %192 = vector.multi_reduction <add>, %191, %cst_77 [0] : vector<32x128xf32> to vector<128xf32>
    %193 = vector.shape_cast %192 : vector<128xf32> to vector<1x128xf32>
    %cst_78 = arith.constant 0.055555556 : f32
    %194 = vector.broadcast %cst_78 : f32 to vector<1x128xf32>
    %195 = arith.mulf %193, %194 : vector<1x128xf32>
    %c0_79 = arith.constant 0 : index
    %c0_80 = arith.constant 0 : index
    %196 = vector.load %arg17[%c0_79, %c0_80] : memref<1x128xf32, #tpu.memory_space<vmem>>, vector<1x128xf32>
    %cst_81 = arith.constant 9.99999974E-6 : f32
    %197 = vector.broadcast %cst_81 : f32 to vector<1x128xf32>
    %198 = arith.addf %195, %197 : vector<1x128xf32>
    %199 = math.rsqrt %198 : vector<1x128xf32>
    %200 = arith.mulf %196, %199 : vector<1x128xf32>
    %c0_82 = arith.constant 0 : index
    %c0_83 = arith.constant 0 : index
    %201 = vector.load %arg18[%c0_82, %c0_83] : memref<1x128xf32, #tpu.memory_space<vmem>>, vector<1x128xf32>
    %202 = arith.mulf %184, %200 : vector<1x128xf32>
    %203 = arith.subf %201, %202 : vector<1x128xf32>
    %204 = vector.broadcast %200 : vector<1x128xf32> to vector<32x128xf32>
    %205 = arith.mulf %176, %204 : vector<32x128xf32>
    %206 = vector.broadcast %203 : vector<1x128xf32> to vector<32x128xf32>
    %207 = arith.addf %205, %206 : vector<32x128xf32>
    %cst_84 = arith.constant 0.000000e+00 : f32
    %208 = vector.broadcast %cst_84 : f32 to vector<32x128xf32>
    %209 = arith.cmpf oge, %207, %208 : vector<32x128xf32>
    %cst_85 = arith.constant 2.000000e-01 : f32
    %210 = vector.broadcast %cst_85 : f32 to vector<32x128xf32>
    %211 = arith.mulf %210, %207 : vector<32x128xf32>
    %212 = arith.select %209, %207, %211 : vector<32x128xi1>, vector<32x128xf32>
    %c1_i32_86 = arith.constant 1 : i32
    %213 = tpu.dynamic_rotate %212 by %c1_i32_86 dim 0 : vector<32x128xf32>, i32 -> vector<32x128xf32>
    %cst_87 = arith.constant 0.000000e+00 : f32
    %214 = vector.shape_cast %20 : vector<32x1xi1> to vector<32x1xi1>
    %215 = vector.broadcast %214 : vector<32x1xi1> to vector<32x128xi1>
    %216 = vector.broadcast %cst_87 : f32 to vector<32x128xf32>
    %217 = arith.select %215, %213, %216 : vector<32x128xi1>, vector<32x128xf32>
    %c31_i32_88 = arith.constant 31 : i32
    %218 = tpu.dynamic_rotate %212 by %c31_i32_88 dim 0 : vector<32x128xf32>, i32 -> vector<32x128xf32>
    %cst_89 = arith.constant 0.000000e+00 : f32
    %219 = vector.shape_cast %22 : vector<32x1xi1> to vector<32x1xi1>
    %220 = vector.broadcast %219 : vector<32x1xi1> to vector<32x128xi1>
    %221 = vector.broadcast %cst_89 : f32 to vector<32x128xf32>
    %222 = arith.select %220, %218, %221 : vector<32x128xi1>, vector<32x128xf32>
    %223 = tpu.concatenate %217, %212, %222 in 1 : vector<32x128xf32>, vector<32x128xf32>, vector<32x128xf32> -> vector<32x384xf32>
    %224 = arith.truncf %223 : vector<32x384xf32> to vector<32x384xbf16>
    %c0_90 = arith.constant 0 : index
    %c0_91 = arith.constant 0 : index
    %225 = vector.load %arg19[%c0_90, %c0_91] : memref<384x256xbf16, #tpu.memory_space<vmem>>, vector<384x256xbf16>
    %cst_92 = arith.constant dense<0.000000e+00> : vector<32x256xf32>
    %226 = tpu.matmul %224, %225, %cst_92 {dimension_numbers = #tpu.dot_dimension_numbers<[1], [0], [0], [1], [0, 0, 1, 1], [], []>} : vector<32x384xbf16>, vector<384x256xbf16>, vector<32x256xf32> -> vector<32x256xf32>
    %c0_93 = arith.constant 0 : index
    %c0_94 = arith.constant 0 : index
    %227 = vector.load %arg20[%c0_93, %c0_94] : memref<1x256xf32, #tpu.memory_space<vmem>>, vector<1x256xf32>
    %228 = vector.broadcast %227 : vector<1x256xf32> to vector<32x256xf32>
    %229 = arith.addf %226, %228 : vector<32x256xf32>
    %cst_95 = arith.constant 0.000000e+00 : f32
    %230 = vector.shape_cast %18 : vector<32x1xi1> to vector<32x1xi1>
    %231 = vector.broadcast %230 : vector<32x1xi1> to vector<32x256xi1>
    %232 = vector.broadcast %cst_95 : f32 to vector<32x256xf32>
    %233 = arith.select %231, %229, %232 : vector<32x256xi1>, vector<32x256xf32>
    %cst_96 = arith.constant dense<0.000000e+00> : vector<256xf32>
    %234 = vector.multi_reduction <add>, %233, %cst_96 [0] : vector<32x256xf32> to vector<256xf32>
    %235 = vector.shape_cast %234 : vector<256xf32> to vector<1x256xf32>
    %cst_97 = arith.constant 0.055555556 : f32
    %236 = vector.broadcast %cst_97 : f32 to vector<1x256xf32>
    %237 = arith.mulf %235, %236 : vector<1x256xf32>
    %238 = vector.broadcast %237 : vector<1x256xf32> to vector<32x256xf32>
    %239 = arith.subf %229, %238 : vector<32x256xf32>
    %cst_98 = arith.constant 0.000000e+00 : f32
    %240 = vector.shape_cast %18 : vector<32x1xi1> to vector<32x1xi1>
    %241 = vector.broadcast %240 : vector<32x1xi1> to vector<32x256xi1>
    %242 = vector.broadcast %cst_98 : f32 to vector<32x256xf32>
    %243 = arith.select %241, %239, %242 : vector<32x256xi1>, vector<32x256xf32>
    %244 = arith.mulf %243, %243 : vector<32x256xf32>
    %cst_99 = arith.constant dense<0.000000e+00> : vector<256xf32>
    %245 = vector.multi_reduction <add>, %244, %cst_99 [0] : vector<32x256xf32> to vector<256xf32>
    %246 = vector.shape_cast %245 : vector<256xf32> to vector<1x256xf32>
    %cst_100 = arith.constant 0.055555556 : f32
    %247 = vector.broadcast %cst_100 : f32 to vector<1x256xf32>
    %248 = arith.mulf %246, %247 : vector<1x256xf32>
    %c0_101 = arith.constant 0 : index
    %c0_102 = arith.constant 0 : index
    %249 = vector.load %arg21[%c0_101, %c0_102] : memref<1x256xf32, #tpu.memory_space<vmem>>, vector<1x256xf32>
    %cst_103 = arith.constant 9.99999974E-6 : f32
    %250 = vector.broadcast %cst_103 : f32 to vector<1x256xf32>
    %251 = arith.addf %248, %250 : vector<1x256xf32>
    %252 = math.rsqrt %251 : vector<1x256xf32>
    %253 = arith.mulf %249, %252 : vector<1x256xf32>
    %c0_104 = arith.constant 0 : index
    %c0_105 = arith.constant 0 : index
    %254 = vector.load %arg22[%c0_104, %c0_105] : memref<1x256xf32, #tpu.memory_space<vmem>>, vector<1x256xf32>
    %255 = arith.mulf %237, %253 : vector<1x256xf32>
    %256 = arith.subf %254, %255 : vector<1x256xf32>
    %257 = vector.broadcast %253 : vector<1x256xf32> to vector<32x256xf32>
    %258 = arith.mulf %229, %257 : vector<32x256xf32>
    %259 = vector.broadcast %256 : vector<1x256xf32> to vector<32x256xf32>
    %260 = arith.addf %258, %259 : vector<32x256xf32>
    %cst_106 = arith.constant 0.000000e+00 : f32
    %261 = vector.broadcast %cst_106 : f32 to vector<32x256xf32>
    %262 = arith.cmpf oge, %260, %261 : vector<32x256xf32>
    %cst_107 = arith.constant 2.000000e-01 : f32
    %263 = vector.broadcast %cst_107 : f32 to vector<32x256xf32>
    %264 = arith.mulf %263, %260 : vector<32x256xf32>
    %265 = arith.select %262, %260, %264 : vector<32x256xi1>, vector<32x256xf32>
    %c1_i32_108 = arith.constant 1 : i32
    %266 = tpu.dynamic_rotate %265 by %c1_i32_108 dim 0 : vector<32x256xf32>, i32 -> vector<32x256xf32>
    %cst_109 = arith.constant 0.000000e+00 : f32
    %267 = vector.shape_cast %20 : vector<32x1xi1> to vector<32x1xi1>
    %268 = vector.broadcast %267 : vector<32x1xi1> to vector<32x256xi1>
    %269 = vector.broadcast %cst_109 : f32 to vector<32x256xf32>
    %270 = arith.select %268, %266, %269 : vector<32x256xi1>, vector<32x256xf32>
    %c31_i32_110 = arith.constant 31 : i32
    %271 = tpu.dynamic_rotate %265 by %c31_i32_110 dim 0 : vector<32x256xf32>, i32 -> vector<32x256xf32>
    %cst_111 = arith.constant 0.000000e+00 : f32
    %272 = vector.shape_cast %22 : vector<32x1xi1> to vector<32x1xi1>
    %273 = vector.broadcast %272 : vector<32x1xi1> to vector<32x256xi1>
    %274 = vector.broadcast %cst_111 : f32 to vector<32x256xf32>
    %275 = arith.select %273, %271, %274 : vector<32x256xi1>, vector<32x256xf32>
    %276 = tpu.concatenate %270, %265, %275 in 1 : vector<32x256xf32>, vector<32x256xf32>, vector<32x256xf32> -> vector<32x768xf32>
    %277 = arith.truncf %276 : vector<32x768xf32> to vector<32x768xbf16>
    %c0_112 = arith.constant 0 : index
    %c0_113 = arith.constant 0 : index
    %278 = vector.load %arg23[%c0_112, %c0_113] : memref<768x128xbf16, #tpu.memory_space<vmem>>, vector<768x128xbf16>
    %cst_114 = arith.constant dense<0.000000e+00> : vector<32x128xf32>
    %279 = tpu.matmul %277, %278, %cst_114 {dimension_numbers = #tpu.dot_dimension_numbers<[1], [0], [0], [1], [0, 0, 1, 1], [], []>} : vector<32x768xbf16>, vector<768x128xbf16>, vector<32x128xf32> -> vector<32x128xf32>
    %c0_115 = arith.constant 0 : index
    %c0_116 = arith.constant 0 : index
    %280 = vector.load %arg24[%c0_115, %c0_116] : memref<1x128xf32, #tpu.memory_space<vmem>>, vector<1x128xf32>
    %281 = vector.broadcast %280 : vector<1x128xf32> to vector<32x128xf32>
    %282 = arith.addf %279, %281 : vector<32x128xf32>
    %283 = arith.truncf %282 : vector<32x128xf32> to vector<32x128xbf16>
    %c0_117 = arith.constant 0 : index
    %c0_118 = arith.constant 0 : index
    %284 = vector.load %arg25[%c0_117, %c0_118] : memref<128x256xbf16, #tpu.memory_space<vmem>>, vector<128x256xbf16>
    %cst_119 = arith.constant dense<0.000000e+00> : vector<32x256xf32>
    %285 = tpu.matmul %283, %284, %cst_119 {dimension_numbers = #tpu.dot_dimension_numbers<[1], [0], [0], [1], [0, 0, 1, 1], [], []>} : vector<32x128xbf16>, vector<128x256xbf16>, vector<32x256xf32> -> vector<32x256xf32>
    %c0_120 = arith.constant 0 : index
    %c0_121 = arith.constant 0 : index
    %286 = vector.load %arg26[%c0_120, %c0_121] : memref<32x256xf32, #tpu.memory_space<vmem>>, vector<32x256xf32>
    tpu.vector_store %arg26[%c0_120, %c0_121], %285 {strides = array<i32>} : memref<32x256xf32, #tpu.memory_space<vmem>>, vector<32x256xf32>,
    %c0_122 = arith.constant 0 : index
    %c0_123 = arith.constant 0 : index
    %287 = vector.load %arg27[%c0_122, %c0_123] : memref<32x256xf32, #tpu.memory_space<vmem>>, vector<32x256xf32>
    tpu.vector_store %arg27[%c0_122, %c0_123], %151 {strides = array<i32>} : memref<32x256xf32, #tpu.memory_space<vmem>>, vector<32x256xf32>,
    return
  }
  func.func @transform_0(%arg0: i32) -> (i32, i32) {
    %c0_i32 = arith.constant 0 : i32
    %c0_i32_0 = arith.constant 0 : i32
    %c0_i32_1 = arith.constant 0 : i32
    return %c0_i32, %c0_i32_0 : i32, i32
  }
  func.func @transform_1(%arg0: i32) -> (i32, i32) {
    %c0_i32 = arith.constant 0 : i32
    %c0_i32_0 = arith.constant 0 : i32
    %c0_i32_1 = arith.constant 0 : i32
    return %c0_i32, %c0_i32_0 : i32, i32
  }
  func.func @transform_2(%arg0: i32) -> (i32, i32) {
    %c0_i32 = arith.constant 0 : i32
    %c0_i32_0 = arith.constant 0 : i32
    %c0_i32_1 = arith.constant 0 : i32
    return %c0_i32, %c0_i32_0 : i32, i32
  }
  func.func @transform_3(%arg0: i32) -> (i32, i32) {
    %c0_i32 = arith.constant 0 : i32
    %c0_i32_0 = arith.constant 0 : i32
    %c0_i32_1 = arith.constant 0 : i32
    return %c0_i32, %c0_i32_0 : i32, i32
  }
  func.func @transform_4(%arg0: i32) -> (i32, i32) {
    %c0_i32 = arith.constant 0 : i32
    %c0_i32_0 = arith.constant 0 : i32
    %c0_i32_1 = arith.constant 0 : i32
    return %c0_i32, %c0_i32_0 : i32, i32
  }
  func.func @transform_5(%arg0: i32) -> (i32, i32) {
    %c0_i32 = arith.constant 0 : i32
    %c0_i32_0 = arith.constant 0 : i32
    %c0_i32_1 = arith.constant 0 : i32
    return %c0_i32, %c0_i32_0 : i32, i32
  }
  func.func @transform_6(%arg0: i32) -> (i32, i32) {
    %c0_i32 = arith.constant 0 : i32
    %c0_i32_0 = arith.constant 0 : i32
    %c0_i32_1 = arith.constant 0 : i32
    return %c0_i32, %c0_i32_0 : i32, i32
  }
  func.func @transform_7(%arg0: i32) -> (i32, i32) {
    %c0_i32 = arith.constant 0 : i32
    %c0_i32_0 = arith.constant 0 : i32
    %c0_i32_1 = arith.constant 0 : i32
    return %c0_i32, %c0_i32_0 : i32, i32
  }
  func.func @transform_8(%arg0: i32) -> (i32, i32) {
    %c0_i32 = arith.constant 0 : i32
    %c0_i32_0 = arith.constant 0 : i32
    %c0_i32_1 = arith.constant 0 : i32
    return %c0_i32, %c0_i32_0 : i32, i32
  }
  func.func @transform_9(%arg0: i32) -> (i32, i32) {
    %c0_i32 = arith.constant 0 : i32
    %c0_i32_0 = arith.constant 0 : i32
    %c0_i32_1 = arith.constant 0 : i32
    return %c0_i32, %c0_i32_0 : i32, i32
  }
  func.func @transform_10(%arg0: i32) -> (i32, i32) {
    %c0_i32 = arith.constant 0 : i32
    %c0_i32_0 = arith.constant 0 : i32
    %c0_i32_1 = arith.constant 0 : i32
    return %c0_i32, %c0_i32_0 : i32, i32
  }
  func.func @transform_11(%arg0: i32) -> (i32, i32) {
    %c0_i32 = arith.constant 0 : i32
    %c0_i32_0 = arith.constant 0 : i32
    %c0_i32_1 = arith.constant 0 : i32
    return %c0_i32, %c0_i32_0 : i32, i32
  }
  func.func @transform_12(%arg0: i32) -> (i32, i32) {
    %c0_i32 = arith.constant 0 : i32
    %c0_i32_0 = arith.constant 0 : i32
    %c0_i32_1 = arith.constant 0 : i32
    return %c0_i32, %c0_i32_0 : i32, i32
  }
  func.func @transform_13(%arg0: i32) -> (i32, i32) {
    %c0_i32 = arith.constant 0 : i32
    %c0_i32_0 = arith.constant 0 : i32
    %c0_i32_1 = arith.constant 0 : i32
    return %c0_i32, %c0_i32_0 : i32, i32
  }
  func.func @transform_14(%arg0: i32) -> (i32, i32) {
    %c0_i32 = arith.constant 0 : i32
    %c0_i32_0 = arith.constant 0 : i32
    %c0_i32_1 = arith.constant 0 : i32
    return %c0_i32, %c0_i32_0 : i32, i32
  }
  func.func @transform_15(%arg0: i32) -> (i32, i32) {
    %c0_i32 = arith.constant 0 : i32
    %c0_i32_0 = arith.constant 0 : i32
    %c0_i32_1 = arith.constant 0 : i32
    return %c0_i32, %c0_i32_0 : i32, i32
  }
  func.func @transform_16(%arg0: i32) -> (i32, i32) {
    %c0_i32 = arith.constant 0 : i32
    %c0_i32_0 = arith.constant 0 : i32
    %c0_i32_1 = arith.constant 0 : i32
    return %c0_i32, %c0_i32_0 : i32, i32
  }
  func.func @transform_17(%arg0: i32) -> (i32, i32) {
    %c0_i32 = arith.constant 0 : i32
    %c0_i32_0 = arith.constant 0 : i32
    %c0_i32_1 = arith.constant 0 : i32
    return %c0_i32, %c0_i32_0 : i32, i32
  }
  func.func @transform_18(%arg0: i32) -> (i32, i32) {
    %c0_i32 = arith.constant 0 : i32
    %c0_i32_0 = arith.constant 0 : i32
    %c0_i32_1 = arith.constant 0 : i32
    return %c0_i32, %c0_i32_0 : i32, i32
  }
  func.func @transform_19(%arg0: i32) -> (i32, i32) {
    %c0_i32 = arith.constant 0 : i32
    %c0_i32_0 = arith.constant 0 : i32
    %c0_i32_1 = arith.constant 0 : i32
    return %c0_i32, %c0_i32_0 : i32, i32
  }
  func.func @transform_20(%arg0: i32) -> (i32, i32) {
    %c0_i32 = arith.constant 0 : i32
    %c0_i32_0 = arith.constant 0 : i32
    %c0_i32_1 = arith.constant 0 : i32
    return %c0_i32, %c0_i32_0 : i32, i32
  }
  func.func @transform_21(%arg0: i32) -> (i32, i32) {
    %c0_i32 = arith.constant 0 : i32
    %c0_i32_0 = arith.constant 0 : i32
    %c0_i32_1 = arith.constant 0 : i32
    return %c0_i32, %c0_i32_0 : i32, i32
  }
  func.func @transform_22(%arg0: i32) -> (i32, i32) {
    %c0_i32 = arith.constant 0 : i32
    %c0_i32_0 = arith.constant 0 : i32
    %c0_i32_1 = arith.constant 0 : i32
    return %c0_i32, %c0_i32_0 : i32, i32
  }
  func.func @transform_23(%arg0: i32) -> (i32, i32) {
    %c0_i32 = arith.constant 0 : i32
    %c0_i32_0 = arith.constant 0 : i32
    %c0_i32_1 = arith.constant 0 : i32
    return %c0_i32, %c0_i32_0 : i32, i32
  }
  func.func @transform_24(%arg0: i32) -> (i32, i32) {
    %c0_i32 = arith.constant 0 : i32
    %c0_i32_0 = arith.constant 0 : i32
    %c0_i32_1 = arith.constant 0 : i32
    return %c0_i32, %c0_i32_0 : i32, i32
  }
  func.func @transform_25(%arg0: i32) -> (i32, i32) {
    %c0_i32 = arith.constant 0 : i32
    %c0_i32_0 = arith.constant 0 : i32
    %c0_i32_1 = arith.constant 0 : i32
    return %c0_i32, %c0_i32_0 : i32, i32
  }
  func.func @transform_26(%arg0: i32) -> (i32, i32) {
    %c0_i32 = arith.constant 0 : i32
    %c0_i32_0 = arith.constant 0 : i32
    %c0_i32_1 = arith.constant 0 : i32
    return %c0_i32, %c0_i32_0 : i32, i32
  }
}

</mosaic_0001>

<bundles_post_ra>
// kernel: forward.1
= control target key start
LH: loop header
LB: loop body
LE: loop exit
PB: predicated region body
PF: predicated region fallthrough
CT: control target
= control target key end

     0   :  { %v83_v53 = vlaneseq  ;;  %s6738_s2 = inlined_call_operand.vmem [shape: bf16[256,128], index: 2, kind: input, shape index: {}]   ;;  %s6739_s0 = inlined_call_operand.vmem [shape: bf16[32,256], index: 0, kind: input, shape index: {}]   ;;  %s6740_s4 = inlined_call_operand.vmem [shape: bf16[384,256], index: 4, kind: input, shape index: {}]   ;;  %s6741_s3 = inlined_call_operand.vmem [shape: f32[1,128], index: 3, kind: input, shape index: {}]   ;;  %s6742_s8 = inlined_call_operand.vmem [shape: bf16[768,128], index: 8, kind: input, shape index: {}]   ;;  %s6743_s5 = inlined_call_operand.vmem [shape: f32[1,256], index: 5, kind: input, shape index: {}]   ;;  %s6744_s6 = inlined_call_operand.vmem [shape: f32[1,256], index: 6, kind: input, shape index: {}, may-alias: {6,20}]   ;;  %s6745_s7 = inlined_call_operand.vmem [shape: f32[1,256], index: 7, kind: input, shape index: {}, may-alias: {7,21}]   ;;  %s6746_s12 = inlined_call_operand.vmem [shape: bf16[384,256], index: 12, kind: input, shape index: {}]   ;;  %s6747_s9 = inlined_call_operand.vmem [shape: f32[1,128], index: 9, kind: input, shape index: {}]   ;;  %s6748_s10 = inlined_call_operand.vmem [shape: f32[1,128], index: 10, kind: input, shape index: {}, may-alias: {10,16}]   ;;  %s6749_s11 = inlined_call_operand.vmem [shape: f32[1,128], index: 11, kind: input, shape index: {}, may-alias: {11,17}]   ;;  %s6750_s14 = inlined_call_operand.vmem [shape: bf16[384,128], index: 14, kind: input, shape index: {}]   ;;  %s6751_s13 = inlined_call_operand.vmem [shape: f32[1,256], index: 13, kind: input, shape index: {}]   ;;  %s6752_s26 = inlined_call_operand.vmem [shape: f32[32,256], index: 26, kind: output, shape index: {1}]   ;;  %s6753_s1 = inlined_call_operand.vmem [shape: f32[32,128], index: 1, kind: input, shape index: {}]   ;;  %s6754_s18 = inlined_call_operand.vmem [shape: bf16[384,256], index: 18, kind: input, shape index: {}]   ;;  %s6755_s15 = inlined_call_operand.vmem [shape: f32[1,128], index: 15, kind: input, shape index: {}]   ;;  %s6756_s16 = inlined_call_operand.vmem [shape: f32[1,128], index: 16, kind: input, shape index: {}, may-alias: {10,16}]   ;;  %s6757_s17 = inlined_call_operand.vmem [shape: f32[1,128], index: 17, kind: input, shape index: {}, may-alias: {11,17}]   ;;  %s6758_s22 = inlined_call_operand.vmem [shape: bf16[768,128], index: 22, kind: input, shape index: {}]   ;;  %s6759_s19 = inlined_call_operand.vmem [shape: f32[1,256], index: 19, kind: input, shape index: {}]   ;;  %s6760_s20 = inlined_call_operand.vmem [shape: f32[1,256], index: 20, kind: input, shape index: {}, may-alias: {6,20}]   ;;  %s6761_s21 = inlined_call_operand.vmem [shape: f32[1,256], index: 21, kind: input, shape index: {}, may-alias: {7,21}]   ;;  %s6762_s24 = inlined_call_operand.vmem [shape: bf16[128,256], index: 24, kind: input, shape index: {}]   ;;  %s6763_s23 = inlined_call_operand.vmem [shape: f32[1,128], index: 23, kind: input, shape index: {}]   ;;  %s6764_s25 = inlined_call_operand.vmem [shape: f32[32,256], index: 25, kind: output, shape index: {0}]  }
   0x1   :  { %6770 = sst [smem:[#allocation2_spill]] %s6738_s2 }
   0x2   :  { %6771 = sst [smem:[#allocation3_spill]] %s6739_s0  ;;  %v5364_v54 = vshrl.u32 %v83_v53, 7 }
   0x3   :  { %6772 = sst [smem:[#allocation4_spill]] %s6740_s4 }
   0x4   :  { %6773 = sst [smem:[#allocation5_spill]] %s6741_s3  ;;  %v85_v55 = vadd.s32 8, %v5364_v54  ;;  %v5368_v56 = vmul.u32.u64.low 3817748708, %v5364_v54  ;;  %v5369_v57 = vmul.u32.u64.high 3817748708, %v5364_v54, %v5368_v56  ;;  %v5375_v60 = vadd.s32 16, %v5364_v54 }
   0x5   :  { %6774 = sst [smem:[#allocation6_spill]] %s6742_s8  ;;  %v87_v61 = vadd.s32 24, %v5364_v54  ;;  %s6784_s28 = sld [smem:[#allocation5_spill]]  ;;  %vm397_vm2 = vcmp.lt.s32.totalorder %v5364_v54, 7  ;;  %vm376_vm5 = vcmp.lt.s32.totalorder %v5364_v54, 1 }
   0x6   :  { %6775 = sst [smem:[#allocation7_spill]] %s6743_s5  ;;  %s6782_s5 = sld [smem:[#allocation3_spill]]  ;;  %v5371_v58 = vmul.u32.u64.low 3817748708, %v85_v55  ;;  %v5372_v59 = vmul.u32.u64.high 3817748708, %v85_v55, %v5371_v58  ;;  %v94_v62 = vshrl.u32 %v5369_v57, 3 }
   0x7   :  { %6776 = sst [smem:[#allocation8_spill]] %s6744_s6  ;;  %s6794_s0 = sld [smem:[#allocation7_spill]] }
   0x8   :  { %6777 = sst [smem:[#allocation9_spill]] %s6745_s7  ;;  %s6781_s7 = sld [smem:[#allocation2_spill]] }
   0x9   :  { %6778 = sst [smem:[#allocation10_spill]] %s6746_s12  ;;  %s6783_s12 = sld [smem:[#allocation4_spill]] }
   0xa   :  { %6779 = sst [smem:[#allocation11_spill]] %s6747_s9 }
   0xb   :  { %6780 = sst [smem:[#allocation12_spill]] %s6748_s10  ;;  %s6798_s4 = sld [smem:[#allocation11_spill]] }
   0xc   :  { %v4684_v11 = vld [vmem:[%s6782_s5 + $0x4] ss:$8 sps:$4 sm:$0xff]   ;;  %v4682_v24 = vld [vmem:[%s6782_s5] ss:$8 sps:$4 sm:$0xff]   ;;  %v4685_v26 = vld [vmem:[%s6782_s5 + $0x14] ss:$8 sps:$4 sm:$0xff]  }
   0xd   :  { %355 = vmatprep.mubr.bf16.mxu0 %v4684_v11  ;;  %v4687_v30 = vld [vmem:[%s6782_s5 + $0x10] ss:$8 sps:$4 sm:$0xff]   ;;  %s6793_s5 = sld [smem:[#allocation6_spill]]  ;;  %s6799_s6 = sld [smem:[#allocation12_spill]] }
   0xe   :  { %v4666_v0 = vld [vmem:[%s6781_s7 + $0x40] sm:$0xff]   ;;  %v4668_v2 = vld [vmem:[%s6781_s7 + $0x48] sm:$0xff]   ;;  %v4670_v4 = vld [vmem:[%s6781_s7 + $0x50] sm:$0xff]  }
   0xf   :  { %v4667_v1 = vld [vmem:[%s6781_s7] sm:$0xff]   ;;  %4338 = vmatprep.subr.bf16.mxu0 %v4666_v0  ;;  %v4669_v3 = vld [vmem:[%s6781_s7 + $0x8] sm:$0xff]   ;;  %v4671_v5 = vld [vmem:[%s6781_s7 + $0x10] sm:$0xff]   ;;  %v5380_v63 = vmul.u32.u64.low 3817748708, %v5375_v60  ;;  %v5381_v0 = vmul.u32.u64.high 3817748708, %v5375_v60, %v5380_v63 }
  0x10   :  { %4339 = vmatpush3.bf16.msra.mxu0 %v4667_v1  ;;  %v4672_v6 = vld [vmem:[%s6781_s7 + $0x58] sm:$0xff]   ;;  %v4674_v8 = vld [vmem:[%s6781_s7 + $0x60] sm:$0xff]   ;;  %v4676_v10 = vld [vmem:[%s6781_s7 + $0x68] sm:$0xff]  }
  0x11   :  { %4340 = vmatprep.subr.bf16.mxu0 %v4668_v2  ;;  %v4673_v7 = vld [vmem:[%s6781_s7 + $0x18] sm:$0xff]   ;;  %v4675_v9 = vld [vmem:[%s6781_s7 + $0x20] sm:$0xff]   ;;  %v4677_v12 = vld [vmem:[%s6781_s7 + $0x28] sm:$0xff]   ;;  %v5383_v1 = vmul.u32.u64.low 3817748708, %v87_v61  ;;  %v5384_v2 = vmul.u32.u64.high 3817748708, %v87_v61, %v5383_v1 }
  0x12   :  { %v4678_v13 = vld [vmem:[%s6781_s7 + $0x70] sm:$0xff]   ;;  %v4688_v14 = vld [vmem:[%s6783_s12 + $0x4] ss:$8 sps:$4 sm:$0xff]   ;;  %v4690_v15 = vld [vmem:[%s6783_s12] ss:$8 sps:$4 sm:$0xff]  }
  0x13   :  { %v4691_v16 = vld [vmem:[%s6783_s12 + $0x14] ss:$8 sps:$4 sm:$0xff]   ;;  %720 = vmatprep.subr.bf16.mxu1 %v4688_v14  ;;  %v4693_v17 = vld [vmem:[%s6783_s12 + $0x10] ss:$8 sps:$4 sm:$0xff]   ;;  %v4694_v19 = vld [vmem:[%s6783_s12 + $0x24] ss:$8 sps:$4 sm:$0xff]  }
  0x14   :  { %4341 = vmatpush3.bf16.msra.mxu0 %v4669_v3  ;;  %721 = vmatpush1.bf16.msra.mxu1 %v4690_v15  ;;  %v4679_v18 = vld [vmem:[%s6781_s7 + $0x30] sm:$0xff]   ;;  %v4680_v20 = vld [vmem:[%s6781_s7 + $0x78] sm:$0xff]   ;;  %v4696_v21 = vld [vmem:[%s6783_s12 + $0x20] ss:$8 sps:$4 sm:$0xff]   ;;  %v105_v3 = vshrl.u32 %v5372_v59, 3  ;;  %v127_v11 = vshrl.u32 %v5384_v2, 3 }
  0x15   :  { %4342 = vmatprep.subr.bf16.mxu0 %v4670_v4  ;;  %722 = vmatprep.subr.bf16.mxu1 %v4691_v16  ;;  %v4681_v22 = vld [vmem:[%s6781_s7 + $0x38] sm:$0xff]   ;;  %v4700_v27 = vld [vmem:[%s6783_s12 + $0x44] ss:$8 sps:$4 sm:$0xff]   ;;  %v4702_v28 = vld [vmem:[%s6783_s12 + $0x40] ss:$8 sps:$4 sm:$0xff]   ;;  %v95_v4 = vmul.u32 9, %v94_v62 }
  0x16   :  { %v4697_v23 = vld [vmem:[%s6783_s12 + $0x34] ss:$8 sps:$4 sm:$0xff]   ;;  %v4699_v25 = vld [vmem:[%s6783_s12 + $0x30] ss:$8 sps:$4 sm:$0xff]   ;;  %v4706_v32 = vld [vmem:[%s6783_s12 + $0x64] ss:$8 sps:$4 sm:$0xff]  }
  0x17   :  { %v4703_v29 = vld [vmem:[%s6783_s12 + $0x54] ss:$8 sps:$4 sm:$0xff]   ;;  %v4705_v31 = vld [vmem:[%s6783_s12 + $0x50] ss:$8 sps:$4 sm:$0xff]   ;;  %v4708_v33 = vld [vmem:[%s6783_s12 + $0x60] ss:$8 sps:$4 sm:$0xff]  }
  0x18   :  { %4343 = vmatpush3.bf16.msra.mxu0 %v4671_v5  ;;  %723 = vmatpush1.bf16.msra.mxu1 %v4693_v17  ;;  %v4709_v34 = vld [vmem:[%s6783_s12 + $0x74] ss:$8 sps:$4 sm:$0xff]   ;;  %v4711_v35 = vld [vmem:[%s6783_s12 + $0x70] ss:$8 sps:$4 sm:$0xff]   ;;  %v4712_v36 = vld [vmem:[%s6783_s12 + $0x84] ss:$8 sps:$4 sm:$0xff]  }
  0x19   :  { %4344 = vmatprep.subr.bf16.mxu0 %v4672_v6  ;;  %724 = vmatprep.subr.bf16.mxu1 %v4694_v19  ;;  %v4714_v37 = vld [vmem:[%s6783_s12 + $0x80] ss:$8 sps:$4 sm:$0xff]   ;;  %v4715_v38 = vld [vmem:[%s6783_s12 + $0x94] ss:$8 sps:$4 sm:$0xff]   ;;  %v4717_v39 = vld [vmem:[%s6783_s12 + $0x90] ss:$8 sps:$4 sm:$0xff]  }
  0x1a   :  { %v4718_v40 = vld [vmem:[%s6783_s12 + $0xa4] ss:$8 sps:$4 sm:$0xff]   ;;  %v4720_v41 = vld [vmem:[%s6783_s12 + $0xa0] ss:$8 sps:$4 sm:$0xff]   ;;  %v4721_v42 = vld [vmem:[%s6783_s12 + $0xb4] ss:$8 sps:$4 sm:$0xff]  }
  0x1b   :  { %v4723_v43 = vld [vmem:[%s6783_s12 + $0xb0] ss:$8 sps:$4 sm:$0xff]   ;;  %v4724_v44 = vld [vmem:[%s6783_s12 + $0xc4] ss:$8 sps:$4 sm:$0xff]   ;;  %v4726_v45 = vld [vmem:[%s6783_s12 + $0xc0] ss:$8 sps:$4 sm:$0xff]  }
  0x1c   :  { %4345 = vmatpush3.bf16.msra.mxu0 %v4673_v7  ;;  %725 = vmatpush1.bf16.msra.mxu1 %v4696_v21  ;;  %v4727_v46 = vld [vmem:[%s6783_s12 + $0xd4] ss:$8 sps:$4 sm:$0xff]   ;;  %v4729_v47 = vld [vmem:[%s6783_s12 + $0xd0] ss:$8 sps:$4 sm:$0xff]   ;;  %v4730_v48 = vld [vmem:[%s6783_s12 + $0xe4] ss:$8 sps:$4 sm:$0xff]  }
  0x1d   :  { %4346 = vmatprep.subr.bf16.mxu0 %v4674_v8  ;;  %726 = vmatprep.subr.bf16.mxu1 %v4697_v23  ;;  %v4732_v49 = vld [vmem:[%s6783_s12 + $0xe0] ss:$8 sps:$4 sm:$0xff]   ;;  %v4733_v50 = vld [vmem:[%s6783_s12 + $0xf4] ss:$8 sps:$4 sm:$0xff]   ;;  %v4735_v51 = vld [vmem:[%s6783_s12 + $0xf0] ss:$8 sps:$4 sm:$0xff]  }
  0x1e   :  { %v4738_v52 = vld [vmem:[%s6783_s12 + $0x104] ss:$8 sps:$4 sm:$0xff]   ;;  %v106_v5 = vmul.u32 9, %v105_v3  ;;  %v3938_v7 = vld [vmem:[%s6784_s28] ss:$0 sm:$0xff]  ;;  %v128_v19 = vmul.u32 9, %v127_v11 }
  0x1f   :  { %v4739_v2 = vld [vmem:[%s6783_s12 + $0x110] ss:$8 sps:$4 sm:$0xff]   ;;  %v4744_v3 = vld [vmem:[%s6783_s12 + $0x124] ss:$8 sps:$4 sm:$0xff]   ;;  %v4753_v11 = vld [vmem:[%s6783_s12 + $0x154] ss:$8 sps:$4 sm:$0xff]  }
  0x20   :  { %4347 = vmatpush3.bf16.msra.mxu0 %v4675_v9  ;;  %727 = vmatpush1.bf16.msra.mxu1 %v4699_v25  ;;  %v96_v9 = vsub.s32 %v5364_v54, %v95_v4  ;;  %v107_v14 = vsub.s32 %v85_v55, %v106_v5  ;;  %v4742_v4 = vld [vmem:[%s6783_s12 + $0x120] ss:$8 sps:$4 sm:$0xff]   ;;  %s6795_s28 = sld [smem:[#allocation8_spill]] }
  0x21   :  { %4348 = vmatprep.subr.bf16.mxu0 %v4676_v10  ;;  %728 = vmatprep.subr.bf16.mxu1 %v4700_v27  ;;  %v116_v10 = vshrl.u32 %v5381_v0, 3  ;;  %v4995_v55 = vld [vmem:[%s6758_s22 + $0x88] sm:$0xff]  }
  0x22   :  { %vm132_vm0 = vcmp.ne.s32.totalorder %v96_v9, 0  ;;  %vm136_vm1 = vcmp.lt.s32.totalorder %v96_v9, 0  ;;  %vm133_vm3 = vcmp.ne.s32.totalorder %v107_v14, 0  ;;  %vm137_vm4 = vcmp.lt.s32.totalorder %v107_v14, 0  ;;  %v5002_v5 = vld [vmem:[%s6758_s22 + $0xe8] sm:$0xff]  }
  0x23   :  { %v145_v23 = vadd.s32 9, %v107_v14  ;;  %vm140_vm6 = vmand %vm136_vm1, %vm132_vm0 }
  0x24   :  { %4349 = vmatpush3.bf16.msra.mxu0 %v4677_v12  ;;  %729 = vmatpush1.bf16.msra.mxu1 %v4702_v28  ;;  %vm141_vm7 = vmand %vm137_vm4, %vm133_vm3 }
  0x25   :  { %4350 = vmatprep.subr.bf16.mxu0 %v4678_v13  ;;  %730 = vmatprep.subr.bf16.mxu1 %v4703_v29 }
  0x28   :  { %4351 = vmatpush3.bf16.msra.mxu0 %v4679_v18  ;;  %731 = vmatpush1.bf16.msra.mxu1 %v4705_v31  ;;  %v117_v18 = vmul.u32 9, %v116_v10  ;;  %v129_v31 = vsub.s32 %v87_v61, %v128_v19  ;;  %v4741_v61 = vld [vmem:[%s6783_s12 + $0x114] ss:$8 sps:$4 sm:$0xff]   ;;  %v4748_v10 = vld [vmem:[%s6783_s12 + $0x140] ss:$8 sps:$4 sm:$0xff]  }
  0x29   :  { %4352 = vmatprep.subr.bf16.mxu0 %v4680_v20  ;;  %732 = vmatprep.subr.bf16.mxu1 %v4706_v32  ;;  %v4760_v19 = vld [vmem:[%s6793_s5 + $0x40] sm:$0xff]  }
  0x2a   :  { %vm135_vm9 = vcmp.ne.s32.totalorder %v129_v31, 0  ;;  %vm139_vm11 = vcmp.lt.s32.totalorder %v129_v31, 0 }
  0x2b   :  { %vm143_vm15 = vmand %vm139_vm11, %vm135_vm9 }
  0x2c   :  { %4353 = vmatpush3.bf16.msra.mxu0 %v4681_v22  ;;  %733 = vmatpush1.bf16.msra.mxu1 %v4708_v33  ;;  %v144_v22 = vadd.s32 9, %v96_v9 }
  0x2d   :  { %734 = vmatprep.subr.bf16.mxu1 %v4709_v34  ;;  %4366 = vmatprep.subr.bf16.mxu0 %v4760_v19 }
  0x2f   :  { %356 = vmatmul.mubr.bf16.vlgmr.msra.gmra.mrb[0].mxu0 %v4682_v24 }
  0x30   :  { %363 = vmatprep.mubr.bf16.mxu0 %v4685_v26  ;;  %735 = vmatpush1.bf16.msra.mxu1 %v4711_v35 }
  0x31   :  { %736 = vmatprep.subr.bf16.mxu1 %v4712_v36 }
  0x34   :  { %737 = vmatpush1.bf16.msra.mxu1 %v4714_v37 }
  0x35   :  { %738 = vmatprep.subr.bf16.mxu1 %v4715_v38 }
  0x37   :  { %364 = vmatmul.mubr.bf16.gmra.mrb[4].mxu0 %v4687_v30  ;;  %v118_v30 = vsub.s32 %v5375_v60, %v117_v18  ;;  %v5027_v18 = vld [vmem:[%s6762_s24 + $0x10] ss:$8 sps:$4 sm:$0xff]  }
  0x38   :  { %739 = vmatpush1.bf16.msra.mxu1 %v4717_v39  ;;  %v5404_v39 = vsel %vm140_vm6, %v144_v22, %v96_v9  ;;  %v4750_v9 = vld [vmem:[%s6783_s12 + $0x144] ss:$8 sps:$4 sm:$0xff]  }
  0x39   :  { %740 = vmatprep.subr.bf16.mxu1 %v4718_v40  ;;  %v5406_v40 = vsel %vm141_vm7, %v145_v23, %v107_v14  ;;  %vm134_vm8 = vcmp.ne.s32.totalorder %v118_v30, 0  ;;  %vm138_vm10 = vcmp.lt.s32.totalorder %v118_v30, 0  ;;  %vm156_vm12 = vcmp.ne.s32.totalorder %v5404_v39, 0  ;;  %v4754_v14 = vld [vmem:[%s6783_s12 + $0x160] ss:$8 sps:$4 sm:$0xff]   ;;  %v4764_v23 = vld [vmem:[%s6793_s5 + $0x50] sm:$0xff]  }
  0x3a   :  { %vm157_vm13 = vcmp.ne.s32.totalorder %v5406_v40, 0  ;;  %vm142_vm14 = vmand %vm138_vm10, %vm134_vm8  ;;  %vm160_vm6 = vcmp.ne.s32.totalorder %v5404_v39, 8  ;;  %vm161_vm7 = vcmp.ne.s32.totalorder %v5406_v40, 8  ;;  %v4763_v22 = vld [vmem:[%s6793_s5 + $0x8] sm:$0xff]   ;;  %v5556_v39 = vsub.s32 1, %v5364_v54 }
  0x3b   :  { %vm5422_vm0 = vmpackc.low %vm157_vm13, %vm156_vm12  ;;  %vm154_vm12 = vcmp.lt.s32.totalorder %v5375_v60, 18 }
  0x3c   :  { %741 = vmatpush1.bf16.msra.mxu1 %v4720_v41  ;;  %vm5485_vm8 = vmpackc.low %vm161_vm7, %vm160_vm6 }
  0x3d   :  { %742 = vmatprep.subr.bf16.mxu1 %v4721_v42 }
  0x40   :  { %743 = vmatpush1.bf16.msra.mxu1 %v4723_v43 }
  0x41   :  { %744 = vmatprep.subr.bf16.mxu1 %v4724_v44  ;;  %v146_v44 = vadd.s32 9, %v118_v30 }
  0x43   :  { %v150_v0 = vsel %vm142_vm14, %v146_v44, %v118_v30  ;;  %v4771_v30 = vld [vmem:[%s6793_s5 + $0x28] sm:$0xff]  }
  0x44   :  { %745 = vmatpush1.bf16.msra.mxu1 %v4726_v45  ;;  %v147_v45 = vadd.s32 9, %v129_v31  ;;  %vm158_vm1 = vcmp.ne.s32.totalorder %v150_v0, 0  ;;  %vm162_vm9 = vcmp.ne.s32.totalorder %v150_v0, 8 }
  0x45   :  { %746 = vmatprep.subr.bf16.mxu1 %v4727_v46 }
  0x46   :  { %v151_v1 = vsel %vm143_vm15, %v147_v45, %v129_v31  ;;  %v4772_v31 = vld [vmem:[%s6793_s5 + $0x70] sm:$0xff]  }
  0x47   :  { %vm159_vm3 = vcmp.ne.s32.totalorder %v151_v1, 0  ;;  %vm163_vm10 = vcmp.ne.s32.totalorder %v151_v1, 8 }
  0x48   :  { %747 = vmatpush1.bf16.msra.mxu1 %v4729_v47  ;;  %vm5446_vm4 = vmpackc.low %vm159_vm3, %vm158_vm1 }
  0x49   :  { %748 = vmatprep.subr.bf16.mxu1 %v4730_v48  ;;  %vm5492_vm11 = vmpackc.low %vm163_vm10, %vm162_vm9 }
  0x4c   :  { %749 = vmatpush1.bf16.msra.mxu1 %v4732_v49 }
  0x4d   :  { %750 = vmatprep.subr.bf16.mxu1 %v4733_v50 }
  0x50   :  { %751 = vmatpush1.bf16.msra.mxu1 %v4735_v51 }
  0x51   :  { %773 = vmatprep.subr.bf16.mxu1 %v4738_v52  ;;  %v4736_v52 = vld [vmem:[%s6783_s12 + $0x100] ss:$8 sps:$4 sm:$0xff]  }
 0x102   :  { %v4354_v6 = vpop.f32.mrb[0].mxu0 }
 0x103   :  { %v4355_v8 = vpop.f32.mrb[1].mxu0 }
 0x104   :  { %v4356_v12 = vadd.f32 %v4355_v8, %v4354_v6  ;;  %v4357_v13 = vpop.f32.mrb[2].mxu0  ;;  %v4747_v6 = vld [vmem:[%s6783_s12 + $0x134] ss:$8 sps:$4 sm:$0xff]   ;;  %v5068_v8 = vmov 0  }
 0x105   :  { %v4358_v15 = vpop.f32.mrb[3].mxu0 }
 0x106   :  { %v358_v16 = vadd.f32 %v4356_v12, %v3938_v7  ;;  %v4359_v17 = vadd.f32 %v4358_v15, %v4357_v13  ;;  %v4751_v12 = vld [vmem:[%s6783_s12 + $0x150] ss:$8 sps:$4 sm:$0xff]   ;;  %v4756_v13 = vld [vmem:[%s6783_s12 + $0x164] ss:$8 sps:$4 sm:$0xff]   ;;  %v4759_v15 = vld [vmem:[%s6783_s12 + $0x174] ss:$8 sps:$4 sm:$0xff]  }
 0x108   :  { %v361_v20 = vadd.f32 %v4359_v17, %v3938_v7  ;;  %v372_v21 = vrot.slane %v358_v16, 7  ;;  %v393_v24 = vrot.slane %v358_v16, 1  ;;  %v5026_v17 = vld [vmem:[%s6762_s24 + $0x4] ss:$8 sps:$4 sm:$0xff]  }
 0x10a   :  { %v373_v25 = vrot.slane %v361_v20, 7  ;;  %v394_v26 = vrot.slane %v361_v20, 1  ;;  %v4360_v27 = vpop.f32.mrb[4].mxu0  ;;  %v415_v28 = vpack.c.bf16 %v361_v20, %v358_v16  ;;  %v4757_v16 = vld [vmem:[%s6783_s12 + $0x170] ss:$8 sps:$4 sm:$0xff]   ;;  %v4761_v20 = vld [vmem:[%s6793_s5] sm:$0xff]  }
 0x10b   :  { %v4361_v29 = vpop.f32.mrb[5].mxu0  ;;  %4367 = vmatpush3.bf16.msra.mxu0 %v4761_v20 }
 0x10c   :  { %v5400_v32 = vsel %vm397_vm2, %v393_v24, %v394_v26  ;;  %v4362_v33 = vadd.f32 %v4361_v29, %v4360_v27  ;;  %v4363_v34 = vpop.f32.mrb[6].mxu0  ;;  %752 = vmatprep.mubr.bf16.mxu1 %v415_v28  ;;  %v379_v35 = vsel %vm376_vm5, %v372_v21, %v373_v25  ;;  %v4768_v27 = vld [vmem:[%s6793_s5 + $0x60] sm:$0xff]   ;;  %v4770_v29 = vld [vmem:[%s6793_s5 + $0x68] sm:$0xff]  }
 0x10d   :  { %v4364_v36 = vpop.f32.mrb[7].mxu0  ;;  %v4769_v28 = vld [vmem:[%s6793_s5 + $0x20] sm:$0xff]  }
 0x10e   :  { %v366_v37 = vadd.f32 %v4362_v33, %v3938_v7  ;;  %v4365_v38 = vadd.f32 %v4364_v36, %v4363_v34  ;;  %v4774_v33 = vld [vmem:[%s6793_s5 + $0x78] sm:$0xff]   ;;  %v5550_v36 = vsub.s32 0, %v5364_v54 }
 0x10f   :  { %v4775_v34 = vld [vmem:[%s6793_s5 + $0x38] sm:$0xff]  }
 0x110   :  { %v374_v41 = vrot.slane %v366_v37, 7  ;;  %v395_v42 = vrot.slane %v366_v37, 1  ;;  %v369_v43 = vadd.f32 %v4365_v38, %v3938_v7  ;;  %v4745_v7 = vld [vmem:[%s6783_s12 + $0x130] ss:$8 sps:$4 sm:$0xff]   ;;  %v468_v38 = vld [vmem:[%s6794_s0] sm:$0x3] }
 0x111   :  { %v477_v44 = vrot.slane %v468_v38, %v5556_v39  ;;  %s6796_s12 = sld [smem:[#allocation9_spill]]  ;;  %s6797_s0 = sld [smem:[#allocation10_spill]] }
 0x112   :  { %v399_v46 = vsel %vm397_vm2, %v394_v26, %v395_v42  ;;  %v375_v47 = vrot.slane %v369_v43, 7  ;;  %v396_v48 = vrot.slane %v369_v43, 1  ;;  %v418_v49 = vpack.c.bf16 %v369_v43, %v366_v37  ;;  %v4767_v26 = vld [vmem:[%s6793_s5 + $0x18] sm:$0xff]  }
 0x113   :  { %v4014_v50 = vpack.c.bf16 %v399_v46, %v5400_v32  ;;  %v378_v51 = vsel %vm376_vm5, %v373_v25, %v374_v41  ;;  %v4766_v25 = vld [vmem:[%s6793_s5 + $0x58] sm:$0xff]   ;;  %v4773_v32 = vld [vmem:[%s6793_s5 + $0x30] sm:$0xff]   ;;  %v473_v43 = vrot.slane %v468_v38, %v5550_v36 }
 0x114   :  { %v380_v53 = vsel %vm376_vm5, %v375_v47, %v372_v21  ;;  %v377_v56 = vsel %vm376_vm5, %v374_v41, %v375_v47  ;;  %v398_v57 = vsel %vm397_vm2, %v395_v42, %v396_v48  ;;  %v401_v58 = vsel %vm397_vm2, %v396_v48, %v393_v24  ;;  %v4762_v21 = vld [vmem:[%s6793_s5 + $0x48] sm:$0xff]   ;;  %v4765_v24 = vld [vmem:[%s6793_s5 + $0x10] sm:$0xff]  }
 0x115   :  { %v4008_v59 = vpack.c.bf16 %v379_v35, %v380_v53  ;;  %v4011_v62 = vpack.c.bf16 %v377_v56, %v378_v51  ;;  %v4017_v63 = vpack.c.bf16 %v401_v58, %v398_v57  ;;  %4368 = vmatprep.subr.bf16.mxu0 %v4762_v21  ;;  %v4776_v35 = vld [vmem:[%s6793_s5 + $0xc0] sm:$0xff]  }
 0x116   :  { %4369 = vmatpush3.bf16.msra.mxu0 %v4763_v22 }
 0x117   :  { %4009 = vmatmul.mubr.msk.bf16.vlgmr.msra.gmra.mrb[0].mxu1 %vm5422_vm0, %v4008_v59  ;;  %4370 = vmatprep.subr.bf16.mxu0 %v4764_v23 }
 0x118   :  { %774 = vmatpush1.bf16.msra.mxu1 %v4736_v52  ;;  %762 = vmatprep.mubr.bf16.mxu1 %v418_v49 }
 0x119   :  { %775 = vmatprep.subr.bf16.mxu1 %v4741_v61 }
 0x11a   :  { %4371 = vmatpush3.bf16.msra.mxu0 %v4765_v24 }
 0x11b   :  { %4372 = vmatprep.subr.bf16.mxu0 %v4766_v25 }
 0x11c   :  { %776 = vmatpush1.bf16.msra.mxu1 %v4739_v2 }
 0x11d   :  { %777 = vmatprep.subr.bf16.mxu1 %v4744_v3 }
 0x11e   :  { %4373 = vmatpush3.bf16.msra.mxu0 %v4767_v26 }
 0x11f   :  { %4012 = vmatmul.mubr.msk.bf16.gmra.mrb[4].mxu1 %vm5446_vm4, %v4011_v62  ;;  %4374 = vmatprep.subr.bf16.mxu0 %v4768_v27 }
 0x120   :  { %778 = vmatpush1.bf16.msra.mxu1 %v4742_v4  ;;  %805 = vmatprep.mubr.bf16.mxu1 %v5068_v8 }
 0x121   :  { %779 = vmatprep.subr.bf16.mxu1 %v4747_v6 }
 0x122   :  { %4375 = vmatpush3.bf16.msra.mxu0 %v4769_v28 }
 0x123   :  { %4376 = vmatprep.subr.bf16.mxu0 %v4770_v29 }
 0x124   :  { %780 = vmatpush1.bf16.msra.mxu1 %v4745_v7 }
 0x125   :  { %781 = vmatprep.subr.bf16.mxu1 %v4750_v9 }
 0x126   :  { %4377 = vmatpush3.bf16.msra.mxu0 %v4771_v30 }
 0x127   :  { %4378 = vmatprep.subr.bf16.mxu0 %v4772_v31 }
 0x128   :  { %782 = vmatpush1.bf16.msra.mxu1 %v4748_v10 }
 0x129   :  { %783 = vmatprep.subr.bf16.mxu1 %v4753_v11 }
 0x12a   :  { %4379 = vmatpush3.bf16.msra.mxu0 %v4773_v32 }
 0x12b   :  { %4380 = vmatprep.subr.bf16.mxu0 %v4774_v33 }
 0x12c   :  { %784 = vmatpush1.bf16.msra.mxu1 %v4751_v12 }
 0x12d   :  { %785 = vmatprep.subr.bf16.mxu1 %v4756_v13 }
 0x12e   :  { %4381 = vmatpush3.bf16.msra.mxu0 %v4775_v34 }
 0x12f   :  { %4394 = vmatprep.subr.bf16.mxu0 %v4776_v35 }
 0x130   :  { %786 = vmatpush1.bf16.msra.mxu1 %v4754_v14 }
 0x131   :  { %787 = vmatprep.subr.bf16.mxu1 %v4759_v15 }
 0x134   :  { %788 = vmatpush1.bf16.msra.mxu1 %v4757_v16 }
 0x137   :  { %4015 = vmatmul.mubr.msk.bf16.vlgmr.msra.gmra.mrb[0].mxu1 %vm5485_vm8, %v4014_v50 }
 0x138   :  { %815 = vmatprep.mubr.bf16.mxu1 %v5068_v8 }
 0x13f   :  { %4018 = vmatmul.mubr.msk.bf16.gmra.mrb[4].mxu1 %vm5492_vm11, %v4017_v63 }
 0x20a   :  { %v807_v37 = vpop.f32.mrb[0].mxu1 }
 0x20b   :  { %v809_v40 = vpop.f32.mrb[1].mxu1  ;;  %v5564_v47 = vadd.f32 %v807_v37, %v473_v43 }
 0x20c   :  { %v811_v41 = vpop.f32.mrb[2].mxu1  ;;  %v5567_v49 = vadd.f32 %v809_v40, %v477_v44 }
 0x20d   :  { %v813_v42 = vpop.f32.mrb[3].mxu1  ;;  %v5560_v45 = vadd.f32 %v811_v41, %v473_v43 }
 0x20e   :  { %v5562_v46 = vadd.f32 %v813_v42, %v477_v44 }
 0x20f   :  { %v842_v52 = vadd.f32 %v5560_v45, %v5564_v47 }
 0x210   :  { %v851_v57 = vadd.f32 %v5562_v46, %v5567_v49 }
 0x212   :  { %v817_v48 = vpop.f32.mrb[4].mxu1 }
 0x213   :  { %v5569_v50 = vadd.f32 %v817_v48, %v473_v43  ;;  %v819_v51 = vpop.f32.mrb[5].mxu1 }
 0x214   :  { %v5573_v53 = vadd.f32 %v819_v51, %v477_v44  ;;  %v821_v56 = vpop.f32.mrb[6].mxu1 }
 0x215   :  { %v838_v58 = vsel %vm154_vm12, %v5569_v50, 0.0  ;;  %v5580_v59 = vadd.f32 %v821_v56, %v473_v43  ;;  %v823_v61 = vpop.f32.mrb[7].mxu1 }
 0x216   :  { %v843_v62 = vadd.f32 %v842_v52, %v838_v58  ;;  %v839_v63 = vsel %vm154_vm12, %v5573_v53, 0.0  ;;  %v5585_v0 = vadd.f32 %v823_v61, %v477_v44 }
 0x217   :  { %v852_v1 = vadd.f32 %v851_v57, %v839_v63 }
 0x218   :  { %v845_v2 = vrot.slane %v843_v62, 4 }
 0x219   :  { %v854_v3 = vrot.slane %v852_v1, 4 }
 0x21a   :  { %v846_v4 = vadd.f32 %v845_v2, %v843_v62 }
 0x21b   :  { %v855_v6 = vadd.f32 %v854_v3, %v852_v1  ;;  %v5069_v3 = vmov 1966171168  }
 0x21c   :  { %v847_v7 = vrot.slane %v846_v4, 2 }
 0x21d   :  { %v856_v9 = vrot.slane %v855_v6, 2 }
 0x21e   :  { %v848_v10 = vadd.f32 %v847_v7, %v846_v4  ;;  %v915_v4 = vunpack.c.l.s4 %v5069_v3 }
 0x21f   :  { %v857_v11 = vadd.f32 %v856_v9, %v855_v6 }
 0x220   :  { %v849_v12 = vrot.slane %v848_v10, 1  ;;  %v916_v6 = vunpack.c.0.s8 %v915_v4 }
 0x221   :  { %v858_v13 = vrot.slane %v857_v11, 1 }
 0x222   :  { %v850_v14 = vadd.f32 %v849_v12, %v848_v10  ;;  %v5598_v9 = vsub.s32 %v916_v6, %v5364_v54  ;;  %v4997_v54 = vld [vmem:[%s6758_s22 + $0x90] sm:$0xff]  }
 0x223   :  { %v859_v15 = vadd.f32 %v858_v13, %v857_v11  ;;  %v906_v13 = vld [vmem:[%s6795_s28] sm:$0x3] }
 0x224   :  { %v860_v16 = vmul.f32 0.055555556, %v850_v14 }
 0x225   :  { %v861_v19 = vmul.f32 0.055555556, %v859_v15 }
 0x226   :  { %v862_v20 = vsub.f32 %v5564_v47, %v860_v16  ;;  %v864_v21 = vsub.f32 %v5560_v45, %v860_v16  ;;  %v866_v22 = vsub.f32 %v5569_v50, %v860_v16 }
 0x227   :  { %v863_v23 = vsub.f32 %v5567_v49, %v861_v19  ;;  %v865_v24 = vsub.f32 %v5562_v46, %v861_v19  ;;  %v867_v25 = vsub.f32 %v5573_v53, %v861_v19 }
 0x228   :  { %v874_v26 = vsel %vm154_vm12, %v866_v22, 0.0  ;;  %v878_v27 = vmul.f32 %v862_v20, %v862_v20  ;;  %v880_v28 = vmul.f32 %v864_v21, %v864_v21 }
 0x229   :  { %v882_v29 = vmul.f32 %v874_v26, %v874_v26  ;;  %v875_v30 = vsel %vm154_vm12, %v867_v25, 0.0  ;;  %v879_v31 = vmul.f32 %v863_v23, %v863_v23  ;;  %v881_v32 = vmul.f32 %v865_v24, %v865_v24 }
 0x22a   :  { %v886_v33 = vadd.f32 %v880_v28, %v878_v27  ;;  %v883_v34 = vmul.f32 %v875_v30, %v875_v30 }
 0x22b   :  { %v895_v35 = vadd.f32 %v881_v32, %v879_v31 }
 0x22c   :  { %v887_v37 = vadd.f32 %v886_v33, %v882_v29  ;;  %v930_v29 = vld [vmem:[%s6796_s12] sm:$0x3] }
 0x22d   :  { %v896_v38 = vadd.f32 %v895_v35, %v883_v34 }
 0x22e   :  { %v889_v40 = vrot.slane %v887_v37, 4 }
 0x22f   :  { %v898_v41 = vrot.slane %v896_v38, 4 }
 0x230   :  { %v890_v42 = vadd.f32 %v889_v40, %v887_v37 }
 0x231   :  { %v899_v43 = vadd.f32 %v898_v41, %v896_v38 }
 0x232   :  { %v891_v44 = vrot.slane %v890_v42, 2 }
 0x233   :  { %v900_v48 = vrot.slane %v899_v43, 2 }
 0x234   :  { %v892_v51 = vadd.f32 %v891_v44, %v890_v42 }
 0x235   :  { %v901_v52 = vadd.f32 %v900_v48, %v899_v43 }
 0x236   :  { %v893_v56 = vrot.slane %v892_v51, 1 }
 0x237   :  { %v902_v57 = vrot.slane %v901_v52, 1 }
 0x238   :  { %v894_v58 = vadd.f32 %v893_v56, %v892_v51 }
 0x239   :  { %v903_v61 = vadd.f32 %v902_v57, %v901_v52 }
 0x23a   :  { %v904_v62 = vmul.f32 0.055555556, %v894_v58 }
 0x23b   :  { %v905_v63 = vmul.f32 0.055555556, %v903_v61 }
 0x23c   :  { %v907_v1 = vadd.f32 1e-05, %v904_v62 }
 0x23d   :  { %v908_v2 = vadd.f32 1e-05, %v905_v63 }
 0x23e   :  { %5048 = vrsqrt.f32 %v907_v1 }
 0x23f   :  { %5050 = vrsqrt.f32 %v908_v2 }
 0x248   :  { %v5049_v7 = vpop.eup %5048 }
 0x249   :  { %v5051_v10 = vpop.eup %5050 }
 0x24a   :  { %v913_v11 = vcombine.low %v5049_v7, %v5051_v10 }
 0x24c   :  { %v920_v12 = vrot.slane %v913_v11, %v5598_v9 }
 0x24e   :  { %v927_v14 = vrot.slane %v920_v12, %v5598_v9 }
 0x250   :  { %v929_v15 = vmul.f32 %v927_v14, %v906_v13 }
 0x252   :  { %v935_v20 = vrot.slane %v929_v15, %v5550_v36  ;;  %v939_v21 = vrot.slane %v929_v15, %v5556_v39 }
 0x254   :  { %v942_v22 = vmul.f32 %v935_v20, %v860_v16  ;;  %v943_v23 = vmul.f32 %v939_v21, %v861_v19  ;;  %v968_v24 = vmul.f32 %v5573_v53, %v939_v21  ;;  %v969_v25 = vmul.f32 %v5580_v59, %v935_v20 }
 0x255   :  { %v970_v26 = vmul.f32 %v5585_v0, %v939_v21  ;;  %v963_v16 = vmul.f32 %v5564_v47, %v935_v20  ;;  %v965_v53 = vmul.f32 %v5560_v45, %v935_v20  ;;  %v964_v0 = vmul.f32 %v5567_v49, %v939_v21 }
 0x256   :  { %v946_v27 = vcombine.low %v942_v22, %v943_v23  ;;  %v966_v19 = vmul.f32 %v5562_v46, %v939_v21  ;;  %v967_v42 = vmul.f32 %v5569_v50, %v935_v20 }
 0x258   :  { %v953_v28 = vrot.slane %v946_v27, %v5598_v9 }
 0x25a   :  { %v960_v30 = vrot.slane %v953_v28, %v5598_v9 }
 0x25c   :  { %v962_v31 = vsub.f32 %v930_v29, %v960_v30 }
 0x25e   :  { %v979_v32 = vrot.slane %v962_v31, %v5556_v39  ;;  %v975_v59 = vrot.slane %v962_v31, %v5550_v36 }
 0x260   :  { %v987_v33 = vadd.f32 %v979_v32, %v968_v24  ;;  %v982_v34 = vadd.f32 %v975_v59, %v963_v16  ;;  %v984_v35 = vadd.f32 %v975_v59, %v965_v53  ;;  %v988_v37 = vadd.f32 %v975_v59, %v969_v25 }
 0x261   :  { %v989_v38 = vadd.f32 %v979_v32, %v970_v26  ;;  %v983_v40 = vadd.f32 %v979_v32, %v964_v0  ;;  %v985_v41 = vadd.f32 %v979_v32, %v966_v19  ;;  %v986_v48 = vadd.f32 %v975_v59, %v967_v42  ;;  %v4777_v32 = vld [vmem:[%s6793_s5 + $0x80] sm:$0xff]   ;;  %v4778_v0 = vld [vmem:[%s6793_s5 + $0xc8] sm:$0xff]  }
 0x262   :  { %vm995_vm13 = vcmp.ge.f32.partialorder %v987_v33, 0.0  ;;  %v1003_v43 = vmul.f32 0.2, %v987_v33  ;;  %vm990_vm14 = vcmp.ge.f32.partialorder %v982_v34, 0.0  ;;  %vm992_vm15 = vcmp.ge.f32.partialorder %v984_v35, 0.0 }
 0x263   :  { %vm996_vm1 = vcmp.ge.f32.partialorder %v988_v37, 0.0  ;;  %v998_v45 = vmul.f32 0.2, %v982_v34  ;;  %v1000_v47 = vmul.f32 0.2, %v984_v35  ;;  %vm997_vm3 = vcmp.ge.f32.partialorder %v989_v38, 0.0 }
 0x264   :  { %v5622_v49 = vsel %vm995_vm13, %v987_v33, %v1003_v43  ;;  %v1004_v46 = vmul.f32 0.2, %v988_v37  ;;  %v1005_v44 = vmul.f32 0.2, %v989_v38  ;;  %vm991_vm6 = vcmp.ge.f32.partialorder %v983_v40, 0.0 }
 0x265   :  { %v5624_v51 = vsel %vm990_vm14, %v982_v34, %v998_v45  ;;  %v5626_v52 = vsel %vm992_vm15, %v984_v35, %v1000_v47  ;;  %v999_v56 = vmul.f32 0.2, %v983_v40  ;;  %vm993_vm7 = vcmp.ge.f32.partialorder %v985_v41, 0.0  ;;  %v4779_v45 = vld [vmem:[%s6793_s5 + $0x88] sm:$0xff]  }
 0x266   :  { %v5628_v50 = vsel %vm996_vm1, %v988_v37, %v1004_v46  ;;  %v1014_v57 = vrot.slane %v5624_v51, 7  ;;  %v1016_v58 = vrot.slane %v5626_v52, 7  ;;  %v5632_v61 = vsel %vm997_vm3, %v989_v38, %v1005_v44 }
 0x267   :  { %v1020_v62 = vrot.slane %v5628_v50, 7  ;;  %v1021_v63 = vrot.slane %v5632_v61, 7  ;;  %v1001_v2 = vmul.f32 0.2, %v985_v41  ;;  %v1007_v3 = vsel %vm991_vm6, %v983_v40, %v999_v56 }
 0x268   :  { %v1026_v1 = vsel %vm376_vm5, %v1014_v57, %v1016_v58  ;;  %v1019_v4 = vrot.slane %v5622_v49, 7  ;;  %v1015_v7 = vrot.slane %v1007_v3, 7  ;;  %vm994_vm9 = vcmp.ge.f32.partialorder %v986_v48, 0.0 }
 0x269   :  { %v1028_v6 = vsel %vm376_vm5, %v1020_v62, %v1014_v57  ;;  %v1002_v10 = vmul.f32 0.2, %v986_v48  ;;  %v1044_v11 = vrot.slane %v5628_v50, 1  ;;  %v1009_v13 = vsel %vm993_vm7, %v985_v41, %v1001_v2  ;;  %v4783_v2 = vld [vmem:[%s6793_s5 + $0x98] sm:$0xff]  }
 0x26a   :  { %v4072_v12 = vpack.c.bf16 %v1026_v1, %v1028_v6  ;;  %v1023_v14 = vsel %vm376_vm5, %v1019_v4, %v1021_v63  ;;  %v1045_v15 = vrot.slane %v5632_v61, 1  ;;  %v1017_v20 = vrot.slane %v1009_v13, 7  ;;  %v4785_v6 = vld [vmem:[%s6793_s5 + $0xa0] sm:$0xff]  }
 0x26b   :  { %v1029_v21 = vsel %vm376_vm5, %v1021_v63, %v1015_v7  ;;  %v5647_v22 = vsel %vm994_vm9, %v986_v48, %v1002_v10  ;;  %v1071_v25 = vpack.c.bf16 %v5632_v61, %v5622_v49  ;;  %v1039_v29 = vrot.slane %v1007_v3, 1  ;;  %v4780_v48 = vld [vmem:[%s6793_s5 + $0xd0] sm:$0xff]   ;;  %v4782_v63 = vld [vmem:[%s6793_s5 + $0xd8] sm:$0xff]  }
 0x26c   :  { %v1018_v23 = vrot.slane %v5647_v22, 7  ;;  %v1042_v24 = vrot.slane %v5647_v22, 1  ;;  %v1070_v26 = vpack.c.bf16 %v5628_v50, %v5647_v22  ;;  %v1027_v27 = vsel %vm376_vm5, %v1015_v7, %v1017_v20  ;;  %v4787_v7 = vld [vmem:[%s6793_s5 + $0xa8] sm:$0xff]   ;;  %v4788_v10 = vld [vmem:[%s6793_s5 + $0xf0] sm:$0xff]   ;;  %v4799_v61 = vld [vmem:[%s6793_s5 + $0x118] sm:$0xff]  }
 0x26d   :  { %v1025_v28 = vsel %vm376_vm5, %v1017_v20, %v1019_v4  ;;  %v1041_v30 = vrot.slane %v1009_v13, 1  ;;  %v4069_v31 = vpack.c.bf16 %v1027_v27, %v1029_v21  ;;  %v1043_v33 = vrot.slane %v5622_v49, 1  ;;  %v4784_v4 = vld [vmem:[%s6793_s5 + $0xe0] sm:$0xff]   ;;  %v4794_v21 = vld [vmem:[%s6793_s5 + $0x148] sm:$0xff]   ;;  %v4798_v49 = vld [vmem:[%s6793_s5 + $0x158] sm:$0xff]  }
 0x26e   :  { %v4075_v16 = vpack.c.bf16 %v1023_v14, %v1025_v28  ;;  %v1022_v53 = vsel %vm376_vm5, %v1018_v23, %v1020_v62  ;;  %v1024_v59 = vsel %vm376_vm5, %v1016_v58, %v1018_v23  ;;  %v1038_v35 = vrot.slane %v5624_v51, 1  ;;  %v4781_v62 = vld [vmem:[%s6793_s5 + $0x90] sm:$0xff]   ;;  %v4792_v14 = vld [vmem:[%s6793_s5 + $0x140] sm:$0xff]   ;;  %v4795_v23 = vld [vmem:[%s6793_s5 + $0x108] sm:$0xff]  }
 0x26f   :  { %v4078_v19 = vpack.c.bf16 %v1022_v53, %v1024_v59  ;;  %v5672_v34 = vsel %vm397_vm2, %v1039_v29, %v1041_v30  ;;  %4070 = vmatprep.mubr.msk.bf16.mxu0 %vm5422_vm0, %v4069_v31  ;;  %v1040_v37 = vrot.slane %v5626_v52, 1  ;;  %v5680_v38 = vsel %vm397_vm2, %v1045_v15, %v1039_v29  ;;  %v4802_v50 = vld [vmem:[%s6793_s5 + $0x168] sm:$0xff]   ;;  %v4805_v27 = vld [vmem:[%s6793_s5 + $0x130] sm:$0xff]   ;;  %v4806_v28 = vld [vmem:[%s6793_s5 + $0x178] sm:$0xff]  }
 0x270   :  { %v5684_v40 = vsel %vm397_vm2, %v1042_v24, %v1044_v11  ;;  %4073 = vmatmul.mubr.msk.bf16.vlgmr.msra.gmra.mrb[8].mxu0 %vm5422_vm0, %v4072_v12  ;;  %v1049_v41 = vsel %vm397_vm2, %v1041_v30, %v1043_v33  ;;  %v5692_v42 = vsel %vm397_vm2, %v1043_v33, %v1045_v15  ;;  %v5696_v43 = vsel %vm397_vm2, %v1044_v11, %v1038_v35  ;;  %v4789_v11 = vld [vmem:[%s6793_s5 + $0xb0] sm:$0xff]   ;;  %v4790_v12 = vld [vmem:[%s6793_s5 + $0xf8] sm:$0xff]   ;;  %v4793_v15 = vld [vmem:[%s6793_s5 + $0x100] sm:$0xff]  }
 0x271   :  { %4395 = vmatpush3.bf16.msra.mxu0 %v4777_v32  ;;  %4076 = vmatprep.mubr.msk.bf16.mxu0 %vm5446_vm4, %v4075_v16  ;;  %v4081_v47 = vpack.c.bf16 %v1049_v41, %v5672_v34  ;;  %v5706_v46 = vsel %vm397_vm2, %v1040_v37, %v1042_v24  ;;  %v5710_v44 = vsel %vm397_vm2, %v1038_v35, %v1040_v37  ;;  %v4800_v24 = vld [vmem:[%s6793_s5 + $0x160] sm:$0xff]   ;;  %v4803_v22 = vld [vmem:[%s6793_s5 + $0x128] sm:$0xff]   ;;  %v4807_v29 = vld [vmem:[%s6793_s5 + $0x138] sm:$0xff]  }
 0x272   :  { %4396 = vmatprep.subr.bf16.mxu0 %v4778_v0  ;;  %v4084_v56 = vpack.c.bf16 %v5706_v46, %v5710_v44  ;;  %v4087_v57 = vpack.c.bf16 %v5680_v38, %v5692_v42  ;;  %v4090_v58 = vpack.c.bf16 %v5696_v43, %v5684_v40  ;;  %v1065_v1 = vpack.c.bf16 %v1009_v13, %v1007_v3  ;;  %v4786_v3 = vld [vmem:[%s6793_s5 + $0xe8] sm:$0xff]   ;;  %v4791_v13 = vld [vmem:[%s6793_s5 + $0xb8] sm:$0xff]  }
 0x273   :  { %v1064_v20 = vpack.c.bf16 %v5626_v52, %v5624_v51  ;;  %v4796_v51 = vld [vmem:[%s6793_s5 + $0x150] sm:$0xff]   ;;  %v4810_v30 = vld [vmem:[%s6797_s0 + $0x4] ss:$8 sps:$4 sm:$0xff]   ;;  %v4808_v31 = vld [vmem:[%s6797_s0] ss:$8 sps:$4 sm:$0xff]  }
 0x274   :  { %v4797_v52 = vld [vmem:[%s6793_s5 + $0x110] sm:$0xff]   ;;  %2017 = vmatprep.subr.bf16.mxu1 %v4810_v30  ;;  %v4816_v53 = vld [vmem:[%s6797_s0 + $0x24] ss:$8 sps:$4 sm:$0xff]   ;;  %v4814_v59 = vld [vmem:[%s6797_s0 + $0x20] ss:$8 sps:$4 sm:$0xff]  }
 0x275   :  { %4397 = vmatpush3.bf16.msra.mxu0 %v4779_v45  ;;  %2018 = vmatpush1.bf16.msra.mxu1 %v4808_v31  ;;  %v4813_v32 = vld [vmem:[%s6797_s0 + $0x14] ss:$8 sps:$4 sm:$0xff]   ;;  %v4811_v16 = vld [vmem:[%s6797_s0 + $0x10] ss:$8 sps:$4 sm:$0xff]   ;;  %v4822_v33 = vld [vmem:[%s6797_s0 + $0x44] ss:$8 sps:$4 sm:$0xff]  }
 0x276   :  { %4398 = vmatprep.subr.bf16.mxu0 %v4780_v48  ;;  %2019 = vmatprep.subr.bf16.mxu1 %v4813_v32  ;;  %v4819_v0 = vld [vmem:[%s6797_s0 + $0x34] ss:$8 sps:$4 sm:$0xff]   ;;  %v4820_v34 = vld [vmem:[%s6797_s0 + $0x40] ss:$8 sps:$4 sm:$0xff]   ;;  %v4823_v37 = vld [vmem:[%s6797_s0 + $0x50] ss:$8 sps:$4 sm:$0xff]  }
 0x277   :  { %v4825_v35 = vld [vmem:[%s6797_s0 + $0x54] ss:$8 sps:$4 sm:$0xff]   ;;  %v4828_v38 = vld [vmem:[%s6797_s0 + $0x64] ss:$8 sps:$4 sm:$0xff]   ;;  %v4826_v40 = vld [vmem:[%s6797_s0 + $0x60] ss:$8 sps:$4 sm:$0xff]  }
 0x278   :  { %4079 = vmatmul.mubr.msk.bf16.gmra.mrb[12].mxu0 %vm5446_vm4, %v4078_v19  ;;  %v4817_v19 = vld [vmem:[%s6797_s0 + $0x30] ss:$8 sps:$4 sm:$0xff]   ;;  %v4831_v41 = vld [vmem:[%s6797_s0 + $0x74] ss:$8 sps:$4 sm:$0xff]   ;;  %v4834_v43 = vld [vmem:[%s6797_s0 + $0x84] ss:$8 sps:$4 sm:$0xff]  }
 0x279   :  { %4399 = vmatpush3.bf16.msra.mxu0 %v4781_v62  ;;  %1546 = vmatprep.mubr.bf16.mxu0 %v1065_v1  ;;  %v4829_v42 = vld [vmem:[%s6797_s0 + $0x70] ss:$8 sps:$4 sm:$0xff]   ;;  %v4832_v45 = vld [vmem:[%s6797_s0 + $0x80] ss:$8 sps:$4 sm:$0xff]   ;;  %v4840_v44 = vld [vmem:[%s6797_s0 + $0xa4] ss:$8 sps:$4 sm:$0xff]  }
 0x27a   :  { %4400 = vmatprep.subr.bf16.mxu0 %v4782_v63  ;;  %2020 = vmatpush1.bf16.msra.mxu1 %v4811_v16  ;;  %v4835_v46 = vld [vmem:[%s6797_s0 + $0x90] ss:$8 sps:$4 sm:$0xff]   ;;  %v4838_v48 = vld [vmem:[%s6797_s0 + $0xa0] ss:$8 sps:$4 sm:$0xff]  }
 0x27b   :  { %2021 = vmatprep.subr.bf16.mxu1 %v4816_v53  ;;  %v4841_v1 = vld [vmem:[%s6797_s0 + $0xb0] ss:$8 sps:$4 sm:$0xff]  }
 0x27d   :  { %4401 = vmatpush3.bf16.msra.mxu0 %v4783_v2 }
 0x27e   :  { %4402 = vmatprep.subr.bf16.mxu0 %v4784_v4  ;;  %2022 = vmatpush1.bf16.msra.mxu1 %v4814_v59 }
 0x27f   :  { %2023 = vmatprep.subr.bf16.mxu1 %v4819_v0 }
 0x281   :  { %4403 = vmatpush3.bf16.msra.mxu0 %v4785_v6  ;;  %v4846_v6 = vld [vmem:[%s6797_s0 + $0xc4] ss:$8 sps:$4 sm:$0xff]  }
 0x282   :  { %4404 = vmatprep.subr.bf16.mxu0 %v4786_v3  ;;  %2024 = vmatpush1.bf16.msra.mxu1 %v4817_v19  ;;  %v4844_v3 = vld [vmem:[%s6797_s0 + $0xc0] ss:$8 sps:$4 sm:$0xff]  }
 0x283   :  { %2025 = vmatprep.subr.bf16.mxu1 %v4822_v33 }
 0x285   :  { %4405 = vmatpush3.bf16.msra.mxu0 %v4787_v7 }
 0x286   :  { %4406 = vmatprep.subr.bf16.mxu0 %v4788_v10  ;;  %2026 = vmatpush1.bf16.msra.mxu1 %v4820_v34 }
 0x287   :  { %2027 = vmatprep.subr.bf16.mxu1 %v4825_v35 }
 0x289   :  { %4407 = vmatpush3.bf16.msra.mxu0 %v4789_v11  ;;  %v4849_v11 = vld [vmem:[%s6797_s0 + $0xd4] ss:$8 sps:$4 sm:$0xff]  }
 0x28a   :  { %4408 = vmatprep.subr.bf16.mxu0 %v4790_v12  ;;  %2028 = vmatpush1.bf16.msra.mxu1 %v4823_v37 }
 0x28b   :  { %2029 = vmatprep.subr.bf16.mxu1 %v4828_v38 }
 0x28d   :  { %4409 = vmatpush3.bf16.msra.mxu0 %v4791_v13 }
 0x28e   :  { %4422 = vmatprep.subr.bf16.mxu0 %v4792_v14  ;;  %2030 = vmatpush1.bf16.msra.mxu1 %v4826_v40  ;;  %v4847_v14 = vld [vmem:[%s6797_s0 + $0xd0] ss:$8 sps:$4 sm:$0xff]  }
 0x28f   :  { %2031 = vmatprep.subr.bf16.mxu1 %v4831_v41 }
 0x290   :  { %1547 = vmatmul.mubr.bf16.vlgmr.msra.gmra.mrb[16].mxu0 %v1064_v20 }
 0x291   :  { %1554 = vmatprep.mubr.bf16.mxu0 %v1071_v25  ;;  %4423 = vmatpush3.bf16.msra.mxu0 %v4793_v15  ;;  %v4801_v25 = vld [vmem:[%s6793_s5 + $0x120] sm:$0xff]  }
 0x292   :  { %4424 = vmatprep.subr.bf16.mxu0 %v4794_v21  ;;  %2032 = vmatpush1.bf16.msra.mxu1 %v4829_v42  ;;  %v4852_v21 = vld [vmem:[%s6797_s0 + $0xe4] ss:$8 sps:$4 sm:$0xff]  }
 0x293   :  { %2033 = vmatprep.subr.bf16.mxu1 %v4834_v43 }
 0x295   :  { %4425 = vmatpush3.bf16.msra.mxu0 %v4795_v23  ;;  %v4850_v23 = vld [vmem:[%s6797_s0 + $0xe0] ss:$8 sps:$4 sm:$0xff]  }
 0x296   :  { %4426 = vmatprep.subr.bf16.mxu0 %v4796_v51  ;;  %2034 = vmatpush1.bf16.msra.mxu1 %v4832_v45  ;;  %v4855_v51 = vld [vmem:[%s6797_s0 + $0xf4] ss:$8 sps:$4 sm:$0xff]  }
 0x298   :  { %1555 = vmatmul.mubr.bf16.gmra.mrb[20].mxu0 %v1070_v26  ;;  %v4804_v26 = vld [vmem:[%s6793_s5 + $0x170] sm:$0xff]  }
 0x299   :  { %4427 = vmatpush3.bf16.msra.mxu0 %v4797_v52  ;;  %4082 = vmatprep.mubr.msk.bf16.mxu0 %vm5485_vm8, %v4081_v47  ;;  %v4837_v47 = vld [vmem:[%s6797_s0 + $0x94] ss:$8 sps:$4 sm:$0xff]   ;;  %v4853_v52 = vld [vmem:[%s6797_s0 + $0xf0] ss:$8 sps:$4 sm:$0xff]  }
 0x29a   :  { %4428 = vmatprep.subr.bf16.mxu0 %v4798_v49  ;;  %2035 = vmatprep.subr.bf16.mxu1 %v4837_v47  ;;  %v4858_v49 = vld [vmem:[%s6797_s0 + $0x104] ss:$8 sps:$4 sm:$0xff]  }
 0x29b   :  { %2036 = vmatpush1.bf16.msra.mxu1 %v4835_v46 }
 0x29c   :  { %2037 = vmatprep.subr.bf16.mxu1 %v4840_v44 }
 0x29d   :  { %4429 = vmatpush3.bf16.msra.mxu0 %v4799_v61  ;;  %v4019_v61 = vld [vmem:[%s6798_s4] ss:$0 sm:$0xff] }
 0x29e   :  { %4430 = vmatprep.subr.bf16.mxu0 %v4800_v24 }
 0x29f   :  { %2038 = vmatpush1.bf16.msra.mxu1 %v4838_v48 }
 0x2a1   :  { %4431 = vmatpush3.bf16.msra.mxu0 %v4801_v25 }
 0x2a2   :  { %4432 = vmatprep.subr.bf16.mxu0 %v4802_v50 }
 0x2a5   :  { %4433 = vmatpush3.bf16.msra.mxu0 %v4803_v22 }
 0x2a6   :  { %4434 = vmatprep.subr.bf16.mxu0 %v4804_v26 }
 0x2a9   :  { %4435 = vmatpush3.bf16.msra.mxu0 %v4805_v27 }
 0x2aa   :  { %4436 = vmatprep.subr.bf16.mxu0 %v4806_v28 }
 0x2ad   :  { %4437 = vmatpush3.bf16.msra.mxu0 %v4807_v29 }
 0x2b0   :  { %4085 = vmatmul.mubr.msk.bf16.vlgmr.msra.gmra.mrb[24].mxu0 %vm5485_vm8, %v4084_v56 }
 0x2b1   :  { %4088 = vmatprep.mubr.msk.bf16.mxu0 %vm5492_vm11, %v4087_v57 }
 0x2b8   :  { %4091 = vmatmul.mubr.msk.bf16.gmra.mrb[28].mxu0 %vm5492_vm11, %v4090_v58  ;;  %v4843_v58 = vld [vmem:[%s6797_s0 + $0xb4] ss:$8 sps:$4 sm:$0xff]  }
 0x2b9   :  { %2039 = vmatprep.subr.bf16.mxu1 %v4843_v58 }
 0x2ba   :  { %2040 = vmatpush1.bf16.msra.mxu1 %v4841_v1 }
 0x2bb   :  { %2041 = vmatprep.subr.bf16.mxu1 %v4846_v6 }
 0x2be   :  { %2042 = vmatpush1.bf16.msra.mxu1 %v4844_v3 }
 0x2bf   :  { %2043 = vmatprep.subr.bf16.mxu1 %v4849_v11 }
 0x2c2   :  { %2044 = vmatpush1.bf16.msra.mxu1 %v4847_v14 }
 0x2c3   :  { %2045 = vmatprep.subr.bf16.mxu1 %v4852_v21 }
 0x2c6   :  { %2046 = vmatpush1.bf16.msra.mxu1 %v4850_v23 }
 0x2c7   :  { %2047 = vmatprep.subr.bf16.mxu1 %v4855_v51 }
 0x2ca   :  { %2048 = vmatpush1.bf16.msra.mxu1 %v4853_v52 }
 0x2cb   :  { %2070 = vmatprep.subr.bf16.mxu1 %v4858_v49 }
 0x343   :  { %v4382_v56 = vpop.f32.mrb[8].mxu0 }
 0x344   :  { %v4383_v57 = vpop.f32.mrb[9].mxu0 }
 0x345   :  { %v4384_v62 = vadd.f32 %v4383_v57, %v4382_v56  ;;  %v4385_v63 = vpop.f32.mrb[10].mxu0 }
 0x346   :  { %v4386_v2 = vpop.f32.mrb[11].mxu0 }
 0x347   :  { %v4387_v4 = vadd.f32 %v4386_v2, %v4385_v63  ;;  %v1500_v50 = vadd.f32 %v4384_v62, %v4019_v61 }
 0x349   :  { %v1503_v28 = vadd.f32 %v4387_v4, %v4019_v61 }
 0x34b   :  { %v4388_v7 = vpop.f32.mrb[12].mxu0 }
 0x34c   :  { %v4389_v10 = vpop.f32.mrb[13].mxu0 }
 0x34d   :  { %v4390_v12 = vadd.f32 %v4389_v10, %v4388_v7  ;;  %v4391_v13 = vpop.f32.mrb[14].mxu0 }
 0x34e   :  { %v4392_v15 = vpop.f32.mrb[15].mxu0 }
 0x34f   :  { %v4393_v20 = vadd.f32 %v4392_v15, %v4391_v13  ;;  %v1508_v53 = vadd.f32 %v4390_v12, %v4019_v61 }
 0x351   :  { %v1511_v33 = vadd.f32 %v4393_v20, %v4019_v61 }
 0x363   :  { %v4410_v24 = vpop.f32.mrb[16].mxu0 }
 0x364   :  { %v4411_v25 = vpop.f32.mrb[17].mxu0 }
 0x365   :  { %v4412_v22 = vadd.f32 %v4411_v25, %v4410_v24  ;;  %v4413_v26 = vpop.f32.mrb[18].mxu0 }
 0x366   :  { %v4414_v27 = vpop.f32.mrb[19].mxu0 }
 0x367   :  { %v1549_v29 = vadd.f32 %v4412_v22, %v1500_v50  ;;  %v4415_v30 = vadd.f32 %v4414_v27, %v4413_v26 }
 0x369   :  { %v1552_v31 = vadd.f32 %v4415_v30, %v1503_v28 }
 0x36b   :  { %v4416_v32 = vpop.f32.mrb[20].mxu0 }
 0x36c   :  { %v4417_v16 = vpop.f32.mrb[21].mxu0 }
 0x36d   :  { %v4418_v59 = vadd.f32 %v4417_v16, %v4416_v32  ;;  %v4419_v0 = vpop.f32.mrb[22].mxu0 }
 0x36e   :  { %v4420_v19 = vpop.f32.mrb[23].mxu0 }
 0x36f   :  { %v1557_v34 = vadd.f32 %v4418_v59, %v1508_v53  ;;  %v4421_v35 = vadd.f32 %v4420_v19, %v4419_v0  ;;  %v1652_v53 = vld [vmem:[%s6749_s11] sm:$0x1] }
 0x371   :  { %v1560_v37 = vadd.f32 %v4421_v35, %v1511_v33 }
 0x383   :  { %v4438_v38 = vpop.f32.mrb[24].mxu0 }
 0x384   :  { %v4439_v40 = vpop.f32.mrb[25].mxu0 }
 0x385   :  { %v4440_v41 = vadd.f32 %v4439_v40, %v4438_v38  ;;  %v4441_v42 = vpop.f32.mrb[26].mxu0 }
 0x386   :  { %v4442_v43 = vpop.f32.mrb[27].mxu0 }
 0x387   :  { %v1598_v45 = vadd.f32 %v4440_v41, %v1549_v29  ;;  %v4443_v47 = vadd.f32 %v4442_v43, %v4441_v42 }
 0x389   :  { %v1601_v46 = vadd.f32 %v4443_v47, %v1552_v31  ;;  %v1648_v31 = vld [vmem:[%s6799_s6] sm:$0x1] }
 0x38b   :  { %v1616_v44 = vadd.f32 %v1601_v46, %v1598_v45  ;;  %v4444_v48 = vpop.f32.mrb[28].mxu0 }
 0x38c   :  { %v4445_v56 = vpop.f32.mrb[29].mxu0 }
 0x38d   :  { %v4446_v57 = vadd.f32 %v4445_v56, %v4444_v48  ;;  %v4447_v58 = vpop.f32.mrb[30].mxu0 }
 0x38e   :  { %v4448_v62 = vpop.f32.mrb[31].mxu0 }
 0x38f   :  { %v1606_v63 = vadd.f32 %v4446_v57, %v1557_v34  ;;  %v4449_v1 = vadd.f32 %v4448_v62, %v4447_v58 }
 0x391   :  { %v1614_v2 = vsel %vm154_vm12, %v1606_v63, 0.0  ;;  %v1609_v4 = vadd.f32 %v4449_v1, %v1560_v37 }
 0x392   :  { %v1617_v6 = vadd.f32 %v1616_v44, %v1614_v2 }
 0x394   :  { %v1619_v3 = vrot.slane %v1617_v6, 4 }
 0x396   :  { %v1620_v7 = vadd.f32 %v1619_v3, %v1617_v6 }
 0x398   :  { %v1621_v10 = vrot.slane %v1620_v7, 2 }
 0x39a   :  { %v1622_v11 = vadd.f32 %v1621_v10, %v1620_v7 }
 0x39c   :  { %v1623_v12 = vrot.slane %v1622_v11, 1 }
 0x39e   :  { %v1624_v13 = vadd.f32 %v1623_v12, %v1622_v11  ;;  %v4856_v12 = vld [vmem:[%s6797_s0 + $0x100] ss:$8 sps:$4 sm:$0xff]  }
 0x3a0   :  { %v1625_v14 = vmul.f32 0.055555556, %v1624_v13 }
 0x3a2   :  { %v1626_v15 = vsub.f32 %v1598_v45, %v1625_v14  ;;  %v1627_v20 = vsub.f32 %v1601_v46, %v1625_v14  ;;  %v1628_v21 = vsub.f32 %v1606_v63, %v1625_v14 }
 0x3a4   :  { %v1632_v23 = vsel %vm154_vm12, %v1628_v21, 0.0  ;;  %v1634_v51 = vmul.f32 %v1626_v15, %v1626_v15  ;;  %v1635_v52 = vmul.f32 %v1627_v20, %v1627_v20  ;;  %v4861_v21 = vld [vmem:[%s6797_s0 + $0x114] ss:$8 sps:$4 sm:$0xff]  }
 0x3a5   :  { %v1636_v49 = vmul.f32 %v1632_v23, %v1632_v23 }
 0x3a6   :  { %v1638_v61 = vadd.f32 %v1635_v52, %v1634_v51 }
 0x3a8   :  { %v1639_v24 = vadd.f32 %v1638_v61, %v1636_v49 }
 0x3aa   :  { %v1641_v25 = vrot.slane %v1639_v24, 4 }
 0x3ac   :  { %v1642_v50 = vadd.f32 %v1641_v25, %v1639_v24 }
 0x3ae   :  { %v1643_v22 = vrot.slane %v1642_v50, 2 }
 0x3b0   :  { %v1644_v26 = vadd.f32 %v1643_v22, %v1642_v50  ;;  %v4859_v50 = vld [vmem:[%s6797_s0 + $0x110] ss:$8 sps:$4 sm:$0xff]  }
 0x3b2   :  { %v1645_v27 = vrot.slane %v1644_v26, 1 }
 0x3b4   :  { %v1646_v28 = vadd.f32 %v1645_v27, %v1644_v26  ;;  %v4864_v26 = vld [vmem:[%s6797_s0 + $0x124] ss:$8 sps:$4 sm:$0xff]   ;;  %v4862_v27 = vld [vmem:[%s6797_s0 + $0x120] ss:$8 sps:$4 sm:$0xff]  }
 0x3b6   :  { %v1647_v29 = vmul.f32 0.055555556, %v1646_v28  ;;  %v4867_v28 = vld [vmem:[%s6797_s0 + $0x134] ss:$8 sps:$4 sm:$0xff]  }
 0x3b8   :  { %v1649_v30 = vadd.f32 1e-05, %v1647_v29  ;;  %v4865_v29 = vld [vmem:[%s6797_s0 + $0x130] ss:$8 sps:$4 sm:$0xff]  }
 0x3ba   :  { %5052 = vrsqrt.f32 %v1649_v30  ;;  %v4870_v30 = vld [vmem:[%s6797_s0 + $0x144] ss:$8 sps:$4 sm:$0xff]  }
 0x3c4   :  { %v5053_v32 = vpop.eup %5052 }
 0x3c5   :  { %v1651_v16 = vmul.f32 %v5053_v32, %v1648_v31  ;;  %v4868_v31 = vld [vmem:[%s6797_s0 + $0x140] ss:$8 sps:$4 sm:$0xff]   ;;  %v4873_v32 = vld [vmem:[%s6797_s0 + $0x154] ss:$8 sps:$4 sm:$0xff]  }
 0x3c7   :  { %v1653_v59 = vmul.f32 %v1651_v16, %v1625_v14  ;;  %v1659_v0 = vrot.slane %v1651_v16, %v5550_v36  ;;  %v4871_v16 = vld [vmem:[%s6797_s0 + $0x150] ss:$8 sps:$4 sm:$0xff]  }
 0x3c9   :  { %v1654_v19 = vsub.f32 %v1652_v53, %v1653_v59  ;;  %v1663_v33 = vmul.f32 %v1659_v0, %v1606_v63  ;;  %v1664_v34 = vmul.f32 %v1659_v0, %v1609_v4  ;;  %v1661_v35 = vmul.f32 %v1659_v0, %v1598_v45  ;;  %v4876_v53 = vld [vmem:[%s6797_s0 + $0x164] ss:$8 sps:$4 sm:$0xff]   ;;  %v4874_v59 = vld [vmem:[%s6797_s0 + $0x160] ss:$8 sps:$4 sm:$0xff]  }
 0x3ca   :  { %v1662_v37 = vmul.f32 %v1659_v0, %v1601_v46  ;;  %v4879_v0 = vld [vmem:[%s6797_s0 + $0x174] ss:$8 sps:$4 sm:$0xff]  }
 0x3cb   :  { %v1669_v38 = vrot.slane %v1654_v19, %v5550_v36  ;;  %v4877_v19 = vld [vmem:[%s6797_s0 + $0x170] ss:$8 sps:$4 sm:$0xff]  }
 0x3cd   :  { %v1673_v40 = vadd.f32 %v1669_v38, %v1663_v33  ;;  %v1674_v41 = vadd.f32 %v1669_v38, %v1664_v34  ;;  %v1671_v42 = vadd.f32 %v1669_v38, %v1661_v35  ;;  %v1672_v43 = vadd.f32 %v1669_v38, %v1662_v37  ;;  %v4880_v33 = vld [vmem:[%s6750_s14 + $0x40] sm:$0xff]   ;;  %v4882_v35 = vld [vmem:[%s6750_s14 + $0x48] sm:$0xff]   ;;  %v4884_v38 = vld [vmem:[%s6750_s14 + $0x50] sm:$0xff]  }
 0x3ce   :  { %v4881_v34 = vld [vmem:[%s6750_s14] sm:$0xff]   ;;  %4450 = vmatprep.subr.bf16.mxu0 %v4880_v33  ;;  %v4883_v37 = vld [vmem:[%s6750_s14 + $0x8] sm:$0xff]  }
 0x3cf   :  { %vm1678_vm10 = vcmp.ge.f32.partialorder %v1674_v41, 0.0  ;;  %v1682_v47 = vmul.f32 0.2, %v1674_v41  ;;  %vm1675_vm13 = vcmp.ge.f32.partialorder %v1671_v42, 0.0  ;;  %vm1676_vm14 = vcmp.ge.f32.partialorder %v1672_v43, 0.0  ;;  %4451 = vmatpush3.bf16.msra.mxu0 %v4881_v34 }
 0x3d0   :  { %v1679_v44 = vmul.f32 0.2, %v1671_v42  ;;  %v1680_v48 = vmul.f32 0.2, %v1672_v43  ;;  %vm1677_vm15 = vcmp.ge.f32.partialorder %v1673_v40, 0.0  ;;  %4452 = vmatprep.subr.bf16.mxu0 %v4882_v35 }
 0x3d1   :  { %v1686_v56 = vsel %vm1678_vm10, %v1674_v41, %v1682_v47  ;;  %v1681_v57 = vmul.f32 0.2, %v1673_v40  ;;  %v4886_v41 = vld [vmem:[%s6750_s14 + $0x58] sm:$0xff]   ;;  %v4889_v47 = vld [vmem:[%s6750_s14 + $0x20] sm:$0xff]  }
 0x3d2   :  { %v1690_v58 = vrot.slane %v1686_v56, 7  ;;  %v1683_v62 = vsel %vm1675_vm13, %v1671_v42, %v1679_v44  ;;  %v1684_v63 = vsel %vm1676_vm14, %v1672_v43, %v1680_v48  ;;  %v1702_v45 = vrot.slane %v1686_v56, 1  ;;  %v4887_v42 = vld [vmem:[%s6750_s14 + $0x18] sm:$0xff]   ;;  %v4888_v43 = vld [vmem:[%s6750_s14 + $0x60] sm:$0xff]   ;;  %v4890_v44 = vld [vmem:[%s6750_s14 + $0x68] sm:$0xff]  }
 0x3d3   :  { %v1687_v46 = vrot.slane %v1683_v62, 7  ;;  %v1688_v1 = vrot.slane %v1684_v63, 7  ;;  %v1699_v2 = vrot.slane %v1683_v62, 1  ;;  %v1700_v4 = vrot.slane %v1684_v63, 1  ;;  %4453 = vmatpush3.bf16.msra.mxu0 %v4883_v37  ;;  %v4891_v48 = vld [vmem:[%s6750_s14 + $0x28] sm:$0xff]  }
 0x3d4   :  { %v1712_v6 = vpack.c.bf16 %v1684_v63, %v1683_v62  ;;  %v1685_v3 = vsel %vm1677_vm15, %v1673_v40, %v1681_v57  ;;  %v4885_v40 = vld [vmem:[%s6750_s14 + $0x10] sm:$0xff]   ;;  %4454 = vmatprep.subr.bf16.mxu0 %v4884_v38  ;;  %v4895_v62 = vld [vmem:[%s6750_s14 + $0x38] sm:$0xff]   ;;  %v6065_v63 = vld [vmem:[%s6750_s14 + $0x80] sm:$0xff]  }
 0x3d5   :  { %v1693_v7 = vsel %vm376_vm5, %v1687_v46, %v1688_v1  ;;  %v1694_v10 = vsel %vm376_vm5, %v1690_v58, %v1687_v46  ;;  %v1705_v11 = vsel %vm397_vm2, %v1699_v2, %v1700_v4  ;;  %v1689_v13 = vrot.slane %v1685_v3, 7  ;;  %v4893_v57 = vld [vmem:[%s6750_s14 + $0x30] sm:$0xff]  }
 0x3d6   :  { %2049 = vmatprep.mubr.bf16.mxu1 %v1712_v6  ;;  %v4141_v14 = vpack.c.bf16 %v1693_v7, %v1694_v10  ;;  %v1701_v15 = vrot.slane %v1685_v3, 1  ;;  %v1715_v20 = vpack.c.bf16 %v1686_v56, %v1685_v3  ;;  %v1706_v23 = vsel %vm397_vm2, %v1702_v45, %v1699_v2  ;;  %v4892_v56 = vld [vmem:[%s6750_s14 + $0x70] sm:$0xff]  }
 0x3d7   :  { %v1691_v51 = vsel %vm376_vm5, %v1689_v13, %v1690_v58  ;;  %v1692_v52 = vsel %vm376_vm5, %v1688_v1, %v1689_v13  ;;  %4455 = vmatpush3.bf16.msra.mxu0 %v4885_v40  ;;  %v4894_v58 = vld [vmem:[%s6750_s14 + $0x78] sm:$0xff]  }
 0x3d8   :  { %4142 = vmatmul.mubr.msk.bf16.vlgmr.msra.gmra.mrb[8].mxu1 %vm5422_vm0, %v4141_v14  ;;  %v1704_v49 = vsel %vm397_vm2, %v1700_v4, %v1701_v15  ;;  %v4144_v61 = vpack.c.bf16 %v1691_v51, %v1692_v52  ;;  %v1703_v24 = vsel %vm397_vm2, %v1701_v15, %v1702_v45  ;;  %4456 = vmatprep.subr.bf16.mxu0 %v4886_v41  ;;  %v1765_v45 = vld [vmem:[%s6751_s13] sm:$0x3]  ;;  %v2126_v40 = vld [vmem:[%s6753_s1 + $0x18] sm:$0xff] }
 0x3d9   :  { %2071 = vmatpush1.bf16.msra.mxu1 %v4856_v12  ;;  %2059 = vmatprep.mubr.bf16.mxu1 %v1715_v20  ;;  %v4147_v25 = vpack.c.bf16 %v1704_v49, %v1705_v11  ;;  %v4150_v22 = vpack.c.bf16 %v1706_v23, %v1703_v24  ;;  %v1770_v46 = vrot.slane %v1765_v45, %v5550_v36 }
 0x3da   :  { %2072 = vmatprep.subr.bf16.mxu1 %v4861_v21  ;;  %v1774_v1 = vrot.slane %v1765_v45, %v5556_v39 }
 0x3db   :  { %4457 = vmatpush3.bf16.msra.mxu0 %v4887_v42 }
 0x3dc   :  { %4458 = vmatprep.subr.bf16.mxu0 %v4888_v43 }
 0x3dd   :  { %2073 = vmatpush1.bf16.msra.mxu1 %v4859_v50 }
 0x3de   :  { %2074 = vmatprep.subr.bf16.mxu1 %v4864_v26 }
 0x3df   :  { %4459 = vmatpush3.bf16.msra.mxu0 %v4889_v47 }
 0x3e0   :  { %4145 = vmatmul.mubr.msk.bf16.gmra.mrb[12].mxu1 %vm5446_vm4, %v4144_v61  ;;  %4460 = vmatprep.subr.bf16.mxu0 %v4890_v44 }
 0x3e1   :  { %2075 = vmatpush1.bf16.msra.mxu1 %v4862_v27  ;;  %2102 = vmatprep.mubr.bf16.mxu1 %v5068_v8 }
 0x3e2   :  { %2076 = vmatprep.subr.bf16.mxu1 %v4867_v28  ;;  %v2123_v28 = vld [vmem:[%s6753_s1] sm:$0xff] }
 0x3e3   :  { %4461 = vmatpush3.bf16.msra.mxu0 %v4891_v48 }
 0x3e4   :  { %4462 = vmatprep.subr.bf16.mxu0 %v4892_v56 }
 0x3e5   :  { %2077 = vmatpush1.bf16.msra.mxu1 %v4865_v29 }
 0x3e6   :  { %2078 = vmatprep.subr.bf16.mxu1 %v4870_v30  ;;  %v2124_v30 = vld [vmem:[%s6753_s1 + $0x8] sm:$0xff] }
 0x3e7   :  { %4463 = vmatpush3.bf16.msra.mxu0 %v4893_v57 }
 0x3e8   :  { %4464 = vmatprep.subr.bf16.mxu0 %v4894_v58 }
 0x3e9   :  { %2079 = vmatpush1.bf16.msra.mxu1 %v4868_v31 }
 0x3ea   :  { %2080 = vmatprep.subr.bf16.mxu1 %v4873_v32 }
 0x3eb   :  { %4465 = vmatpush3.bf16.msra.mxu0 %v4895_v62 }
 0x3ec   :  { %4572 = vmatprep.subr.bf16.mxu0 %v6065_v63 }
 0x3ed   :  { %2081 = vmatpush1.bf16.msra.mxu1 %v4871_v16 }
 0x3ee   :  { %2082 = vmatprep.subr.bf16.mxu1 %v4876_v53 }
 0x3f1   :  { %2083 = vmatpush1.bf16.msra.mxu1 %v4874_v59 }
 0x3f2   :  { %2084 = vmatprep.subr.bf16.mxu1 %v4879_v0 }
 0x3f5   :  { %2085 = vmatpush1.bf16.msra.mxu1 %v4877_v19  ;;  %v2125_v19 = vld [vmem:[%s6753_s1 + $0x10] sm:$0xff] }
 0x3f8   :  { %4148 = vmatmul.mubr.msk.bf16.vlgmr.msra.gmra.mrb[8].mxu1 %vm5485_vm8, %v4147_v25 }
 0x3f9   :  { %2112 = vmatprep.mubr.bf16.mxu1 %v5068_v8 }
 0x400   :  { %4151 = vmatmul.mubr.msk.bf16.gmra.mrb[12].mxu1 %vm5492_vm11, %v4150_v22 }
 0x4cb   :  { %v2104_v2 = vpop.f32.mrb[8].mxu1 }
 0x4cc   :  { %v4616_v4 = vadd.f32 %v2104_v2, %v1770_v46  ;;  %v2106_v6 = vpop.f32.mrb[9].mxu1 }
 0x4cd   :  { %v4617_v3 = vadd.f32 %v2106_v6, %v1774_v1  ;;  %v2108_v7 = vpop.f32.mrb[10].mxu1 }
 0x4ce   :  { %3922 = vst [vmem:[%s6752_s26] sm:$0xff] %v4616_v4  ;;  %v4618_v10 = vadd.f32 %v2108_v7, %v1770_v46  ;;  %v2110_v11 = vpop.f32.mrb[11].mxu1 }
 0x4cf   :  { %v2127_v12 = vmul.f32 0.5, %v4617_v3  ;;  %3923 = vst [vmem:[%s6752_s26 + $0x8] sm:$0xff] %v4617_v3  ;;  %v4619_v13 = vadd.f32 %v2110_v11, %v1774_v1  ;;  %v4897_v11 = vld [vmem:[%s6750_s14 + $0x88] sm:$0xff]  }
 0x4d0   :  { %3924 = vst [vmem:[%s6752_s26 + $0x10] sm:$0xff] %v4618_v10 }
 0x4d1   :  { %v2131_v14 = vmul.f32 1.442695, %v2127_v12  ;;  %v2128_v15 = vmul.f32 0.5, %v4619_v13  ;;  %3925 = vst [vmem:[%s6752_s26 + $0x18] sm:$0xff] %v4619_v13 }
 0x4d3   :  { %5054 = vpow2.f32 %v2131_v14  ;;  %v2133_v20 = vmul.f32 1.442695, %v2128_v15  ;;  %v2114_v21 = vpop.f32.mrb[12].mxu1  ;;  %v4898_v15 = vld [vmem:[%s6750_s14 + $0x90] sm:$0xff]  }
 0x4d4   :  { %v4620_v23 = vadd.f32 %v2114_v21, %v1770_v46  ;;  %v2116_v51 = vpop.f32.mrb[13].mxu1  ;;  %v4901_v21 = vld [vmem:[%s6750_s14 + $0xa8] sm:$0xff]  }
 0x4d5   :  { %5056 = vpow2.f32 %v2133_v20  ;;  %v4621_v52 = vadd.f32 %v2116_v51, %v1774_v1  ;;  %v2118_v49 = vpop.f32.mrb[14].mxu1  ;;  %v4899_v20 = vld [vmem:[%s6750_s14 + $0x98] sm:$0xff]  }
 0x4d6   :  { %3926 = vst [vmem:[%s6752_s26 + $0x20] sm:$0xff] %v4620_v23  ;;  %v4622_v61 = vadd.f32 %v2118_v49, %v1770_v46  ;;  %v2120_v24 = vpop.f32.mrb[15].mxu1  ;;  %v4903_v51 = vld [vmem:[%s6750_s14 + $0xb8] sm:$0xff]   ;;  %v4904_v49 = vld [vmem:[%s6754_s18] ss:$8 sps:$4 sm:$0xff]  }
 0x4d7   :  { %v2129_v25 = vmul.f32 0.5, %v4621_v52  ;;  %3927 = vst [vmem:[%s6752_s26 + $0x28] sm:$0xff] %v4621_v52  ;;  %v4623_v50 = vadd.f32 %v2120_v24, %v1774_v1  ;;  %v4906_v52 = vld [vmem:[%s6754_s18 + $0x4] ss:$8 sps:$4 sm:$0xff]   ;;  %v4907_v24 = vld [vmem:[%s6754_s18 + $0x10] ss:$8 sps:$4 sm:$0xff]  }
 0x4d8   :  { %3928 = vst [vmem:[%s6752_s26 + $0x30] sm:$0xff] %v4622_v61 }
 0x4d9   :  { %v2135_v22 = vmul.f32 1.442695, %v2129_v25  ;;  %v2130_v26 = vmul.f32 0.5, %v4623_v50  ;;  %3929 = vst [vmem:[%s6752_s26 + $0x38] sm:$0xff] %v4623_v50  ;;  %v4912_v25 = vld [vmem:[%s6754_s18 + $0x24] ss:$8 sps:$4 sm:$0xff]  }
 0x4da   :  { %v4910_v50 = vld [vmem:[%s6754_s18 + $0x20] ss:$8 sps:$4 sm:$0xff]  }
 0x4db   :  { %5058 = vpow2.f32 %v2135_v22  ;;  %v2137_v27 = vmul.f32 1.442695, %v2130_v26  ;;  %v4915_v22 = vld [vmem:[%s6754_s18 + $0x34] ss:$8 sps:$4 sm:$0xff]   ;;  %v4913_v26 = vld [vmem:[%s6754_s18 + $0x30] ss:$8 sps:$4 sm:$0xff]  }
 0x4dd   :  { %v5055_v29 = vpop.eup %5054  ;;  %5060 = vpow2.f32 %v2137_v27  ;;  %v4918_v27 = vld [vmem:[%s6754_s18 + $0x44] ss:$8 sps:$4 sm:$0xff]  }
 0x4de   :  { %v2139_v31 = vmul.f32 %v5055_v29, %v2123_v28  ;;  %v4916_v28 = vld [vmem:[%s6754_s18 + $0x40] ss:$8 sps:$4 sm:$0xff]   ;;  %v4921_v29 = vld [vmem:[%s6754_s18 + $0x54] ss:$8 sps:$4 sm:$0xff]  }
 0x4df   :  { %v5057_v32 = vpop.eup %5056 }
 0x4e0   :  { %v2140_v16 = vmul.f32 %v5057_v32, %v2124_v30  ;;  %v2143_v53 = vadd.f32 %v4616_v4, %v2139_v31  ;;  %v4919_v30 = vld [vmem:[%s6754_s18 + $0x50] ss:$8 sps:$4 sm:$0xff]   ;;  %v4924_v31 = vld [vmem:[%s6754_s18 + $0x64] ss:$8 sps:$4 sm:$0xff]   ;;  %v4922_v32 = vld [vmem:[%s6754_s18 + $0x60] ss:$8 sps:$4 sm:$0xff]  }
 0x4e2   :  { %v2144_v59 = vadd.f32 %v4618_v10, %v2140_v16  ;;  %v2147_v0 = vrot.slane %v2143_v53, 7  ;;  %v2159_v35 = vrot.slane %v2143_v53, 1  ;;  %v4927_v16 = vld [vmem:[%s6754_s18 + $0x74] ss:$8 sps:$4 sm:$0xff]  }
 0x4e4   :  { %v2148_v33 = vrot.slane %v2144_v59, 7  ;;  %v2172_v34 = vpack.c.bf16 %v2144_v59, %v2143_v53  ;;  %v2160_v37 = vrot.slane %v2144_v59, 1  ;;  %v4925_v53 = vld [vmem:[%s6754_s18 + $0x70] ss:$8 sps:$4 sm:$0xff]   ;;  %v4930_v59 = vld [vmem:[%s6754_s18 + $0x84] ss:$8 sps:$4 sm:$0xff]  }
 0x4e5   :  { %v5059_v38 = vpop.eup %5058 }
 0x4e6   :  { %v2153_v41 = vsel %vm376_vm5, %v2147_v0, %v2148_v33  ;;  %2408 = vmatprep.mubr.bf16.mxu0 %v2172_v34  ;;  %v2141_v42 = vmul.f32 %v5059_v38, %v2125_v19  ;;  %v2165_v43 = vsel %vm397_vm2, %v2159_v35, %v2160_v37  ;;  %v4933_v19 = vld [vmem:[%s6754_s18 + $0x94] ss:$8 sps:$4 sm:$0xff]   ;;  %v4936_v34 = vld [vmem:[%s6754_s18 + $0xa4] ss:$8 sps:$4 sm:$0xff]   ;;  %v4937_v38 = vld [vmem:[%s6754_s18 + $0xb0] ss:$8 sps:$4 sm:$0xff]  }
 0x4e7   :  { %v5061_v47 = vpop.eup %5060 }
 0x4e8   :  { %v2142_v44 = vmul.f32 %v5061_v47, %v2126_v40  ;;  %v2145_v48 = vadd.f32 %v4620_v23, %v2141_v42  ;;  %v4902_v23 = vld [vmem:[%s6750_s14 + $0xb0] sm:$0xff]   ;;  %v4942_v40 = vld [vmem:[%s6754_s18 + $0xc4] ss:$8 sps:$4 sm:$0xff]   ;;  %v4946_v47 = vld [vmem:[%s6754_s18 + $0xe0] ss:$8 sps:$4 sm:$0xff]  }
 0x4e9   :  { %v4945_v42 = vld [vmem:[%s6754_s18 + $0xd4] ss:$8 sps:$4 sm:$0xff]  }
 0x4ea   :  { %v2146_v56 = vadd.f32 %v4622_v61, %v2142_v44  ;;  %v2149_v57 = vrot.slane %v2145_v48, 7  ;;  %v2161_v58 = vrot.slane %v2145_v48, 1  ;;  %v4909_v61 = vld [vmem:[%s6754_s18 + $0x14] ss:$8 sps:$4 sm:$0xff]   ;;  %v4948_v44 = vld [vmem:[%s6754_s18 + $0xe4] ss:$8 sps:$4 sm:$0xff]  }
 0x4ec   :  { %v2150_v62 = vrot.slane %v2146_v56, 7  ;;  %v2162_v45 = vrot.slane %v2146_v56, 1  ;;  %v2175_v46 = vpack.c.bf16 %v2146_v56, %v2145_v48  ;;  %v2152_v1 = vsel %vm376_vm5, %v2148_v33, %v2149_v57  ;;  %v4931_v33 = vld [vmem:[%s6754_s18 + $0x90] ss:$8 sps:$4 sm:$0xff]   ;;  %v4951_v48 = vld [vmem:[%s6754_s18 + $0xf4] ss:$8 sps:$4 sm:$0xff]  }
 0x4ed   :  { %v2164_v2 = vsel %vm397_vm2, %v2160_v37, %v2161_v58  ;;  %v4939_v37 = vld [vmem:[%s6754_s18 + $0xb4] ss:$8 sps:$4 sm:$0xff]   ;;  %v4949_v56 = vld [vmem:[%s6754_s18 + $0xf0] ss:$8 sps:$4 sm:$0xff]  }
 0x4ee   :  { %v2154_v4 = vsel %vm376_vm5, %v2150_v62, %v2147_v0  ;;  %v2151_v6 = vsel %vm376_vm5, %v2149_v57, %v2150_v62  ;;  %v2163_v3 = vsel %vm397_vm2, %v2161_v58, %v2162_v45  ;;  %v2166_v7 = vsel %vm397_vm2, %v2162_v45, %v2159_v35  ;;  %v4928_v0 = vld [vmem:[%s6754_s18 + $0x80] ss:$8 sps:$4 sm:$0xff]   ;;  %v4954_v57 = vld [vmem:[%s6754_s18 + $0x104] ss:$8 sps:$4 sm:$0xff]  }
 0x4ef   :  { %v4178_v10 = vpack.c.bf16 %v2153_v41, %v2154_v4  ;;  %v4181_v12 = vpack.c.bf16 %v2151_v6, %v2152_v1  ;;  %v4184_v13 = vpack.c.bf16 %v2164_v2, %v2165_v43  ;;  %v4187_v14 = vpack.c.bf16 %v2166_v7, %v2163_v3  ;;  %v4934_v35 = vld [vmem:[%s6754_s18 + $0xa0] ss:$8 sps:$4 sm:$0xff]   ;;  %v4943_v43 = vld [vmem:[%s6754_s18 + $0xd0] ss:$8 sps:$4 sm:$0xff]  }
 0x4f0   :  { %v4940_v41 = vld [vmem:[%s6754_s18 + $0xc0] ss:$8 sps:$4 sm:$0xff]  }
 0x4f1   :  { %4179 = vmatmul.mubr.msk.bf16.vlgmr.msra.gmra.mrb[32].mxu0 %vm5422_vm0, %v4178_v10 }
 0x4f2   :  { %4573 = vmatpush3.bf16.msra.mxu0 %v6065_v63  ;;  %2416 = vmatprep.mubr.bf16.mxu0 %v2175_v46  ;;  %v4900_v63 = vld [vmem:[%s6750_s14 + $0xa0] sm:$0xff]  }
 0x4f3   :  { %4574 = vmatprep.subr.bf16.mxu0 %v4897_v11 }
 0x4f6   :  { %4575 = vmatpush3.bf16.msra.mxu0 %v4897_v11 }
 0x4f7   :  { %4576 = vmatprep.subr.bf16.mxu0 %v4898_v15 }
 0x4f9   :  { %4182 = vmatmul.mubr.msk.bf16.gmra.mrb[36].mxu0 %vm5446_vm4, %v4181_v12  ;;  %v4152_v12 = vld [vmem:[%s6755_s15] ss:$0 sm:$0xff] }
 0x4fa   :  { %4577 = vmatpush3.bf16.msra.mxu0 %v4898_v15  ;;  %4588 = vmatprep.mubr.msk.bf16.mxu0 %vm5485_vm8, %v4184_v13 }
 0x4fb   :  { %4578 = vmatprep.subr.bf16.mxu0 %v4899_v20 }
 0x4fe   :  { %4579 = vmatpush3.bf16.msra.mxu0 %v4899_v20 }
 0x4ff   :  { %4580 = vmatprep.subr.bf16.mxu0 %v4900_v63 }
 0x502   :  { %4581 = vmatpush3.bf16.msra.mxu0 %v4900_v63 }
 0x503   :  { %4582 = vmatprep.subr.bf16.mxu0 %v4901_v21 }
 0x506   :  { %4583 = vmatpush3.bf16.msra.mxu0 %v4901_v21 }
 0x507   :  { %4584 = vmatprep.subr.bf16.mxu0 %v4902_v23 }
 0x50a   :  { %4585 = vmatpush3.bf16.msra.mxu0 %v4902_v23 }
 0x50b   :  { %4586 = vmatprep.subr.bf16.mxu0 %v4903_v51 }
 0x50e   :  { %4587 = vmatpush3.bf16.msra.mxu0 %v4903_v51 }
 0x50f   :  { %2879 = vmatprep.subr.bf16.mxu0 %v4906_v52 }
 0x511   :  { %4589 = vmatmul.mubr.msk.bf16.vlgmr.msra.gmra.mrb[40].mxu0 %vm5492_vm11, %v4187_v14 }
 0x512   :  { %2880 = vmatpush1.bf16.msra.mxu0 %v4904_v49 }
 0x513   :  { %2881 = vmatprep.subr.bf16.mxu0 %v4909_v61 }
 0x516   :  { %2882 = vmatpush1.bf16.msra.mxu0 %v4907_v24 }
 0x517   :  { %2883 = vmatprep.subr.bf16.mxu0 %v4912_v25 }
 0x51a   :  { %2884 = vmatpush1.bf16.msra.mxu0 %v4910_v50 }
 0x51b   :  { %2885 = vmatprep.subr.bf16.mxu0 %v4915_v22 }
 0x51e   :  { %2886 = vmatpush1.bf16.msra.mxu0 %v4913_v26 }
 0x51f   :  { %2887 = vmatprep.subr.bf16.mxu0 %v4918_v27 }
 0x522   :  { %2888 = vmatpush1.bf16.msra.mxu0 %v4916_v28 }
 0x523   :  { %2889 = vmatprep.subr.bf16.mxu0 %v4921_v29 }
 0x526   :  { %2890 = vmatpush1.bf16.msra.mxu0 %v4919_v30 }
 0x527   :  { %2891 = vmatprep.subr.bf16.mxu0 %v4924_v31 }
 0x52a   :  { %2892 = vmatpush1.bf16.msra.mxu0 %v4922_v32 }
 0x52b   :  { %2893 = vmatprep.subr.bf16.mxu0 %v4927_v16 }
 0x52e   :  { %2894 = vmatpush1.bf16.msra.mxu0 %v4925_v53 }
 0x52f   :  { %2895 = vmatprep.subr.bf16.mxu0 %v4930_v59 }
 0x532   :  { %2896 = vmatpush1.bf16.msra.mxu0 %v4928_v0 }
 0x533   :  { %2897 = vmatprep.subr.bf16.mxu0 %v4933_v19 }
 0x536   :  { %2898 = vmatpush1.bf16.msra.mxu0 %v4931_v33 }
 0x537   :  { %2899 = vmatprep.subr.bf16.mxu0 %v4936_v34 }
 0x53a   :  { %2900 = vmatpush1.bf16.msra.mxu0 %v4934_v35 }
 0x53b   :  { %2901 = vmatprep.subr.bf16.mxu0 %v4939_v37 }
 0x53e   :  { %2902 = vmatpush1.bf16.msra.mxu0 %v4937_v38 }
 0x53f   :  { %2903 = vmatprep.subr.bf16.mxu0 %v4942_v40 }
 0x542   :  { %2904 = vmatpush1.bf16.msra.mxu0 %v4940_v41 }
 0x543   :  { %2905 = vmatprep.subr.bf16.mxu0 %v4945_v42 }
 0x546   :  { %2906 = vmatpush1.bf16.msra.mxu0 %v4943_v43 }
 0x547   :  { %2907 = vmatprep.subr.bf16.mxu0 %v4948_v44 }
 0x54a   :  { %2908 = vmatpush1.bf16.msra.mxu0 %v4946_v47 }
 0x54b   :  { %2909 = vmatprep.subr.bf16.mxu0 %v4951_v48 }
 0x54e   :  { %2910 = vmatpush1.bf16.msra.mxu0 %v4949_v56  ;;  %v2510_v56 = vld [vmem:[%s6756_s16] sm:$0x1] }
 0x54f   :  { %2932 = vmatprep.subr.bf16.mxu0 %v4954_v57 }
 0x5c4   :  { %v4466_v58 = vpop.f32.mrb[32].mxu0 }
 0x5c5   :  { %v4467_v62 = vpop.f32.mrb[33].mxu0 }
 0x5c6   :  { %v4468_v45 = vadd.f32 %v4467_v62, %v4466_v58  ;;  %v4469_v46 = vpop.f32.mrb[34].mxu0  ;;  %v2514_v62 = vld [vmem:[%s6757_s17] sm:$0x1] }
 0x5c7   :  { %v4470_v1 = vpop.f32.mrb[35].mxu0 }
 0x5c8   :  { %v4471_v2 = vadd.f32 %v4470_v1, %v4469_v46  ;;  %v2411_v15 = vadd.f32 %v4468_v45, %v4152_v12 }
 0x5ca   :  { %v2414_v52 = vadd.f32 %v4471_v2, %v4152_v12 }
 0x5cc   :  { %v4472_v4 = vpop.f32.mrb[36].mxu0 }
 0x5cd   :  { %v4473_v6 = vpop.f32.mrb[37].mxu0 }
 0x5ce   :  { %v4474_v3 = vadd.f32 %v4473_v6, %v4472_v4  ;;  %v4475_v7 = vpop.f32.mrb[38].mxu0 }
 0x5cf   :  { %v4476_v10 = vpop.f32.mrb[39].mxu0 }
 0x5d0   :  { %v4477_v11 = vadd.f32 %v4476_v10, %v4475_v7  ;;  %v2419_v13 = vadd.f32 %v4474_v3, %v4152_v12 }
 0x5d2   :  { %v2422_v21 = vadd.f32 %v4477_v11, %v4152_v12 }
 0x5e4   :  { %v4590_v14 = vpop.f32.mrb[40].mxu0 }
 0x5e5   :  { %v2468_v20 = vadd.f32 %v4590_v14, %v2419_v13  ;;  %v2459_v63 = vpop.f32.mrb[41].mxu0 }
 0x5e6   :  { %v2460_v23 = vadd.f32 %v2459_v63, %v2411_v15  ;;  %v4591_v51 = vpop.f32.mrb[42].mxu0 }
 0x5e7   :  { %v2471_v49 = vadd.f32 %v4591_v51, %v2422_v21  ;;  %v2462_v61 = vpop.f32.mrb[43].mxu0  ;;  %v2476_v50 = vsel %vm154_vm12, %v2468_v20, 0.0 }
 0x5e8   :  { %v2463_v24 = vadd.f32 %v2462_v61, %v2414_v52 }
 0x5ea   :  { %v2478_v25 = vadd.f32 %v2463_v24, %v2460_v23 }
 0x5ec   :  { %v2479_v22 = vadd.f32 %v2478_v25, %v2476_v50 }
 0x5ee   :  { %v2481_v26 = vrot.slane %v2479_v22, 4 }
 0x5f0   :  { %v2482_v27 = vadd.f32 %v2481_v26, %v2479_v22 }
 0x5f2   :  { %v2483_v28 = vrot.slane %v2482_v27, 2 }
 0x5f4   :  { %v2484_v29 = vadd.f32 %v2483_v28, %v2482_v27 }
 0x5f6   :  { %v2485_v30 = vrot.slane %v2484_v29, 1 }
 0x5f8   :  { %v2486_v31 = vadd.f32 %v2485_v30, %v2484_v29 }
 0x5fa   :  { %v2487_v32 = vmul.f32 0.055555556, %v2486_v31 }
 0x5fc   :  { %v2488_v16 = vsub.f32 %v2460_v23, %v2487_v32  ;;  %v2489_v53 = vsub.f32 %v2463_v24, %v2487_v32  ;;  %v2490_v59 = vsub.f32 %v2468_v20, %v2487_v32 }
 0x5fe   :  { %v2494_v0 = vsel %vm154_vm12, %v2490_v59, 0.0  ;;  %v2496_v19 = vmul.f32 %v2488_v16, %v2488_v16  ;;  %v2497_v33 = vmul.f32 %v2489_v53, %v2489_v53 }
 0x5ff   :  { %v2498_v34 = vmul.f32 %v2494_v0, %v2494_v0 }
 0x600   :  { %v2500_v35 = vadd.f32 %v2497_v33, %v2496_v19  ;;  %v4957_v33 = vld [vmem:[%s6754_s18 + $0x114] ss:$8 sps:$4 sm:$0xff]  }
 0x602   :  { %v2501_v37 = vadd.f32 %v2500_v35, %v2498_v34 }
 0x604   :  { %v2503_v38 = vrot.slane %v2501_v37, 4 }
 0x606   :  { %v2504_v40 = vadd.f32 %v2503_v38, %v2501_v37 }
 0x608   :  { %v2505_v41 = vrot.slane %v2504_v40, 2 }
 0x60a   :  { %v2506_v42 = vadd.f32 %v2505_v41, %v2504_v40  ;;  %v4955_v41 = vld [vmem:[%s6754_s18 + $0x110] ss:$8 sps:$4 sm:$0xff]  }
 0x60c   :  { %v2507_v43 = vrot.slane %v2506_v42, 1 }
 0x60e   :  { %v2508_v47 = vadd.f32 %v2507_v43, %v2506_v42  ;;  %v4960_v42 = vld [vmem:[%s6754_s18 + $0x124] ss:$8 sps:$4 sm:$0xff]   ;;  %v4958_v43 = vld [vmem:[%s6754_s18 + $0x120] ss:$8 sps:$4 sm:$0xff]  }
 0x610   :  { %v2509_v44 = vmul.f32 0.055555556, %v2508_v47  ;;  %v4963_v47 = vld [vmem:[%s6754_s18 + $0x134] ss:$8 sps:$4 sm:$0xff]  }
 0x612   :  { %v2511_v48 = vadd.f32 1e-05, %v2509_v44  ;;  %v4961_v44 = vld [vmem:[%s6754_s18 + $0x130] ss:$8 sps:$4 sm:$0xff]  }
 0x614   :  { %5062 = vrsqrt.f32 %v2511_v48  ;;  %v4966_v48 = vld [vmem:[%s6754_s18 + $0x144] ss:$8 sps:$4 sm:$0xff]  }
 0x61e   :  { %v5063_v57 = vpop.eup %5062 }
 0x61f   :  { %v2513_v58 = vmul.f32 %v5063_v57, %v2510_v56  ;;  %v4964_v56 = vld [vmem:[%s6754_s18 + $0x140] ss:$8 sps:$4 sm:$0xff]   ;;  %v4969_v57 = vld [vmem:[%s6754_s18 + $0x154] ss:$8 sps:$4 sm:$0xff]  }
 0x621   :  { %v2515_v45 = vmul.f32 %v2513_v58, %v2487_v32  ;;  %v2521_v46 = vrot.slane %v2513_v58, %v5550_v36  ;;  %v4952_v32 = vld [vmem:[%s6754_s18 + $0x100] ss:$8 sps:$4 sm:$0xff]   ;;  %v4967_v58 = vld [vmem:[%s6754_s18 + $0x150] ss:$8 sps:$4 sm:$0xff]  }
 0x623   :  { %v2516_v1 = vsub.f32 %v2514_v62, %v2515_v45  ;;  %v2524_v2 = vmul.f32 %v2521_v46, %v2463_v24  ;;  %v2526_v4 = vmul.f32 %v2521_v46, %v2471_v49  ;;  %v2523_v6 = vmul.f32 %v2521_v46, %v2460_v23  ;;  %v4972_v62 = vld [vmem:[%s6754_s18 + $0x164] ss:$8 sps:$4 sm:$0xff]   ;;  %v4970_v45 = vld [vmem:[%s6754_s18 + $0x160] ss:$8 sps:$4 sm:$0xff]  }
 0x624   :  { %v2525_v3 = vmul.f32 %v2521_v46, %v2468_v20  ;;  %v4975_v46 = vld [vmem:[%s6754_s18 + $0x174] ss:$8 sps:$4 sm:$0xff]  }
 0x625   :  { %v2531_v7 = vrot.slane %v2516_v1, %v5550_v36  ;;  %v4973_v1 = vld [vmem:[%s6754_s18 + $0x170] ss:$8 sps:$4 sm:$0xff]  }
 0x627   :  { %v2534_v10 = vadd.f32 %v2531_v7, %v2524_v2  ;;  %v2536_v11 = vadd.f32 %v2531_v7, %v2526_v4  ;;  %v2533_v12 = vadd.f32 %v2531_v7, %v2523_v6  ;;  %v2535_v13 = vadd.f32 %v2531_v7, %v2525_v3  ;;  %v4976_v2 = vld [vmem:[%s6758_s22 + $0x40] sm:$0xff]   ;;  %v4978_v6 = vld [vmem:[%s6758_s22 + $0x48] sm:$0xff]   ;;  %v4980_v7 = vld [vmem:[%s6758_s22 + $0x50] sm:$0xff]  }
 0x628   :  { %v4977_v4 = vld [vmem:[%s6758_s22] sm:$0xff]   ;;  %4488 = vmatprep.subr.bf16.mxu1 %v4976_v2  ;;  %v4979_v3 = vld [vmem:[%s6758_s22 + $0x8] sm:$0xff]  }
 0x629   :  { %vm2537_vm1 = vcmp.ge.f32.partialorder %v2533_v12, 0.0  ;;  %vm2538_vm3 = vcmp.ge.f32.partialorder %v2534_v10, 0.0  ;;  %v2541_v14 = vmul.f32 0.2, %v2533_v12  ;;  %v2542_v15 = vmul.f32 0.2, %v2534_v10  ;;  %4489 = vmatpush3.bf16.msra.mxu1 %v4977_v4 }
 0x62a   :  { %vm2540_vm6 = vcmp.ge.f32.partialorder %v2536_v11, 0.0  ;;  %v2544_v63 = vmul.f32 0.2, %v2536_v11  ;;  %vm2539_vm7 = vcmp.ge.f32.partialorder %v2535_v13, 0.0  ;;  %v2543_v21 = vmul.f32 0.2, %v2535_v13  ;;  %4490 = vmatprep.subr.bf16.mxu1 %v4978_v6 }
 0x62b   :  { %v2545_v51 = vsel %vm2537_vm1, %v2533_v12, %v2541_v14  ;;  %v2546_v52 = vsel %vm2538_vm3, %v2534_v10, %v2542_v15  ;;  %v4981_v10 = vld [vmem:[%s6758_s22 + $0x10] sm:$0xff]   ;;  %v4983_v12 = vld [vmem:[%s6758_s22 + $0x18] sm:$0xff]   ;;  %v4985_v14 = vld [vmem:[%s6758_s22 + $0x20] sm:$0xff]  }
 0x62c   :  { %v2549_v61 = vrot.slane %v2545_v51, 7  ;;  %v2550_v49 = vrot.slane %v2546_v52, 7  ;;  %v2561_v23 = vrot.slane %v2545_v51, 1  ;;  %v2562_v20 = vrot.slane %v2546_v52, 1  ;;  %v4986_v15 = vld [vmem:[%s6758_s22 + $0x68] sm:$0xff]  }
 0x62d   :  { %v2574_v24 = vpack.c.bf16 %v2546_v52, %v2545_v51  ;;  %v2548_v25 = vsel %vm2540_vm6, %v2536_v11, %v2544_v63  ;;  %v2547_v50 = vsel %vm2539_vm7, %v2535_v13, %v2543_v21  ;;  %4491 = vmatpush3.bf16.msra.mxu1 %v4979_v3  ;;  %v4982_v11 = vld [vmem:[%s6758_s22 + $0x58] sm:$0xff]   ;;  %v4984_v13 = vld [vmem:[%s6758_s22 + $0x60] sm:$0xff]   ;;  %v4987_v63 = vld [vmem:[%s6758_s22 + $0x28] sm:$0xff]  }
 0x62e   :  { %v2567_v22 = vsel %vm397_vm2, %v2561_v23, %v2562_v20  ;;  %v2552_v26 = vrot.slane %v2548_v25, 7  ;;  %v2555_v27 = vsel %vm376_vm5, %v2549_v61, %v2550_v49  ;;  %v2551_v28 = vrot.slane %v2547_v50, 7  ;;  %4492 = vmatprep.subr.bf16.mxu1 %v4980_v7  ;;  %v4988_v21 = vld [vmem:[%s6758_s22 + $0x70] sm:$0xff]   ;;  %v4990_v52 = vld [vmem:[%s6758_s22 + $0x78] sm:$0xff]  }
 0x62f   :  { %2911 = vmatprep.mubr.bf16.mxu0 %v2574_v24  ;;  %v2563_v29 = vrot.slane %v2547_v50, 1  ;;  %v2577_v30 = vpack.c.bf16 %v2548_v25, %v2547_v50  ;;  %v2564_v31 = vrot.slane %v2548_v25, 1  ;;  %v4989_v51 = vld [vmem:[%s6758_s22 + $0x30] sm:$0xff]  }
 0x630   :  { %v2556_v16 = vsel %vm376_vm5, %v2552_v26, %v2549_v61  ;;  %v2553_v53 = vsel %vm376_vm5, %v2551_v28, %v2552_v26  ;;  %v2554_v59 = vsel %vm376_vm5, %v2550_v49, %v2551_v28  ;;  %v4991_v61 = vld [vmem:[%s6758_s22 + $0x38] sm:$0xff]   ;;  %v4992_v49 = vld [vmem:[%s6758_s22 + $0xc0] sm:$0xff]  }
 0x631   :  { %v4238_v0 = vpack.c.bf16 %v2555_v27, %v2556_v16  ;;  %v2566_v19 = vsel %vm397_vm2, %v2562_v20, %v2563_v29  ;;  %v4241_v34 = vpack.c.bf16 %v2553_v53, %v2554_v59  ;;  %v2565_v35 = vsel %vm397_vm2, %v2563_v29, %v2564_v31  ;;  %4493 = vmatpush3.bf16.msra.mxu1 %v4981_v10  ;;  %v2627_v20 = vld [vmem:[%s6759_s19] sm:$0x3] }
 0x632   :  { %v4244_v37 = vpack.c.bf16 %v2566_v19, %v2567_v22  ;;  %v2568_v38 = vsel %vm397_vm2, %v2564_v31, %v2561_v23  ;;  %4494 = vmatprep.subr.bf16.mxu1 %v4982_v11  ;;  %v2632_v22 = vrot.slane %v2627_v20, %v5550_v36  ;;  %v2636_v26 = vrot.slane %v2627_v20, %v5556_v39 }
 0x633   :  { %4239 = vmatmul.mubr.msk.bf16.vlgmr.msra.gmra.mrb[44].mxu0 %vm5422_vm0, %v4238_v0  ;;  %v4247_v40 = vpack.c.bf16 %v2568_v38, %v2565_v35 }
 0x634   :  { %2933 = vmatpush1.bf16.msra.mxu0 %v4952_v32  ;;  %2921 = vmatprep.mubr.bf16.mxu0 %v2577_v30 }
 0x635   :  { %2934 = vmatprep.subr.bf16.mxu0 %v4957_v33  ;;  %4495 = vmatpush3.bf16.msra.mxu1 %v4983_v12 }
 0x636   :  { %4496 = vmatprep.subr.bf16.mxu1 %v4984_v13 }
 0x638   :  { %2935 = vmatpush1.bf16.msra.mxu0 %v4955_v41 }
 0x639   :  { %2936 = vmatprep.subr.bf16.mxu0 %v4960_v42  ;;  %4497 = vmatpush3.bf16.msra.mxu1 %v4985_v14 }
 0x63a   :  { %4498 = vmatprep.subr.bf16.mxu1 %v4986_v15 }
 0x63b   :  { %4242 = vmatmul.mubr.msk.bf16.gmra.mrb[48].mxu0 %vm5446_vm4, %v4241_v34 }
 0x63c   :  { %2937 = vmatpush1.bf16.msra.mxu0 %v4958_v43  ;;  %2964 = vmatprep.mubr.bf16.mxu0 %v5068_v8 }
 0x63d   :  { %2938 = vmatprep.subr.bf16.mxu0 %v4963_v47  ;;  %4499 = vmatpush3.bf16.msra.mxu1 %v4987_v63 }
 0x63e   :  { %4500 = vmatprep.subr.bf16.mxu1 %v4988_v21 }
 0x640   :  { %2939 = vmatpush1.bf16.msra.mxu0 %v4961_v44 }
 0x641   :  { %2940 = vmatprep.subr.bf16.mxu0 %v4966_v48  ;;  %4501 = vmatpush3.bf16.msra.mxu1 %v4989_v51 }
 0x642   :  { %4502 = vmatprep.subr.bf16.mxu1 %v4990_v52 }
 0x644   :  { %2941 = vmatpush1.bf16.msra.mxu0 %v4964_v56 }
 0x645   :  { %2942 = vmatprep.subr.bf16.mxu0 %v4969_v57  ;;  %4503 = vmatpush3.bf16.msra.mxu1 %v4991_v61 }
 0x646   :  { %4516 = vmatprep.subr.bf16.mxu1 %v4992_v49 }
 0x648   :  { %2943 = vmatpush1.bf16.msra.mxu0 %v4967_v58 }
 0x649   :  { %2944 = vmatprep.subr.bf16.mxu0 %v4972_v62 }
 0x64c   :  { %2945 = vmatpush1.bf16.msra.mxu0 %v4970_v45 }
 0x64d   :  { %2946 = vmatprep.subr.bf16.mxu0 %v4975_v46 }
 0x650   :  { %2947 = vmatpush1.bf16.msra.mxu0 %v4973_v1 }
 0x651   :  { %3861 = vmatprep.subr.bf16.mxu0 %v5026_v17 }
 0x653   :  { %4245 = vmatmul.mubr.msk.bf16.vlgmr.msra.gmra.mrb[44].mxu0 %vm5485_vm8, %v4244_v37 }
 0x654   :  { %2974 = vmatprep.mubr.bf16.mxu0 %v5068_v8 }
 0x65b   :  { %4248 = vmatmul.mubr.msk.bf16.gmra.mrb[48].mxu0 %vm5492_vm11, %v4247_v40 }
 0x65c   :  { %3893 = vmatprep.mubr.bf16.mxu0 %v5068_v8 }
 0x726   :  { %v2966_v23 = vpop.f32.mrb[44].mxu0 }
 0x727   :  { %v2968_v24 = vpop.f32.mrb[45].mxu0  ;;  %v6401_v29 = vadd.f32 %v2966_v23, %v2632_v22 }
 0x728   :  { %v2970_v25 = vpop.f32.mrb[46].mxu0  ;;  %v6403_v31 = vadd.f32 %v2968_v24, %v2636_v26 }
 0x729   :  { %v2972_v50 = vpop.f32.mrb[47].mxu0  ;;  %v6397_v27 = vadd.f32 %v2970_v25, %v2632_v22 }
 0x72a   :  { %v6399_v28 = vadd.f32 %v2972_v50, %v2636_v26 }
 0x72b   :  { %v2993_v53 = vadd.f32 %v6397_v27, %v6401_v29 }
 0x72c   :  { %v3002_v19 = vadd.f32 %v6399_v28, %v6403_v31 }
 0x72e   :  { %v2976_v30 = vpop.f32.mrb[48].mxu0 }
 0x72f   :  { %v6405_v32 = vadd.f32 %v2976_v30, %v2632_v22  ;;  %v2978_v16 = vpop.f32.mrb[49].mxu0 }
 0x730   :  { %v6409_v59 = vadd.f32 %v2978_v16, %v2636_v26  ;;  %v2980_v0 = vpop.f32.mrb[50].mxu0 }
 0x731   :  { %v2989_v33 = vsel %vm154_vm12, %v6405_v32, 0.0  ;;  %v6416_v34 = vadd.f32 %v2980_v0, %v2632_v22  ;;  %v2982_v35 = vpop.f32.mrb[51].mxu0 }
 0x732   :  { %v2994_v37 = vadd.f32 %v2993_v53, %v2989_v33  ;;  %v2990_v38 = vsel %vm154_vm12, %v6409_v59, 0.0  ;;  %v6421_v40 = vadd.f32 %v2982_v35, %v2636_v26 }
 0x733   :  { %v3003_v41 = vadd.f32 %v3002_v19, %v2990_v38 }
 0x734   :  { %v2996_v42 = vrot.slane %v2994_v37, 4 }
 0x735   :  { %v3005_v43 = vrot.slane %v3003_v41, 4 }
 0x736   :  { %v2997_v47 = vadd.f32 %v2996_v42, %v2994_v37 }
 0x737   :  { %v3006_v44 = vadd.f32 %v3005_v43, %v3003_v41 }
 0x738   :  { %v2998_v48 = vrot.slane %v2997_v47, 2 }
 0x739   :  { %v3007_v56 = vrot.slane %v3006_v44, 2 }
 0x73a   :  { %v2999_v57 = vadd.f32 %v2998_v48, %v2997_v47 }
 0x73b   :  { %v3008_v58 = vadd.f32 %v3007_v56, %v3006_v44  ;;  %v3057_v56 = vld [vmem:[%s6760_s20] sm:$0x3] }
 0x73c   :  { %v3000_v62 = vrot.slane %v2999_v57, 1 }
 0x73d   :  { %v3009_v45 = vrot.slane %v3008_v58, 1 }
 0x73e   :  { %v3001_v46 = vadd.f32 %v3000_v62, %v2999_v57 }
 0x73f   :  { %v3010_v1 = vadd.f32 %v3009_v45, %v3008_v58 }
 0x740   :  { %v3011_v2 = vmul.f32 0.055555556, %v3001_v46 }
 0x741   :  { %v3012_v4 = vmul.f32 0.055555556, %v3010_v1 }
 0x742   :  { %v3013_v6 = vsub.f32 %v6401_v29, %v3011_v2  ;;  %v3015_v3 = vsub.f32 %v6397_v27, %v3011_v2  ;;  %v3017_v7 = vsub.f32 %v6405_v32, %v3011_v2 }
 0x743   :  { %v3014_v10 = vsub.f32 %v6403_v31, %v3012_v4  ;;  %v3016_v11 = vsub.f32 %v6399_v28, %v3012_v4  ;;  %v3018_v12 = vsub.f32 %v6409_v59, %v3012_v4 }
 0x744   :  { %v3025_v13 = vsel %vm154_vm12, %v3017_v7, 0.0  ;;  %v3029_v14 = vmul.f32 %v3013_v6, %v3013_v6  ;;  %v3031_v15 = vmul.f32 %v3015_v3, %v3015_v3 }
 0x745   :  { %v3033_v63 = vmul.f32 %v3025_v13, %v3025_v13  ;;  %v3026_v21 = vsel %vm154_vm12, %v3018_v12, 0.0  ;;  %v3030_v51 = vmul.f32 %v3014_v10, %v3014_v10  ;;  %v3032_v52 = vmul.f32 %v3016_v11, %v3016_v11  ;;  %v3081_v12 = vld [vmem:[%s6761_s21] sm:$0x3] }
 0x746   :  { %v3037_v61 = vadd.f32 %v3031_v15, %v3029_v14  ;;  %v3034_v49 = vmul.f32 %v3026_v21, %v3026_v21 }
 0x747   :  { %v3046_v23 = vadd.f32 %v3032_v52, %v3030_v51 }
 0x748   :  { %v3038_v20 = vadd.f32 %v3037_v61, %v3033_v63 }
 0x749   :  { %v3047_v24 = vadd.f32 %v3046_v23, %v3034_v49 }
 0x74a   :  { %v3040_v25 = vrot.slane %v3038_v20, 4 }
 0x74b   :  { %v3049_v50 = vrot.slane %v3047_v24, 4 }
 0x74c   :  { %v3041_v22 = vadd.f32 %v3040_v25, %v3038_v20 }
 0x74d   :  { %v3050_v26 = vadd.f32 %v3049_v50, %v3047_v24 }
 0x74e   :  { %v3042_v30 = vrot.slane %v3041_v22, 2 }
 0x74f   :  { %v3051_v16 = vrot.slane %v3050_v26, 2 }
 0x750   :  { %v3043_v53 = vadd.f32 %v3042_v30, %v3041_v22 }
 0x751   :  { %v3052_v0 = vadd.f32 %v3051_v16, %v3050_v26 }
 0x752   :  { %v3044_v19 = vrot.slane %v3043_v53, 1 }
 0x753   :  { %v3053_v33 = vrot.slane %v3052_v0, 1 }
 0x754   :  { %v3045_v35 = vadd.f32 %v3044_v19, %v3043_v53 }
 0x755   :  { %v3054_v60 = vadd.f32 %v3053_v33, %v3052_v0 }
 0x756   :  { %v3055_v37 = vmul.f32 0.055555556, %v3045_v35 }
 0x757   :  { %v3056_v38 = vmul.f32 0.055555556, %v3054_v60 }
 0x758   :  { %v3058_v41 = vadd.f32 1e-05, %v3055_v37 }
 0x759   :  { %v3059_v42 = vadd.f32 1e-05, %v3056_v38 }
 0x75a   :  { %5064 = vrsqrt.f32 %v3058_v41 }
 0x75b   :  { %5066 = vrsqrt.f32 %v3059_v42 }
 0x764   :  { %v5065_v43 = vpop.eup %5064 }
 0x765   :  { %v5067_v47 = vpop.eup %5066 }
 0x766   :  { %v3064_v44 = vcombine.low %v5065_v43, %v5067_v47 }
 0x768   :  { %v3071_v48 = vrot.slane %v3064_v44, %v5598_v9 }
 0x76a   :  { %v3078_v57 = vrot.slane %v3071_v48, %v5598_v9 }
 0x76c   :  { %v3080_v58 = vmul.f32 %v3078_v57, %v3057_v56 }
 0x76e   :  { %v3086_v62 = vrot.slane %v3080_v58, %v5550_v36  ;;  %v3090_v45 = vrot.slane %v3080_v58, %v5556_v39 }
 0x770   :  { %v3093_v46 = vmul.f32 %v3086_v62, %v3011_v2  ;;  %v3094_v1 = vmul.f32 %v3090_v45, %v3012_v4  ;;  %v3119_v6 = vmul.f32 %v6409_v59, %v3090_v45  ;;  %v3120_v3 = vmul.f32 %v6416_v34, %v3086_v62 }
 0x771   :  { %v3121_v7 = vmul.f32 %v6421_v40, %v3090_v45  ;;  %v3114_v2 = vmul.f32 %v6401_v29, %v3086_v62  ;;  %v3116_v59 = vmul.f32 %v6397_v27, %v3086_v62  ;;  %v3115_v40 = vmul.f32 %v6403_v31, %v3090_v45 }
 0x772   :  { %v3097_v10 = vcombine.low %v3093_v46, %v3094_v1  ;;  %v3117_v4 = vmul.f32 %v6399_v28, %v3090_v45  ;;  %v3118_v23 = vmul.f32 %v6405_v32, %v3086_v62 }
 0x774   :  { %v3104_v11 = vrot.slane %v3097_v10, %v5598_v9 }
 0x776   :  { %v3111_v13 = vrot.slane %v3104_v11, %v5598_v9  ;;  %v4993_v11 = vld [vmem:[%s6758_s22 + $0x80] sm:$0xff]  }
 0x778   :  { %v3113_v14 = vsub.f32 %v3081_v12, %v3111_v13 }
 0x77a   :  { %v3130_v15 = vrot.slane %v3113_v14, %v5556_v39  ;;  %v3126_v34 = vrot.slane %v3113_v14, %v5550_v36 }
 0x77c   :  { %v3138_v63 = vadd.f32 %v3130_v15, %v3119_v6  ;;  %v3133_v21 = vadd.f32 %v3126_v34, %v3114_v2  ;;  %v3135_v51 = vadd.f32 %v3126_v34, %v3116_v59  ;;  %v3139_v52 = vadd.f32 %v3126_v34, %v3120_v3 }
 0x77d   :  { %v3140_v61 = vadd.f32 %v3130_v15, %v3121_v7  ;;  %v3134_v49 = vadd.f32 %v3130_v15, %v3115_v40  ;;  %v3136_v9 = vadd.f32 %v3130_v15, %v3117_v4  ;;  %v3137_v20 = vadd.f32 %v3126_v34, %v3118_v23  ;;  %v4994_v15 = vld [vmem:[%s6758_s22 + $0xc8] sm:$0xff]  }
 0x77e   :  { %vm3146_vm12 = vcmp.ge.f32.partialorder %v3138_v63, 0.0  ;;  %v3154_v39 = vmul.f32 0.2, %v3138_v63  ;;  %vm3141_vm9 = vcmp.ge.f32.partialorder %v3133_v21, 0.0  ;;  %vm3143_vm10 = vcmp.ge.f32.partialorder %v3135_v51, 0.0 }
 0x77f   :  { %vm3147_vm13 = vcmp.ge.f32.partialorder %v3139_v52, 0.0  ;;  %v3149_v27 = vmul.f32 0.2, %v3133_v21  ;;  %v3151_v36 = vmul.f32 0.2, %v3135_v51  ;;  %vm3148_vm14 = vcmp.ge.f32.partialorder %v3140_v61, 0.0 }
 0x780   :  { %v6455_v29 = vsel %vm3146_vm12, %v3138_v63, %v3154_v39  ;;  %v3155_v28 = vmul.f32 0.2, %v3139_v52  ;;  %v3156_v31 = vmul.f32 0.2, %v3140_v61  ;;  %vm3142_vm15 = vcmp.ge.f32.partialorder %v3134_v49, 0.0  ;;  %v4996_v39 = vld [vmem:[%s6758_s22 + $0xd0] sm:$0xff]  }
 0x781   :  { %v6457_v24 = vsel %vm3141_vm9, %v3133_v21, %v3149_v27  ;;  %v6459_v25 = vsel %vm3143_vm10, %v3135_v51, %v3151_v36  ;;  %v3150_v50 = vmul.f32 0.2, %v3134_v49  ;;  %vm3144_vm1 = vcmp.ge.f32.partialorder %v3136_v9, 0.0 }
 0x782   :  { %v6461_v32 = vsel %vm3147_vm13, %v3139_v52, %v3155_v28  ;;  %v3165_v22 = vrot.slane %v6457_v24, 7  ;;  %v3167_v26 = vrot.slane %v6459_v25, 7  ;;  %v6465_v30 = vsel %vm3148_vm14, %v3140_v61, %v3156_v31  ;;  %v4998_v31 = vld [vmem:[%s6758_s22 + $0xd8] sm:$0xff]  }
 0x783   :  { %v3171_v16 = vrot.slane %v6461_v32, 7  ;;  %v3172_v53 = vrot.slane %v6465_v30, 7  ;;  %v3152_v19 = vmul.f32 0.2, %v3136_v9  ;;  %v3158_v33 = vsel %vm3142_vm15, %v3134_v49, %v3150_v50  ;;  %v4999_v50 = vld [vmem:[%s6758_s22 + $0x98] sm:$0xff]  }
 0x784   :  { %v3177_v0 = vsel %vm376_vm5, %v3165_v22, %v3167_v26  ;;  %v3170_v35 = vrot.slane %v6455_v29, 7  ;;  %v3166_v37 = vrot.slane %v3158_v33, 7  ;;  %vm3145_vm3 = vcmp.ge.f32.partialorder %v3137_v20, 0.0 }
 0x785   :  { %v3179_v60 = vsel %vm376_vm5, %v3171_v16, %v3165_v22  ;;  %v3153_v38 = vmul.f32 0.2, %v3137_v20  ;;  %v3195_v41 = vrot.slane %v6461_v32, 1  ;;  %v3160_v43 = vsel %vm3144_vm1, %v3136_v9, %v3152_v19  ;;  %v5000_v22 = vld [vmem:[%s6758_s22 + $0xe0] sm:$0xff]   ;;  %v5006_v19 = vld [vmem:[%s6758_s22 + $0xf8] sm:$0xff]  }
 0x786   :  { %v4302_v42 = vpack.c.bf16 %v3177_v0, %v3179_v60  ;;  %v3174_v47 = vsel %vm376_vm5, %v3170_v35, %v3172_v53  ;;  %v3196_v44 = vrot.slane %v6465_v30, 1  ;;  %v3168_v48 = vrot.slane %v3160_v43, 7  ;;  %v5005_v0 = vld [vmem:[%s6758_s22 + $0xb0] sm:$0xff]   ;;  %v5009_v60 = vld [vmem:[%s6758_s22 + $0x100] sm:$0xff]  }
 0x787   :  { %v3180_v56 = vsel %vm376_vm5, %v3172_v53, %v3166_v37  ;;  %v6480_v57 = vsel %vm3145_vm3, %v3137_v20, %v3153_v38  ;;  %v3222_v45 = vpack.c.bf16 %v6465_v30, %v6455_v29  ;;  %v3190_v3 = vrot.slane %v3158_v33, 1  ;;  %v5004_v53 = vld [vmem:[%s6758_s22 + $0xf0] sm:$0xff]   ;;  %v5010_v38 = vld [vmem:[%s6758_s22 + $0x148] sm:$0xff]   ;;  %v5015_v30 = vld [vmem:[%s6758_s22 + $0x118] sm:$0xff]  }
 0x788   :  { %v3169_v58 = vrot.slane %v6480_v57, 7  ;;  %v3193_v62 = vrot.slane %v6480_v57, 1  ;;  %v3221_v46 = vpack.c.bf16 %v6461_v32, %v6480_v57  ;;  %v3178_v1 = vsel %vm376_vm5, %v3166_v37, %v3168_v48  ;;  %v5018_v32 = vld [vmem:[%s6758_s22 + $0x168] sm:$0xff]   ;;  %v5023_v57 = vld [vmem:[%s6758_s22 + $0x138] sm:$0xff]  }
 0x789   :  { %v3176_v6 = vsel %vm376_vm5, %v3168_v48, %v3170_v35  ;;  %v3192_v7 = vrot.slane %v3160_v43, 1  ;;  %v4299_v10 = vpack.c.bf16 %v3178_v1, %v3180_v56  ;;  %v3194_v59 = vrot.slane %v6455_v29, 1  ;;  %v5008_v35 = vld [vmem:[%s6758_s22 + $0x140] sm:$0xff]   ;;  %v5014_v29 = vld [vmem:[%s6758_s22 + $0x158] sm:$0xff]   ;;  %v5021_v48 = vld [vmem:[%s6758_s22 + $0x130] sm:$0xff]  }
 0x78a   :  { %v4305_v12 = vpack.c.bf16 %v3174_v47, %v3176_v6  ;;  %v3173_v13 = vsel %vm376_vm5, %v3169_v58, %v3171_v16  ;;  %v3175_v14 = vsel %vm376_vm5, %v3167_v26, %v3169_v58  ;;  %v3189_v40 = vrot.slane %v6457_v24, 1  ;;  %v5001_v26 = vld [vmem:[%s6758_s22 + $0xa0] sm:$0xff]   ;;  %v5003_v16 = vld [vmem:[%s6758_s22 + $0xa8] sm:$0xff]   ;;  %v5022_v56 = vld [vmem:[%s6758_s22 + $0x178] sm:$0xff]  }
 0x78b   :  { %v4308_v2 = vpack.c.bf16 %v3173_v13, %v3175_v14  ;;  %v6505_v34 = vsel %vm397_vm2, %v3190_v3, %v3192_v7  ;;  %4300 = vmatprep.mubr.msk.bf16.mxu1 %vm5422_vm0, %v4299_v10  ;;  %v3191_v4 = vrot.slane %v6459_v25, 1  ;;  %v6513_v63 = vsel %vm397_vm2, %v3196_v44, %v3190_v3  ;;  %v5019_v47 = vld [vmem:[%s6758_s22 + $0x128] sm:$0xff]   ;;  %v5033_v1 = vld [vmem:[%s6762_s24 + $0x30] ss:$8 sps:$4 sm:$0xff]   ;;  %v5047_v14 = vld [vmem:[%s6762_s24 + $0x74] ss:$8 sps:$4 sm:$0xff]  }
 0x78c   :  { %v6517_v21 = vsel %vm397_vm2, %v3193_v62, %v3195_v41  ;;  %4303 = vmatmul.mubr.msk.bf16.vlgmr.msra.gmra.mrb[16].mxu1 %vm5422_vm0, %v4302_v42  ;;  %v3200_v51 = vsel %vm397_vm2, %v3192_v7, %v3194_v59  ;;  %v6525_v52 = vsel %vm397_vm2, %v3194_v59, %v3196_v44  ;;  %v6529_v61 = vsel %vm397_vm2, %v3195_v41, %v3189_v40  ;;  %v5011_v41 = vld [vmem:[%s6758_s22 + $0x108] sm:$0xff]   ;;  %v5016_v42 = vld [vmem:[%s6758_s22 + $0x160] sm:$0xff]   ;;  %v5020_v44 = vld [vmem:[%s6758_s22 + $0x170] sm:$0xff]  }
 0x78d   :  { %4517 = vmatpush3.bf16.msra.mxu1 %v4993_v11  ;;  %4306 = vmatprep.mubr.msk.bf16.mxu1 %vm5446_vm4, %v4305_v12  ;;  %v4311_v49 = vpack.c.bf16 %v3200_v51, %v6505_v34  ;;  %v6539_v9 = vsel %vm397_vm2, %v3191_v4, %v3193_v62  ;;  %v6543_v23 = vsel %vm397_vm2, %v3189_v40, %v3191_v4  ;;  %v5024_v58 = vld [vmem:[%s6762_s24] ss:$8 sps:$4 sm:$0xff]   ;;  %v5029_v62 = vld [vmem:[%s6762_s24 + $0x14] ss:$8 sps:$4 sm:$0xff]   ;;  %v5038_v6 = vld [vmem:[%s6762_s24 + $0x44] ss:$8 sps:$4 sm:$0xff]  }
 0x78e   :  { %4518 = vmatprep.subr.bf16.mxu1 %v4994_v15  ;;  %v4314_v27 = vpack.c.bf16 %v6539_v9, %v6543_v23  ;;  %v4317_v36 = vpack.c.bf16 %v6513_v63, %v6525_v52  ;;  %v4320_v28 = vpack.c.bf16 %v6529_v61, %v6517_v21  ;;  %v3216_v20 = vpack.c.bf16 %v3160_v43, %v3158_v33  ;;  %v5007_v33 = vld [vmem:[%s6758_s22 + $0xb8] sm:$0xff]   ;;  %v5017_v43 = vld [vmem:[%s6758_s22 + $0x120] sm:$0xff]  }
 0x78f   :  { %v3215_v37 = vpack.c.bf16 %v6459_v25, %v6457_v24  ;;  %v5012_v24 = vld [vmem:[%s6758_s22 + $0x150] sm:$0xff]   ;;  %3862 = vmatpush1.bf16.msra.mxu0 %v5024_v58  ;;  %v5036_v3 = vld [vmem:[%s6762_s24 + $0x40] ss:$8 sps:$4 sm:$0xff]   ;;  %v5044_v12 = vld [vmem:[%s6762_s24 + $0x64] ss:$8 sps:$4 sm:$0xff]  }
 0x790   :  { %v5013_v25 = vld [vmem:[%s6758_s22 + $0x110] sm:$0xff]   ;;  %3863 = vmatprep.subr.bf16.mxu0 %v5029_v62  ;;  %v5042_v11 = vld [vmem:[%s6762_s24 + $0x60] ss:$8 sps:$4 sm:$0xff]  }
 0x791   :  { %4519 = vmatpush3.bf16.msra.mxu1 %v4995_v55  ;;  %v5041_v7 = vld [vmem:[%s6762_s24 + $0x54] ss:$8 sps:$4 sm:$0xff]   ;;  %v5039_v10 = vld [vmem:[%s6762_s24 + $0x50] ss:$8 sps:$4 sm:$0xff]  }
 0x792   :  { %4520 = vmatprep.subr.bf16.mxu1 %v4996_v39  ;;  %v5045_v13 = vld [vmem:[%s6762_s24 + $0x70] ss:$8 sps:$4 sm:$0xff]  }
 0x793   :  { %3864 = vmatpush1.bf16.msra.mxu0 %v5027_v18 }
 0x794   :  { %4309 = vmatmul.mubr.msk.bf16.gmra.mrb[20].mxu1 %vm5446_vm4, %v4308_v2 }
 0x795   :  { %4521 = vmatpush3.bf16.msra.mxu1 %v4997_v54  ;;  %3697 = vmatprep.mubr.bf16.mxu1 %v3216_v20 }
 0x796   :  { %4522 = vmatprep.subr.bf16.mxu1 %v4998_v31 }
 0x799   :  { %4523 = vmatpush3.bf16.msra.mxu1 %v4999_v50 }
 0x79a   :  { %4524 = vmatprep.subr.bf16.mxu1 %v5000_v22 }
 0x79d   :  { %4525 = vmatpush3.bf16.msra.mxu1 %v5001_v26 }
 0x79e   :  { %4526 = vmatprep.subr.bf16.mxu1 %v5002_v5 }
 0x7a1   :  { %4527 = vmatpush3.bf16.msra.mxu1 %v5003_v16 }
 0x7a2   :  { %4528 = vmatprep.subr.bf16.mxu1 %v5004_v53 }
 0x7a5   :  { %4529 = vmatpush3.bf16.msra.mxu1 %v5005_v0 }
 0x7a6   :  { %4530 = vmatprep.subr.bf16.mxu1 %v5006_v19 }
 0x7a9   :  { %4531 = vmatpush3.bf16.msra.mxu1 %v5007_v33 }
 0x7aa   :  { %4544 = vmatprep.subr.bf16.mxu1 %v5008_v35 }
 0x7ac   :  { %3698 = vmatmul.mubr.bf16.vlgmr.msra.gmra.mrb[24].mxu1 %v3215_v37 }
 0x7ad   :  { %3705 = vmatprep.mubr.bf16.mxu1 %v3222_v45  ;;  %4545 = vmatpush3.bf16.msra.mxu1 %v5009_v60  ;;  %v5030_v45 = vld [vmem:[%s6762_s24 + $0x20] ss:$8 sps:$4 sm:$0xff]  }
 0x7ae   :  { %4546 = vmatprep.subr.bf16.mxu1 %v5010_v38 }
 0x7b1   :  { %4547 = vmatpush3.bf16.msra.mxu1 %v5011_v41 }
 0x7b2   :  { %4548 = vmatprep.subr.bf16.mxu1 %v5012_v24 }
 0x7b4   :  { %3706 = vmatmul.mubr.bf16.gmra.mrb[28].mxu1 %v3221_v46  ;;  %v5035_v46 = vld [vmem:[%s6762_s24 + $0x34] ss:$8 sps:$4 sm:$0xff]  }
 0x7b5   :  { %4549 = vmatpush3.bf16.msra.mxu1 %v5013_v25  ;;  %4312 = vmatprep.mubr.msk.bf16.mxu1 %vm5485_vm8, %v4311_v49  ;;  %v4249_v49 = vld [vmem:[%s6763_s23] ss:$0 sm:$0xff] }
 0x7b6   :  { %4550 = vmatprep.subr.bf16.mxu1 %v5014_v29 }
 0x7b9   :  { %4551 = vmatpush3.bf16.msra.mxu1 %v5015_v30 }
 0x7ba   :  { %4552 = vmatprep.subr.bf16.mxu1 %v5016_v42 }
 0x7bd   :  { %4553 = vmatpush3.bf16.msra.mxu1 %v5017_v43 }
 0x7be   :  { %4554 = vmatprep.subr.bf16.mxu1 %v5018_v32 }
 0x7c1   :  { %4555 = vmatpush3.bf16.msra.mxu1 %v5019_v47 }
 0x7c2   :  { %4556 = vmatprep.subr.bf16.mxu1 %v5020_v44 }
 0x7c5   :  { %4557 = vmatpush3.bf16.msra.mxu1 %v5021_v48 }
 0x7c6   :  { %4558 = vmatprep.subr.bf16.mxu1 %v5022_v56 }
 0x7c9   :  { %4559 = vmatpush3.bf16.msra.mxu1 %v5023_v57 }
 0x7ca   :  { %4592 = vmatprep.subr.bf16.mxu1 %v5026_v17 }
 0x7cc   :  { %4315 = vmatmul.mubr.msk.bf16.vlgmr.msra.gmra.mrb[32].mxu1 %vm5485_vm8, %v4314_v27 }
 0x7cd   :  { %4318 = vmatprep.mubr.msk.bf16.mxu1 %vm5492_vm11, %v4317_v36  ;;  %4600 = vmatpush1.bf16.msra.mxu1 %v5024_v58 }
 0x7ce   :  { %4593 = vmatprep.subr.bf16.mxu1 %v5029_v62 }
 0x7d1   :  { %4601 = vmatpush1.bf16.msra.mxu1 %v5027_v18 }
 0x7d4   :  { %4321 = vmatmul.mubr.msk.bf16.gmra.mrb[36].mxu1 %vm5492_vm11, %v4320_v28 }
 0x7d5   :  { %3903 = vmatprep.mubr.bf16.mxu1 %v5068_v8  ;;  %v5032_v8 = vld [vmem:[%s6762_s24 + $0x24] ss:$8 sps:$4 sm:$0xff]  }
 0x7d6   :  { %3865 = vmatprep.subr.bf16.mxu0 %v5032_v8  ;;  %4594 = vmatprep.subr.bf16.mxu1 %v5032_v8 }
 0x7d7   :  { %3866 = vmatpush1.bf16.msra.mxu0 %v5030_v45  ;;  %4602 = vmatpush1.bf16.msra.mxu1 %v5030_v45 }
 0x7d8   :  { %3867 = vmatprep.subr.bf16.mxu0 %v5035_v46  ;;  %4595 = vmatprep.subr.bf16.mxu1 %v5035_v46 }
 0x7db   :  { %3868 = vmatpush1.bf16.msra.mxu0 %v5033_v1  ;;  %4603 = vmatpush1.bf16.msra.mxu1 %v5033_v1 }
 0x7dc   :  { %3869 = vmatprep.subr.bf16.mxu0 %v5038_v6  ;;  %4596 = vmatprep.subr.bf16.mxu1 %v5038_v6 }
 0x7df   :  { %3870 = vmatpush1.bf16.msra.mxu0 %v5036_v3  ;;  %4604 = vmatpush1.bf16.msra.mxu1 %v5036_v3 }
 0x7e0   :  { %3871 = vmatprep.subr.bf16.mxu0 %v5041_v7  ;;  %4597 = vmatprep.subr.bf16.mxu1 %v5041_v7 }
 0x7e3   :  { %3872 = vmatpush1.bf16.msra.mxu0 %v5039_v10  ;;  %4605 = vmatpush1.bf16.msra.mxu1 %v5039_v10 }
 0x7e4   :  { %3873 = vmatprep.subr.bf16.mxu0 %v5044_v12  ;;  %4598 = vmatprep.subr.bf16.mxu1 %v5044_v12 }
 0x7e7   :  { %3874 = vmatpush1.bf16.msra.mxu0 %v5042_v11  ;;  %4606 = vmatpush1.bf16.msra.mxu1 %v5042_v11 }
 0x7e8   :  { %3875 = vmatprep.subr.bf16.mxu0 %v5047_v14  ;;  %4599 = vmatprep.subr.bf16.mxu1 %v5047_v14 }
 0x7eb   :  { %3876 = vmatpush1.bf16.msra.mxu0 %v5045_v13  ;;  %4607 = vmatpush1.bf16.msra.mxu1 %v5045_v13 }
 0x85f   :  { %v4504_v15 = vpop.f32.mrb[16].mxu1 }
 0x860   :  { %v4505_v2 = vpop.f32.mrb[17].mxu1 }
 0x861   :  { %v4506_v59 = vadd.f32 %v4505_v2, %v4504_v15  ;;  %v4507_v34 = vpop.f32.mrb[18].mxu1 }
 0x862   :  { %v4508_v40 = vpop.f32.mrb[19].mxu1 }
 0x863   :  { %v4509_v4 = vadd.f32 %v4508_v40, %v4507_v34  ;;  %v3651_v39 = vadd.f32 %v4506_v59, %v4249_v49 }
 0x865   :  { %v3654_v54 = vadd.f32 %v4509_v4, %v4249_v49 }
 0x867   :  { %v4510_v63 = vpop.f32.mrb[20].mxu1 }
 0x868   :  { %v4511_v21 = vpop.f32.mrb[21].mxu1 }
 0x869   :  { %v4512_v51 = vadd.f32 %v4511_v21, %v4510_v63  ;;  %v4513_v52 = vpop.f32.mrb[22].mxu1 }
 0x86a   :  { %v4514_v61 = vpop.f32.mrb[23].mxu1 }
 0x86b   :  { %v4515_v55 = vadd.f32 %v4514_v61, %v4513_v52  ;;  %v3659_v5 = vadd.f32 %v4512_v51, %v4249_v49 }
 0x86d   :  { %v3662_v19 = vadd.f32 %v4515_v55, %v4249_v49 }
 0x87f   :  { %v4532_v9 = vpop.f32.mrb[24].mxu1 }
 0x880   :  { %v4533_v23 = vpop.f32.mrb[25].mxu1 }
 0x881   :  { %v4534_v27 = vadd.f32 %v4533_v23, %v4532_v9  ;;  %v4535_v36 = vpop.f32.mrb[26].mxu1 }
 0x882   :  { %v4536_v28 = vpop.f32.mrb[27].mxu1 }
 0x883   :  { %v3700_v31 = vadd.f32 %v4534_v27, %v3651_v39  ;;  %v4537_v20 = vadd.f32 %v4536_v28, %v4535_v36 }
 0x885   :  { %v3703_v50 = vadd.f32 %v4537_v20, %v3654_v54 }
 0x887   :  { %v4538_v22 = vpop.f32.mrb[28].mxu1 }
 0x888   :  { %v4539_v26 = vpop.f32.mrb[29].mxu1 }
 0x889   :  { %v4540_v16 = vadd.f32 %v4539_v26, %v4538_v22  ;;  %v4541_v53 = vpop.f32.mrb[30].mxu1 }
 0x88a   :  { %v4542_v0 = vpop.f32.mrb[31].mxu1 }
 0x88b   :  { %v3708_v33 = vadd.f32 %v4540_v16, %v3659_v5  ;;  %v4543_v35 = vadd.f32 %v4542_v0, %v4541_v53 }
 0x88d   :  { %v3711_v60 = vadd.f32 %v4543_v35, %v3662_v19 }
 0x89f   :  { %v4560_v37 = vpop.f32.mrb[32].mxu1 }
 0x8a0   :  { %v4561_v38 = vpop.f32.mrb[33].mxu1 }
 0x8a1   :  { %v4562_v41 = vadd.f32 %v4561_v38, %v4560_v37  ;;  %v4563_v24 = vpop.f32.mrb[34].mxu1 }
 0x8a2   :  { %v4564_v25 = vpop.f32.mrb[35].mxu1 }
 0x8a3   :  { %v3749_v29 = vadd.f32 %v4562_v41, %v3700_v31  ;;  %v4565_v30 = vadd.f32 %v4564_v25, %v4563_v24 }
 0x8a5   :  { %v3752_v42 = vadd.f32 %v4565_v30, %v3703_v50 }
 0x8a7   :  { %v3763_v43 = vpack.c.bf16 %v3752_v42, %v3749_v29  ;;  %v4566_v32 = vpop.f32.mrb[36].mxu1 }
 0x8a8   :  { %v4567_v47 = vpop.f32.mrb[37].mxu1 }
 0x8a9   :  { %v4568_v44 = vadd.f32 %v4567_v47, %v4566_v32  ;;  %v4569_v48 = vpop.f32.mrb[38].mxu1  ;;  %3894 = vmatmul.mubr.bf16.vlgmr.msra.gmra.mrb[52].mxu0 %v3763_v43 }
 0x8aa   :  { %v4570_v56 = vpop.f32.mrb[39].mxu1 }
 0x8ab   :  { %v3757_v57 = vadd.f32 %v4568_v44, %v3708_v33  ;;  %v4571_v58 = vadd.f32 %v4570_v56, %v4569_v48 }
 0x8ad   :  { %v3760_v17 = vadd.f32 %v4571_v58, %v3711_v60 }
 0x8af   :  { %v3764_v62 = vpack.c.bf16 %v3760_v17, %v3757_v57 }
 0x8b1   :  { %3904 = vmatmul.mubr.bf16.vlgmr.msra.gmra.mrb[40].mxu1 %v3764_v62 }
 0x97c   :  { %v3895_v18 = vpop.f32.mrb[52].mxu0 }
 0x97d   :  { %3914 = vst [vmem:[%s6764_s25] sm:$0xff] %v3895_v18  ;;  %v3897_v8 = vpop.f32.mrb[53].mxu0 }
 0x97e   :  { %3915 = vst [vmem:[%s6764_s25 + $0x8] sm:$0xff] %v3897_v8  ;;  %v3899_v45 = vpop.f32.mrb[54].mxu0 }
 0x97f   :  { %3916 = vst [vmem:[%s6764_s25 + $0x10] sm:$0xff] %v3899_v45  ;;  %v3901_v46 = vpop.f32.mrb[55].mxu0 }
 0x980   :  { %3917 = vst [vmem:[%s6764_s25 + $0x18] sm:$0xff] %v3901_v46 }
 0x984   :  { %v3905_v1 = vpop.f32.mrb[40].mxu1 }
 0x985   :  { %3918 = vst [vmem:[%s6764_s25 + $0x20] sm:$0xff] %v3905_v1  ;;  %v3907_v6 = vpop.f32.mrb[41].mxu1 }
 0x986   :  { %3919 = vst [vmem:[%s6764_s25 + $0x28] sm:$0xff] %v3907_v6  ;;  %v3909_v3 = vpop.f32.mrb[42].mxu1 }
 0x987   :  { %3920 = vst [vmem:[%s6764_s25 + $0x30] sm:$0xff] %v3909_v3  ;;  %v3911_v7 = vpop.f32.mrb[43].mxu1 }
 0x988   :  { %3921 = vst [vmem:[%s6764_s25 + $0x38] sm:$0xff] %v3911_v7 }

</bundles_post_ra>
